<compile_context>
chip_gen: v6e
topology: v6e:2x2x1
jax: 0.10.0
libtpu: 0.0.40
codegen_flags: <defaults>
</compile_context>

<pallas_src>
import functools
import math

import jax
import jax.numpy as jnp
from jax import lax
from jax.experimental import pallas as pl
from jax.experimental.pallas import tpu as pltpu


def _round_up(x, m):
    return ((x + m - 1) // m) * m


def _fused_conv3d_kernel(w_ref, b_ref, x_ref, o_ref, buf_a, buf_b, *,
                         stages, t_k, group, height, width, acc_chunk):
    # w_ref : SMEM (stages*t_k*9,)  flattened weights, [s][dt][kh][kw] row-major
    # b_ref : SMEM (stages,)        biases
    # x_ref : VMEM (T, Hp, Lp)      zero-padded, batch-folded input planes of this group
    # o_ref : VMEM (Hp, Lp)         final padded plane (sigmoid applied)
    # buf_a : VMEM (tA, Hp, Lp)     ping buffer (stage 0, 2, ... outputs)
    # buf_b : VMEM (tB, Hp, Lp)     pong buffer (stage 1, 3, ... outputs)
    #
    # Layout: lane axis packs the group's batch elements side by side, each as a
    # zero-padded (W+2)-wide segment; Lp is a multiple of 128 (slack lanes are zero).
    # Hp = H+2 rounded up to 8.  3x3 spatial taps are XLU rolls of the full padded
    # plane; roll wrap-around only ever lands in pad rows / pad lanes, which are kept
    # exactly zero for every stage, so "same" padding is exact.
    T0, Hp, Lp = x_ref.shape
    G, H, W = group, height, width
    Wseg = W + 2
    f32 = jnp.float32

    # Interior mask (1.0 at real pixels, 0.0 at pad rows / pad cols / slack lanes),
    # built once per grid step.  The OR chain runs over the per-block group size G
    # (<= 128 // (W+2)), not the full batch, so it stays tiny after the grid change.
    row = lax.broadcasted_iota(jnp.int32, (Hp, Lp), 0)
    col = lax.broadcasted_iota(jnp.int32, (Hp, Lp), 1)
    row_ok = jnp.logical_and(row >= 1, row <= H)
    col_ok = None
    for g in range(G):
        lo = g * Wseg + 1
        seg_ok = jnp.logical_and(col >= lo, col <= lo + W - 1)
        col_ok = seg_ok if col_ok is None else jnp.logical_or(col_ok, seg_ok)
    mask = jnp.logical_and(row_ok, col_ok).astype(f32)

    def widx(s, dt, kh, kw):
        return ((s * t_k + dt) * 3 + kh) * 3 + kw

    bufs = (buf_a, buf_b)
    for s in range(stages):
        t_in = T0 - s * (t_k - 1)
        t_out = t_in - (t_k - 1)
        last = (s == stages - 1)
        src = None if s == 0 else bufs[(s - 1) % 2]
        dst = None if last else bufs[s % 2]

        # Hoist all SMEM weight reads for this stage (exactly 9*t_k scalar loads).
        ws = [[[w_ref[widx(s, dt, kh, kw)] for kw in range(3)]
               for kh in range(3)] for dt in range(t_k)]
        # Bias broadcast hoisted once per stage.
        bias_plane = jnp.full((Hp, Lp), b_ref[s], dtype=f32)

        # Output planes in chunks of `acc_chunk` to bound live accumulator vregs.
        for c0 in range(0, t_out, acc_chunk):
            c1 = min(t_out, c0 + acc_chunk)
            accs = [bias_plane for _ in range(c0, c1)]
            # Iterate over the input planes feeding this chunk: each plane is loaded
            # once, its 9 shifted taps are built once (XLU rolls — separate VLIW slot
            # from the VALU MAC chain) and reused by every output plane it feeds.
            for t in range(c0, c1 + t_k - 1):
                xt = x_ref[t] if s == 0 else src[t]
                lsh = (pltpu.roll(xt, 1, axis=1),        # kw = 0  (shift +1 lanes)
                       xt,                               # kw = 1
                       pltpu.roll(xt, Lp - 1, axis=1))   # kw = 2  (shift -1 lanes)
                lo = max(c0, t - (t_k - 1))
                hi = min(c1 - 1, t)
                for kh in range(3):
                    for kw in range(3):
                        if kh == 1:
                            p = lsh[kw]
                        else:
                            p = pltpu.roll(lsh[kw], 1 if kh == 0 else Hp - 1, axis=0)
                        for to in range(lo, hi + 1):
                            dt = t - to
                            accs[to - c0] = accs[to - c0] + ws[dt][kh][kw] * p
            if last:
                # Final stage (t_out == 1 by the module precondition): sigmoid + one
                # full-width unmasked store.
                o_ref[...] = jax.nn.sigmoid(accs[0])
            else:
                for to in range(c0, c1):
                    # Re-mask so pad rows/cols/slack lanes are exactly zero for the
                    # next stage's rolls.
                    dst[to] = accs[to - c0] * mask


def conv3d_forward(x, params, height, width, *, vmem_budget_bytes=48 * 1024 * 1024):
    """Full Conv3D module forward: fused stage chain + sigmoid, returns (B, H, W)."""
    B, T, H, W = x.shape
    assert (H, W) == (height, width)
    S = len(params)
    t_k = params[0][0].shape[0]
    t_final = T - S * (t_k - 1)
    assert t_final == 1, "module precondition (seq_len-1) % stages_num == 0 violated"

    Wseg = W + 2
    Hp = _round_up(H + 2, 8)
    t_inter = max(T - (t_k - 1), 1)                       # stage-0 output length
    t_bufA = t_inter                                      # ping buffer planes
    t_bufB = max(t_inter - (t_k - 1), 1) if S >= 3 else 1  # pong buffer (shrunk)

    # --- choose the batch-group size G (batches folded into one lane block) ---
    def lane_width(g):
        return _round_up(max(g * Wseg, 128), 128)

    def block_bytes(g):
        # double-buffered input block + double-buffered output block + scratch
        return 4 * Hp * lane_width(g) * (2 * T + 2 + t_bufA + t_bufB)

    G = 1 if Wseg > 128 else max(1, min(B, 128 // Wseg))
    while G > 1 and block_bytes(G) > vmem_budget_bytes:
        G -= 1
    # TODO(synk): for very large H*W a single (Hp, Lp) block may still exceed the
    # budget at G == 1; that regime additionally needs H-strip tiling.

    G_num = -(-B // G)
    Bp = G_num * G
    Lseg = G * Wseg
    Lp = lane_width(G)

    # Accumulator-chunk size: keep live accumulator planes within ~32 vregs.
    vregs_per_plane = max(1, (Hp // 8) * (Lp // 128))
    acc_chunk = max(1, min(t_inter, 32 // vregs_per_plane))

    # --- one-time layout prep: pad spatially, fold each group's batches into lanes ---
    xp = jnp.pad(x.astype(jnp.float32),
                 ((0, Bp - B), (0, 0), (1, 1), (1, 1)))             # (Bp, T, H+2, W+2)
    xp = xp.reshape(G_num, G, T, H + 2, Wseg)
    xp = jnp.transpose(xp, (0, 2, 3, 1, 4)).reshape(G_num, T, H + 2, Lseg)
    xp = jnp.pad(xp, ((0, 0), (0, 0), (0, Hp - (H + 2)), (0, Lp - Lseg)))

    w_flat = jnp.concatenate([w.reshape(-1) for (w, _) in params]).astype(jnp.float32)
    b_flat = jnp.concatenate([b.reshape(-1) for (_, b) in params]).astype(jnp.float32)

    kern = functools.partial(_fused_conv3d_kernel, stages=S, t_k=t_k, group=G,
                             height=H, width=W, acc_chunk=acc_chunk)

    vmem_limit = int(max(32 * 1024 * 1024,
                         min(block_bytes(G) + (8 << 20), 128 * 1024 * 1024)))

    out_pad = pl.pallas_call(
        kern,
        out_shape=jax.ShapeDtypeStruct((G_num, Hp, Lp), jnp.float32),
        grid=(G_num,),
        in_specs=[
            pl.BlockSpec(memory_space=pltpu.MemorySpace.SMEM),          # weights
            pl.BlockSpec(memory_space=pltpu.MemorySpace.SMEM),          # biases
            pl.BlockSpec((None, T, Hp, Lp), lambda g: (g, 0, 0, 0)),    # input planes
        ],
        out_specs=pl.BlockSpec((None, Hp, Lp), lambda g: (g, 0, 0)),
        scratch_shapes=[
            pltpu.VMEM((t_bufA, Hp, Lp), jnp.float32),                  # ping
            pltpu.VMEM((t_bufB, Hp, Lp), jnp.float32),                  # pong (shrunk)
        ],
        compiler_params=pltpu.CompilerParams(
            dimension_semantics=("parallel",),
            vmem_limit_bytes=vmem_limit),
    )(w_flat, b_flat, xp)

    # Extract interiors: rows 1..H, and per batch segment the lanes g*(W+2)+1 .. +W.
    out = out_pad[:, 1:H + 1, :Lseg].reshape(G_num, H, G, Wseg)[:, :, :, 1:W + 1]
    out = jnp.transpose(out, (0, 2, 1, 3)).reshape(Bp, H, W)[:B]
    return out


def reference_forward(x, params):
    """Pure-JAX reference matching the PyTorch module exactly."""
    y = x[:, None]  # (B, 1, T, H, W)
    for w, b in params:
        y = lax.conv_general_dilated(
            y, w[None, None],                      # (O=1, I=1, t_k, 3, 3)
            window_strides=(1, 1, 1),
            padding=((0, 0), (1, 1), (1, 1)),
            dimension_numbers=("NCDHW", "OIDHW", "NCDHW"),
            precision=lax.Precision.HIGHEST,
        ) + b.reshape(1, 1, 1, 1, 1)
    return jax.nn.sigmoid(y[:, 0, 0])              # (B, H, W)


if __name__ == "__main__":
    # Small shapes consistent with the module's constraints:
    # (seq_len - 1) % stages_num == 0  ->  seq_len=7, stages_num=3, t_kernel=3
    seq_len, height, width, stages_num = 7, 16, 16, 3
    bs = 2
    assert (seq_len - 1) % stages_num == 0
    t_kernel = (seq_len - 1) // stages_num + 1

    key = jax.random.PRNGKey(0)
    key, xk = jax.random.split(key)
    x = jax.random.normal(xk, (bs, seq_len, height, width), dtype=jnp.float32)

    # Deterministic parameter init mimicking PyTorch Conv3d default (uniform ±1/sqrt(fan_in)).
    fan_in = t_kernel * 3 * 3
    bound = 1.0 / math.sqrt(fan_in)
    params = []
    for _ in range(stages_num):
        key, wk, bk = jax.random.split(key, 3)
        w = jax.random.uniform(wk, (t_kernel, 3, 3), minval=-bound, maxval=bound,
                               dtype=jnp.float32)
        b = jax.random.uniform(bk, (1,), minval=-bound, maxval=bound, dtype=jnp.float32)
        params.append((w, b))

    out = conv3d_forward(x, params, height, width)
    out = jax.block_until_ready(out)

    ref = reference_forward(x, params)
    assert out.shape == (bs, height, width)
    assert jnp.allclose(out, ref, atol=1e-4, rtol=1e-4), "mismatch vs reference"
    print("KERNEL_OK")
</pallas_src>

<mosaic_0001>
module attributes {stable_mosaic.version = 11 : i64} {
  func.func @_fused_conv3d_kernel(%arg0: i32, %arg1: memref<81xf32, #tpu.memory_space<smem>>, %arg2: memref<3xf32, #tpu.memory_space<smem>>, %arg3: memref<1x7x24x128xf32, #tpu.memory_space<vmem>>, %arg4: memref<1x24x128xf32, #tpu.memory_space<vmem>>, %arg5: memref<5x24x128xf32, #tpu.memory_space<vmem>>, %arg6: memref<3x24x128xf32, #tpu.memory_space<vmem>>) attributes {dimension_semantics = [#tpu.dimension_semantics<parallel>], iteration_bounds = array<i64: 1>, scalar_prefetch = 0 : i64, scratch_operands = 2 : i64, tpu.core_type = #tpu.core_type<tc>, window_params = [{transform_indices = @transform_0, window_bounds = array<i64: 81>}, {transform_indices = @transform_1, window_bounds = array<i64: 3>}, {transform_indices = @transform_2, window_bounds = array<i64: 1, 7, 24, 128>}, {transform_indices = @transform_3, window_bounds = array<i64: 1, 24, 128>}]} {
    %0 = tpu.iota {dimensions = array<i32: 0>} : vector<24x128xi32>
    %1 = tpu.iota {dimensions = array<i32: 1>} : vector<24x128xi32>
    %c1_i32 = arith.constant 1 : i32
    %2 = vector.broadcast %c1_i32 : i32 to vector<24x128xi32>
    %3 = arith.cmpi sge, %0, %2 : vector<24x128xi32>
    %c16_i32 = arith.constant 16 : i32
    %4 = vector.broadcast %c16_i32 : i32 to vector<24x128xi32>
    %5 = arith.cmpi sle, %0, %4 : vector<24x128xi32>
    %6 = arith.andi %3, %5 : vector<24x128xi1>
    %c1_i32_0 = arith.constant 1 : i32
    %7 = vector.broadcast %c1_i32_0 : i32 to vector<24x128xi32>
    %8 = arith.cmpi sge, %1, %7 : vector<24x128xi32>
    %c16_i32_1 = arith.constant 16 : i32
    %9 = vector.broadcast %c16_i32_1 : i32 to vector<24x128xi32>
    %10 = arith.cmpi sle, %1, %9 : vector<24x128xi32>
    %11 = arith.andi %8, %10 : vector<24x128xi1>
    %c19_i32 = arith.constant 19 : i32
    %12 = vector.broadcast %c19_i32 : i32 to vector<24x128xi32>
    %13 = arith.cmpi sge, %1, %12 : vector<24x128xi32>
    %c34_i32 = arith.constant 34 : i32
    %14 = vector.broadcast %c34_i32 : i32 to vector<24x128xi32>
    %15 = arith.cmpi sle, %1, %14 : vector<24x128xi32>
    %16 = arith.andi %13, %15 : vector<24x128xi1>
    %17 = arith.ori %11, %16 : vector<24x128xi1>
    %18 = arith.andi %6, %17 : vector<24x128xi1>
    %19 = arith.extui %18 : vector<24x128xi1> to vector<24x128xi32>
    %20 = arith.sitofp %19 : vector<24x128xi32> to vector<24x128xf32>
    %c0 = arith.constant 0 : index
    %21 = memref.load %arg1[%c0] : memref<81xf32, #tpu.memory_space<smem>>
    %c1 = arith.constant 1 : index
    %22 = memref.load %arg1[%c1] : memref<81xf32, #tpu.memory_space<smem>>
    %c2 = arith.constant 2 : index
    %23 = memref.load %arg1[%c2] : memref<81xf32, #tpu.memory_space<smem>>
    %c3 = arith.constant 3 : index
    %24 = memref.load %arg1[%c3] : memref<81xf32, #tpu.memory_space<smem>>
    %c4 = arith.constant 4 : index
    %25 = memref.load %arg1[%c4] : memref<81xf32, #tpu.memory_space<smem>>
    %c5 = arith.constant 5 : index
    %26 = memref.load %arg1[%c5] : memref<81xf32, #tpu.memory_space<smem>>
    %c6 = arith.constant 6 : index
    %27 = memref.load %arg1[%c6] : memref<81xf32, #tpu.memory_space<smem>>
    %c7 = arith.constant 7 : index
    %28 = memref.load %arg1[%c7] : memref<81xf32, #tpu.memory_space<smem>>
    %c8 = arith.constant 8 : index
    %29 = memref.load %arg1[%c8] : memref<81xf32, #tpu.memory_space<smem>>
    %c9 = arith.constant 9 : index
    %30 = memref.load %arg1[%c9] : memref<81xf32, #tpu.memory_space<smem>>
    %c10 = arith.constant 10 : index
    %31 = memref.load %arg1[%c10] : memref<81xf32, #tpu.memory_space<smem>>
    %c11 = arith.constant 11 : index
    %32 = memref.load %arg1[%c11] : memref<81xf32, #tpu.memory_space<smem>>
    %c12 = arith.constant 12 : index
    %33 = memref.load %arg1[%c12] : memref<81xf32, #tpu.memory_space<smem>>
    %c13 = arith.constant 13 : index
    %34 = memref.load %arg1[%c13] : memref<81xf32, #tpu.memory_space<smem>>
    %c14 = arith.constant 14 : index
    %35 = memref.load %arg1[%c14] : memref<81xf32, #tpu.memory_space<smem>>
    %c15 = arith.constant 15 : index
    %36 = memref.load %arg1[%c15] : memref<81xf32, #tpu.memory_space<smem>>
    %c16 = arith.constant 16 : index
    %37 = memref.load %arg1[%c16] : memref<81xf32, #tpu.memory_space<smem>>
    %c17 = arith.constant 17 : index
    %38 = memref.load %arg1[%c17] : memref<81xf32, #tpu.memory_space<smem>>
    %c18 = arith.constant 18 : index
    %39 = memref.load %arg1[%c18] : memref<81xf32, #tpu.memory_space<smem>>
    %c19 = arith.constant 19 : index
    %40 = memref.load %arg1[%c19] : memref<81xf32, #tpu.memory_space<smem>>
    %c20 = arith.constant 20 : index
    %41 = memref.load %arg1[%c20] : memref<81xf32, #tpu.memory_space<smem>>
    %c21 = arith.constant 21 : index
    %42 = memref.load %arg1[%c21] : memref<81xf32, #tpu.memory_space<smem>>
    %c22 = arith.constant 22 : index
    %43 = memref.load %arg1[%c22] : memref<81xf32, #tpu.memory_space<smem>>
    %c23 = arith.constant 23 : index
    %44 = memref.load %arg1[%c23] : memref<81xf32, #tpu.memory_space<smem>>
    %c24 = arith.constant 24 : index
    %45 = memref.load %arg1[%c24] : memref<81xf32, #tpu.memory_space<smem>>
    %c25 = arith.constant 25 : index
    %46 = memref.load %arg1[%c25] : memref<81xf32, #tpu.memory_space<smem>>
    %c26 = arith.constant 26 : index
    %47 = memref.load %arg1[%c26] : memref<81xf32, #tpu.memory_space<smem>>
    %c0_2 = arith.constant 0 : index
    %48 = memref.load %arg2[%c0_2] : memref<3xf32, #tpu.memory_space<smem>>
    %49 = vector.broadcast %48 : f32 to vector<24x128xf32>
    %c0_3 = arith.constant 0 : index
    %c0_4 = arith.constant 0 : index
    %c0_5 = arith.constant 0 : index
    %c0_6 = arith.constant 0 : index
    %50 = vector.load %arg3[%c0_3, %c0_4, %c0_5, %c0_6] : memref<1x7x24x128xf32, #tpu.memory_space<vmem>>, vector<1x1x24x128xf32>
    %51 = vector.shape_cast %50 : vector<1x1x24x128xf32> to vector<24x128xf32>
    %c1_i32_7 = arith.constant 1 : i32
    %52 = tpu.dynamic_rotate %51 by %c1_i32_7 dim 1 : vector<24x128xf32>, i32 -> vector<24x128xf32>
    %c127_i32 = arith.constant 127 : i32
    %53 = tpu.dynamic_rotate %51 by %c127_i32 dim 1 : vector<24x128xf32>, i32 -> vector<24x128xf32>
    %c1_i32_8 = arith.constant 1 : i32
    %54 = tpu.dynamic_rotate %52 by %c1_i32_8 dim 0 : vector<24x128xf32>, i32 -> vector<24x128xf32>
    %55 = vector.broadcast %21 : f32 to vector<24x128xf32>
    %56 = arith.mulf %55, %54 : vector<24x128xf32>
    %57 = arith.addf %49, %56 : vector<24x128xf32>
    %c1_i32_9 = arith.constant 1 : i32
    %58 = tpu.dynamic_rotate %51 by %c1_i32_9 dim 0 : vector<24x128xf32>, i32 -> vector<24x128xf32>
    %59 = vector.broadcast %22 : f32 to vector<24x128xf32>
    %60 = arith.mulf %59, %58 : vector<24x128xf32>
    %61 = arith.addf %57, %60 : vector<24x128xf32>
    %c1_i32_10 = arith.constant 1 : i32
    %62 = tpu.dynamic_rotate %53 by %c1_i32_10 dim 0 : vector<24x128xf32>, i32 -> vector<24x128xf32>
    %63 = vector.broadcast %23 : f32 to vector<24x128xf32>
    %64 = arith.mulf %63, %62 : vector<24x128xf32>
    %65 = arith.addf %61, %64 : vector<24x128xf32>
    %66 = vector.broadcast %24 : f32 to vector<24x128xf32>
    %67 = arith.mulf %66, %52 : vector<24x128xf32>
    %68 = arith.addf %65, %67 : vector<24x128xf32>
    %69 = vector.broadcast %25 : f32 to vector<24x128xf32>
    %70 = arith.mulf %69, %51 : vector<24x128xf32>
    %71 = arith.addf %68, %70 : vector<24x128xf32>
    %72 = vector.broadcast %26 : f32 to vector<24x128xf32>
    %73 = arith.mulf %72, %53 : vector<24x128xf32>
    %74 = arith.addf %71, %73 : vector<24x128xf32>
    %c23_i32 = arith.constant 23 : i32
    %75 = tpu.dynamic_rotate %52 by %c23_i32 dim 0 : vector<24x128xf32>, i32 -> vector<24x128xf32>
    %76 = vector.broadcast %27 : f32 to vector<24x128xf32>
    %77 = arith.mulf %76, %75 : vector<24x128xf32>
    %78 = arith.addf %74, %77 : vector<24x128xf32>
    %c23_i32_11 = arith.constant 23 : i32
    %79 = tpu.dynamic_rotate %51 by %c23_i32_11 dim 0 : vector<24x128xf32>, i32 -> vector<24x128xf32>
    %80 = vector.broadcast %28 : f32 to vector<24x128xf32>
    %81 = arith.mulf %80, %79 : vector<24x128xf32>
    %82 = arith.addf %78, %81 : vector<24x128xf32>
    %c23_i32_12 = arith.constant 23 : i32
    %83 = tpu.dynamic_rotate %53 by %c23_i32_12 dim 0 : vector<24x128xf32>, i32 -> vector<24x128xf32>
    %84 = vector.broadcast %29 : f32 to vector<24x128xf32>
    %85 = arith.mulf %84, %83 : vector<24x128xf32>
    %86 = arith.addf %82, %85 : vector<24x128xf32>
    %c0_13 = arith.constant 0 : index
    %c1_14 = arith.constant 1 : index
    %c0_15 = arith.constant 0 : index
    %c0_16 = arith.constant 0 : index
    %87 = vector.load %arg3[%c0_13, %c1_14, %c0_15, %c0_16] : memref<1x7x24x128xf32, #tpu.memory_space<vmem>>, vector<1x1x24x128xf32>
    %88 = vector.shape_cast %87 : vector<1x1x24x128xf32> to vector<24x128xf32>
    %c1_i32_17 = arith.constant 1 : i32
    %89 = tpu.dynamic_rotate %88 by %c1_i32_17 dim 1 : vector<24x128xf32>, i32 -> vector<24x128xf32>
    %c127_i32_18 = arith.constant 127 : i32
    %90 = tpu.dynamic_rotate %88 by %c127_i32_18 dim 1 : vector<24x128xf32>, i32 -> vector<24x128xf32>
    %c1_i32_19 = arith.constant 1 : i32
    %91 = tpu.dynamic_rotate %89 by %c1_i32_19 dim 0 : vector<24x128xf32>, i32 -> vector<24x128xf32>
    %92 = vector.broadcast %30 : f32 to vector<24x128xf32>
    %93 = arith.mulf %92, %91 : vector<24x128xf32>
    %94 = arith.addf %86, %93 : vector<24x128xf32>
    %95 = vector.broadcast %21 : f32 to vector<24x128xf32>
    %96 = arith.mulf %95, %91 : vector<24x128xf32>
    %97 = arith.addf %49, %96 : vector<24x128xf32>
    %c1_i32_20 = arith.constant 1 : i32
    %98 = tpu.dynamic_rotate %88 by %c1_i32_20 dim 0 : vector<24x128xf32>, i32 -> vector<24x128xf32>
    %99 = vector.broadcast %31 : f32 to vector<24x128xf32>
    %100 = arith.mulf %99, %98 : vector<24x128xf32>
    %101 = arith.addf %94, %100 : vector<24x128xf32>
    %102 = vector.broadcast %22 : f32 to vector<24x128xf32>
    %103 = arith.mulf %102, %98 : vector<24x128xf32>
    %104 = arith.addf %97, %103 : vector<24x128xf32>
    %c1_i32_21 = arith.constant 1 : i32
    %105 = tpu.dynamic_rotate %90 by %c1_i32_21 dim 0 : vector<24x128xf32>, i32 -> vector<24x128xf32>
    %106 = vector.broadcast %32 : f32 to vector<24x128xf32>
    %107 = arith.mulf %106, %105 : vector<24x128xf32>
    %108 = arith.addf %101, %107 : vector<24x128xf32>
    %109 = vector.broadcast %23 : f32 to vector<24x128xf32>
    %110 = arith.mulf %109, %105 : vector<24x128xf32>
    %111 = arith.addf %104, %110 : vector<24x128xf32>
    %112 = vector.broadcast %33 : f32 to vector<24x128xf32>
    %113 = arith.mulf %112, %89 : vector<24x128xf32>
    %114 = arith.addf %108, %113 : vector<24x128xf32>
    %115 = vector.broadcast %24 : f32 to vector<24x128xf32>
    %116 = arith.mulf %115, %89 : vector<24x128xf32>
    %117 = arith.addf %111, %116 : vector<24x128xf32>
    %118 = vector.broadcast %34 : f32 to vector<24x128xf32>
    %119 = arith.mulf %118, %88 : vector<24x128xf32>
    %120 = arith.addf %114, %119 : vector<24x128xf32>
    %121 = vector.broadcast %25 : f32 to vector<24x128xf32>
    %122 = arith.mulf %121, %88 : vector<24x128xf32>
    %123 = arith.addf %117, %122 : vector<24x128xf32>
    %124 = vector.broadcast %35 : f32 to vector<24x128xf32>
    %125 = arith.mulf %124, %90 : vector<24x128xf32>
    %126 = arith.addf %120, %125 : vector<24x128xf32>
    %127 = vector.broadcast %26 : f32 to vector<24x128xf32>
    %128 = arith.mulf %127, %90 : vector<24x128xf32>
    %129 = arith.addf %123, %128 : vector<24x128xf32>
    %c23_i32_22 = arith.constant 23 : i32
    %130 = tpu.dynamic_rotate %89 by %c23_i32_22 dim 0 : vector<24x128xf32>, i32 -> vector<24x128xf32>
    %131 = vector.broadcast %36 : f32 to vector<24x128xf32>
    %132 = arith.mulf %131, %130 : vector<24x128xf32>
    %133 = arith.addf %126, %132 : vector<24x128xf32>
    %134 = vector.broadcast %27 : f32 to vector<24x128xf32>
    %135 = arith.mulf %134, %130 : vector<24x128xf32>
    %136 = arith.addf %129, %135 : vector<24x128xf32>
    %c23_i32_23 = arith.constant 23 : i32
    %137 = tpu.dynamic_rotate %88 by %c23_i32_23 dim 0 : vector<24x128xf32>, i32 -> vector<24x128xf32>
    %138 = vector.broadcast %37 : f32 to vector<24x128xf32>
    %139 = arith.mulf %138, %137 : vector<24x128xf32>
    %140 = arith.addf %133, %139 : vector<24x128xf32>
    %141 = vector.broadcast %28 : f32 to vector<24x128xf32>
    %142 = arith.mulf %141, %137 : vector<24x128xf32>
    %143 = arith.addf %136, %142 : vector<24x128xf32>
    %c23_i32_24 = arith.constant 23 : i32
    %144 = tpu.dynamic_rotate %90 by %c23_i32_24 dim 0 : vector<24x128xf32>, i32 -> vector<24x128xf32>
    %145 = vector.broadcast %38 : f32 to vector<24x128xf32>
    %146 = arith.mulf %145, %144 : vector<24x128xf32>
    %147 = arith.addf %140, %146 : vector<24x128xf32>
    %148 = vector.broadcast %29 : f32 to vector<24x128xf32>
    %149 = arith.mulf %148, %144 : vector<24x128xf32>
    %150 = arith.addf %143, %149 : vector<24x128xf32>
    %c0_25 = arith.constant 0 : index
    %c2_26 = arith.constant 2 : index
    %c0_27 = arith.constant 0 : index
    %c0_28 = arith.constant 0 : index
    %151 = vector.load %arg3[%c0_25, %c2_26, %c0_27, %c0_28] : memref<1x7x24x128xf32, #tpu.memory_space<vmem>>, vector<1x1x24x128xf32>
    %152 = vector.shape_cast %151 : vector<1x1x24x128xf32> to vector<24x128xf32>
    %c1_i32_29 = arith.constant 1 : i32
    %153 = tpu.dynamic_rotate %152 by %c1_i32_29 dim 1 : vector<24x128xf32>, i32 -> vector<24x128xf32>
    %c127_i32_30 = arith.constant 127 : i32
    %154 = tpu.dynamic_rotate %152 by %c127_i32_30 dim 1 : vector<24x128xf32>, i32 -> vector<24x128xf32>
    %c1_i32_31 = arith.constant 1 : i32
    %155 = tpu.dynamic_rotate %153 by %c1_i32_31 dim 0 : vector<24x128xf32>, i32 -> vector<24x128xf32>
    %156 = vector.broadcast %39 : f32 to vector<24x128xf32>
    %157 = arith.mulf %156, %155 : vector<24x128xf32>
    %158 = arith.addf %147, %157 : vector<24x128xf32>
    %159 = vector.broadcast %30 : f32 to vector<24x128xf32>
    %160 = arith.mulf %159, %155 : vector<24x128xf32>
    %161 = arith.addf %150, %160 : vector<24x128xf32>
    %162 = vector.broadcast %21 : f32 to vector<24x128xf32>
    %163 = arith.mulf %162, %155 : vector<24x128xf32>
    %164 = arith.addf %49, %163 : vector<24x128xf32>
    %c1_i32_32 = arith.constant 1 : i32
    %165 = tpu.dynamic_rotate %152 by %c1_i32_32 dim 0 : vector<24x128xf32>, i32 -> vector<24x128xf32>
    %166 = vector.broadcast %40 : f32 to vector<24x128xf32>
    %167 = arith.mulf %166, %165 : vector<24x128xf32>
    %168 = arith.addf %158, %167 : vector<24x128xf32>
    %169 = vector.broadcast %31 : f32 to vector<24x128xf32>
    %170 = arith.mulf %169, %165 : vector<24x128xf32>
    %171 = arith.addf %161, %170 : vector<24x128xf32>
    %172 = vector.broadcast %22 : f32 to vector<24x128xf32>
    %173 = arith.mulf %172, %165 : vector<24x128xf32>
    %174 = arith.addf %164, %173 : vector<24x128xf32>
    %c1_i32_33 = arith.constant 1 : i32
    %175 = tpu.dynamic_rotate %154 by %c1_i32_33 dim 0 : vector<24x128xf32>, i32 -> vector<24x128xf32>
    %176 = vector.broadcast %41 : f32 to vector<24x128xf32>
    %177 = arith.mulf %176, %175 : vector<24x128xf32>
    %178 = arith.addf %168, %177 : vector<24x128xf32>
    %179 = vector.broadcast %32 : f32 to vector<24x128xf32>
    %180 = arith.mulf %179, %175 : vector<24x128xf32>
    %181 = arith.addf %171, %180 : vector<24x128xf32>
    %182 = vector.broadcast %23 : f32 to vector<24x128xf32>
    %183 = arith.mulf %182, %175 : vector<24x128xf32>
    %184 = arith.addf %174, %183 : vector<24x128xf32>
    %185 = vector.broadcast %42 : f32 to vector<24x128xf32>
    %186 = arith.mulf %185, %153 : vector<24x128xf32>
    %187 = arith.addf %178, %186 : vector<24x128xf32>
    %188 = vector.broadcast %33 : f32 to vector<24x128xf32>
    %189 = arith.mulf %188, %153 : vector<24x128xf32>
    %190 = arith.addf %181, %189 : vector<24x128xf32>
    %191 = vector.broadcast %24 : f32 to vector<24x128xf32>
    %192 = arith.mulf %191, %153 : vector<24x128xf32>
    %193 = arith.addf %184, %192 : vector<24x128xf32>
    %194 = vector.broadcast %43 : f32 to vector<24x128xf32>
    %195 = arith.mulf %194, %152 : vector<24x128xf32>
    %196 = arith.addf %187, %195 : vector<24x128xf32>
    %197 = vector.broadcast %34 : f32 to vector<24x128xf32>
    %198 = arith.mulf %197, %152 : vector<24x128xf32>
    %199 = arith.addf %190, %198 : vector<24x128xf32>
    %200 = vector.broadcast %25 : f32 to vector<24x128xf32>
    %201 = arith.mulf %200, %152 : vector<24x128xf32>
    %202 = arith.addf %193, %201 : vector<24x128xf32>
    %203 = vector.broadcast %44 : f32 to vector<24x128xf32>
    %204 = arith.mulf %203, %154 : vector<24x128xf32>
    %205 = arith.addf %196, %204 : vector<24x128xf32>
    %206 = vector.broadcast %35 : f32 to vector<24x128xf32>
    %207 = arith.mulf %206, %154 : vector<24x128xf32>
    %208 = arith.addf %199, %207 : vector<24x128xf32>
    %209 = vector.broadcast %26 : f32 to vector<24x128xf32>
    %210 = arith.mulf %209, %154 : vector<24x128xf32>
    %211 = arith.addf %202, %210 : vector<24x128xf32>
    %c23_i32_34 = arith.constant 23 : i32
    %212 = tpu.dynamic_rotate %153 by %c23_i32_34 dim 0 : vector<24x128xf32>, i32 -> vector<24x128xf32>
    %213 = vector.broadcast %45 : f32 to vector<24x128xf32>
    %214 = arith.mulf %213, %212 : vector<24x128xf32>
    %215 = arith.addf %205, %214 : vector<24x128xf32>
    %216 = vector.broadcast %36 : f32 to vector<24x128xf32>
    %217 = arith.mulf %216, %212 : vector<24x128xf32>
    %218 = arith.addf %208, %217 : vector<24x128xf32>
    %219 = vector.broadcast %27 : f32 to vector<24x128xf32>
    %220 = arith.mulf %219, %212 : vector<24x128xf32>
    %221 = arith.addf %211, %220 : vector<24x128xf32>
    %c23_i32_35 = arith.constant 23 : i32
    %222 = tpu.dynamic_rotate %152 by %c23_i32_35 dim 0 : vector<24x128xf32>, i32 -> vector<24x128xf32>
    %223 = vector.broadcast %46 : f32 to vector<24x128xf32>
    %224 = arith.mulf %223, %222 : vector<24x128xf32>
    %225 = arith.addf %215, %224 : vector<24x128xf32>
    %226 = vector.broadcast %37 : f32 to vector<24x128xf32>
    %227 = arith.mulf %226, %222 : vector<24x128xf32>
    %228 = arith.addf %218, %227 : vector<24x128xf32>
    %229 = vector.broadcast %28 : f32 to vector<24x128xf32>
    %230 = arith.mulf %229, %222 : vector<24x128xf32>
    %231 = arith.addf %221, %230 : vector<24x128xf32>
    %c23_i32_36 = arith.constant 23 : i32
    %232 = tpu.dynamic_rotate %154 by %c23_i32_36 dim 0 : vector<24x128xf32>, i32 -> vector<24x128xf32>
    %233 = vector.broadcast %47 : f32 to vector<24x128xf32>
    %234 = arith.mulf %233, %232 : vector<24x128xf32>
    %235 = arith.addf %225, %234 : vector<24x128xf32>
    %236 = vector.broadcast %38 : f32 to vector<24x128xf32>
    %237 = arith.mulf %236, %232 : vector<24x128xf32>
    %238 = arith.addf %228, %237 : vector<24x128xf32>
    %239 = vector.broadcast %29 : f32 to vector<24x128xf32>
    %240 = arith.mulf %239, %232 : vector<24x128xf32>
    %241 = arith.addf %231, %240 : vector<24x128xf32>
    %c0_37 = arith.constant 0 : index
    %c3_38 = arith.constant 3 : index
    %c0_39 = arith.constant 0 : index
    %c0_40 = arith.constant 0 : index
    %242 = vector.load %arg3[%c0_37, %c3_38, %c0_39, %c0_40] : memref<1x7x24x128xf32, #tpu.memory_space<vmem>>, vector<1x1x24x128xf32>
    %243 = vector.shape_cast %242 : vector<1x1x24x128xf32> to vector<24x128xf32>
    %c1_i32_41 = arith.constant 1 : i32
    %244 = tpu.dynamic_rotate %243 by %c1_i32_41 dim 1 : vector<24x128xf32>, i32 -> vector<24x128xf32>
    %c127_i32_42 = arith.constant 127 : i32
    %245 = tpu.dynamic_rotate %243 by %c127_i32_42 dim 1 : vector<24x128xf32>, i32 -> vector<24x128xf32>
    %c1_i32_43 = arith.constant 1 : i32
    %246 = tpu.dynamic_rotate %244 by %c1_i32_43 dim 0 : vector<24x128xf32>, i32 -> vector<24x128xf32>
    %247 = vector.broadcast %39 : f32 to vector<24x128xf32>
    %248 = arith.mulf %247, %246 : vector<24x128xf32>
    %249 = arith.addf %238, %248 : vector<24x128xf32>
    %250 = vector.broadcast %30 : f32 to vector<24x128xf32>
    %251 = arith.mulf %250, %246 : vector<24x128xf32>
    %252 = arith.addf %241, %251 : vector<24x128xf32>
    %253 = vector.broadcast %21 : f32 to vector<24x128xf32>
    %254 = arith.mulf %253, %246 : vector<24x128xf32>
    %255 = arith.addf %49, %254 : vector<24x128xf32>
    %c1_i32_44 = arith.constant 1 : i32
    %256 = tpu.dynamic_rotate %243 by %c1_i32_44 dim 0 : vector<24x128xf32>, i32 -> vector<24x128xf32>
    %257 = vector.broadcast %40 : f32 to vector<24x128xf32>
    %258 = arith.mulf %257, %256 : vector<24x128xf32>
    %259 = arith.addf %249, %258 : vector<24x128xf32>
    %260 = vector.broadcast %31 : f32 to vector<24x128xf32>
    %261 = arith.mulf %260, %256 : vector<24x128xf32>
    %262 = arith.addf %252, %261 : vector<24x128xf32>
    %263 = vector.broadcast %22 : f32 to vector<24x128xf32>
    %264 = arith.mulf %263, %256 : vector<24x128xf32>
    %265 = arith.addf %255, %264 : vector<24x128xf32>
    %c1_i32_45 = arith.constant 1 : i32
    %266 = tpu.dynamic_rotate %245 by %c1_i32_45 dim 0 : vector<24x128xf32>, i32 -> vector<24x128xf32>
    %267 = vector.broadcast %41 : f32 to vector<24x128xf32>
    %268 = arith.mulf %267, %266 : vector<24x128xf32>
    %269 = arith.addf %259, %268 : vector<24x128xf32>
    %270 = vector.broadcast %32 : f32 to vector<24x128xf32>
    %271 = arith.mulf %270, %266 : vector<24x128xf32>
    %272 = arith.addf %262, %271 : vector<24x128xf32>
    %273 = vector.broadcast %23 : f32 to vector<24x128xf32>
    %274 = arith.mulf %273, %266 : vector<24x128xf32>
    %275 = arith.addf %265, %274 : vector<24x128xf32>
    %276 = vector.broadcast %42 : f32 to vector<24x128xf32>
    %277 = arith.mulf %276, %244 : vector<24x128xf32>
    %278 = arith.addf %269, %277 : vector<24x128xf32>
    %279 = vector.broadcast %33 : f32 to vector<24x128xf32>
    %280 = arith.mulf %279, %244 : vector<24x128xf32>
    %281 = arith.addf %272, %280 : vector<24x128xf32>
    %282 = vector.broadcast %24 : f32 to vector<24x128xf32>
    %283 = arith.mulf %282, %244 : vector<24x128xf32>
    %284 = arith.addf %275, %283 : vector<24x128xf32>
    %285 = vector.broadcast %43 : f32 to vector<24x128xf32>
    %286 = arith.mulf %285, %243 : vector<24x128xf32>
    %287 = arith.addf %278, %286 : vector<24x128xf32>
    %288 = vector.broadcast %34 : f32 to vector<24x128xf32>
    %289 = arith.mulf %288, %243 : vector<24x128xf32>
    %290 = arith.addf %281, %289 : vector<24x128xf32>
    %291 = vector.broadcast %25 : f32 to vector<24x128xf32>
    %292 = arith.mulf %291, %243 : vector<24x128xf32>
    %293 = arith.addf %284, %292 : vector<24x128xf32>
    %294 = vector.broadcast %44 : f32 to vector<24x128xf32>
    %295 = arith.mulf %294, %245 : vector<24x128xf32>
    %296 = arith.addf %287, %295 : vector<24x128xf32>
    %297 = vector.broadcast %35 : f32 to vector<24x128xf32>
    %298 = arith.mulf %297, %245 : vector<24x128xf32>
    %299 = arith.addf %290, %298 : vector<24x128xf32>
    %300 = vector.broadcast %26 : f32 to vector<24x128xf32>
    %301 = arith.mulf %300, %245 : vector<24x128xf32>
    %302 = arith.addf %293, %301 : vector<24x128xf32>
    %c23_i32_46 = arith.constant 23 : i32
    %303 = tpu.dynamic_rotate %244 by %c23_i32_46 dim 0 : vector<24x128xf32>, i32 -> vector<24x128xf32>
    %304 = vector.broadcast %45 : f32 to vector<24x128xf32>
    %305 = arith.mulf %304, %303 : vector<24x128xf32>
    %306 = arith.addf %296, %305 : vector<24x128xf32>
    %307 = vector.broadcast %36 : f32 to vector<24x128xf32>
    %308 = arith.mulf %307, %303 : vector<24x128xf32>
    %309 = arith.addf %299, %308 : vector<24x128xf32>
    %310 = vector.broadcast %27 : f32 to vector<24x128xf32>
    %311 = arith.mulf %310, %303 : vector<24x128xf32>
    %312 = arith.addf %302, %311 : vector<24x128xf32>
    %c23_i32_47 = arith.constant 23 : i32
    %313 = tpu.dynamic_rotate %243 by %c23_i32_47 dim 0 : vector<24x128xf32>, i32 -> vector<24x128xf32>
    %314 = vector.broadcast %46 : f32 to vector<24x128xf32>
    %315 = arith.mulf %314, %313 : vector<24x128xf32>
    %316 = arith.addf %306, %315 : vector<24x128xf32>
    %317 = vector.broadcast %37 : f32 to vector<24x128xf32>
    %318 = arith.mulf %317, %313 : vector<24x128xf32>
    %319 = arith.addf %309, %318 : vector<24x128xf32>
    %320 = vector.broadcast %28 : f32 to vector<24x128xf32>
    %321 = arith.mulf %320, %313 : vector<24x128xf32>
    %322 = arith.addf %312, %321 : vector<24x128xf32>
    %c23_i32_48 = arith.constant 23 : i32
    %323 = tpu.dynamic_rotate %245 by %c23_i32_48 dim 0 : vector<24x128xf32>, i32 -> vector<24x128xf32>
    %324 = vector.broadcast %47 : f32 to vector<24x128xf32>
    %325 = arith.mulf %324, %323 : vector<24x128xf32>
    %326 = arith.addf %316, %325 : vector<24x128xf32>
    %327 = vector.broadcast %38 : f32 to vector<24x128xf32>
    %328 = arith.mulf %327, %323 : vector<24x128xf32>
    %329 = arith.addf %319, %328 : vector<24x128xf32>
    %330 = vector.broadcast %29 : f32 to vector<24x128xf32>
    %331 = arith.mulf %330, %323 : vector<24x128xf32>
    %332 = arith.addf %322, %331 : vector<24x128xf32>
    %c0_49 = arith.constant 0 : index
    %c4_50 = arith.constant 4 : index
    %c0_51 = arith.constant 0 : index
    %c0_52 = arith.constant 0 : index
    %333 = vector.load %arg3[%c0_49, %c4_50, %c0_51, %c0_52] : memref<1x7x24x128xf32, #tpu.memory_space<vmem>>, vector<1x1x24x128xf32>
    %334 = vector.shape_cast %333 : vector<1x1x24x128xf32> to vector<24x128xf32>
    %c1_i32_53 = arith.constant 1 : i32
    %335 = tpu.dynamic_rotate %334 by %c1_i32_53 dim 1 : vector<24x128xf32>, i32 -> vector<24x128xf32>
    %c127_i32_54 = arith.constant 127 : i32
    %336 = tpu.dynamic_rotate %334 by %c127_i32_54 dim 1 : vector<24x128xf32>, i32 -> vector<24x128xf32>
    %c1_i32_55 = arith.constant 1 : i32
    %337 = tpu.dynamic_rotate %335 by %c1_i32_55 dim 0 : vector<24x128xf32>, i32 -> vector<24x128xf32>
    %338 = vector.broadcast %39 : f32 to vector<24x128xf32>
    %339 = arith.mulf %338, %337 : vector<24x128xf32>
    %340 = arith.addf %329, %339 : vector<24x128xf32>
    %341 = vector.broadcast %30 : f32 to vector<24x128xf32>
    %342 = arith.mulf %341, %337 : vector<24x128xf32>
    %343 = arith.addf %332, %342 : vector<24x128xf32>
    %344 = vector.broadcast %21 : f32 to vector<24x128xf32>
    %345 = arith.mulf %344, %337 : vector<24x128xf32>
    %346 = arith.addf %49, %345 : vector<24x128xf32>
    %c1_i32_56 = arith.constant 1 : i32
    %347 = tpu.dynamic_rotate %334 by %c1_i32_56 dim 0 : vector<24x128xf32>, i32 -> vector<24x128xf32>
    %348 = vector.broadcast %40 : f32 to vector<24x128xf32>
    %349 = arith.mulf %348, %347 : vector<24x128xf32>
    %350 = arith.addf %340, %349 : vector<24x128xf32>
    %351 = vector.broadcast %31 : f32 to vector<24x128xf32>
    %352 = arith.mulf %351, %347 : vector<24x128xf32>
    %353 = arith.addf %343, %352 : vector<24x128xf32>
    %354 = vector.broadcast %22 : f32 to vector<24x128xf32>
    %355 = arith.mulf %354, %347 : vector<24x128xf32>
    %356 = arith.addf %346, %355 : vector<24x128xf32>
    %c1_i32_57 = arith.constant 1 : i32
    %357 = tpu.dynamic_rotate %336 by %c1_i32_57 dim 0 : vector<24x128xf32>, i32 -> vector<24x128xf32>
    %358 = vector.broadcast %41 : f32 to vector<24x128xf32>
    %359 = arith.mulf %358, %357 : vector<24x128xf32>
    %360 = arith.addf %350, %359 : vector<24x128xf32>
    %361 = vector.broadcast %32 : f32 to vector<24x128xf32>
    %362 = arith.mulf %361, %357 : vector<24x128xf32>
    %363 = arith.addf %353, %362 : vector<24x128xf32>
    %364 = vector.broadcast %23 : f32 to vector<24x128xf32>
    %365 = arith.mulf %364, %357 : vector<24x128xf32>
    %366 = arith.addf %356, %365 : vector<24x128xf32>
    %367 = vector.broadcast %42 : f32 to vector<24x128xf32>
    %368 = arith.mulf %367, %335 : vector<24x128xf32>
    %369 = arith.addf %360, %368 : vector<24x128xf32>
    %370 = vector.broadcast %33 : f32 to vector<24x128xf32>
    %371 = arith.mulf %370, %335 : vector<24x128xf32>
    %372 = arith.addf %363, %371 : vector<24x128xf32>
    %373 = vector.broadcast %24 : f32 to vector<24x128xf32>
    %374 = arith.mulf %373, %335 : vector<24x128xf32>
    %375 = arith.addf %366, %374 : vector<24x128xf32>
    %376 = vector.broadcast %43 : f32 to vector<24x128xf32>
    %377 = arith.mulf %376, %334 : vector<24x128xf32>
    %378 = arith.addf %369, %377 : vector<24x128xf32>
    %379 = vector.broadcast %34 : f32 to vector<24x128xf32>
    %380 = arith.mulf %379, %334 : vector<24x128xf32>
    %381 = arith.addf %372, %380 : vector<24x128xf32>
    %382 = vector.broadcast %25 : f32 to vector<24x128xf32>
    %383 = arith.mulf %382, %334 : vector<24x128xf32>
    %384 = arith.addf %375, %383 : vector<24x128xf32>
    %385 = vector.broadcast %44 : f32 to vector<24x128xf32>
    %386 = arith.mulf %385, %336 : vector<24x128xf32>
    %387 = arith.addf %378, %386 : vector<24x128xf32>
    %388 = vector.broadcast %35 : f32 to vector<24x128xf32>
    %389 = arith.mulf %388, %336 : vector<24x128xf32>
    %390 = arith.addf %381, %389 : vector<24x128xf32>
    %391 = vector.broadcast %26 : f32 to vector<24x128xf32>
    %392 = arith.mulf %391, %336 : vector<24x128xf32>
    %393 = arith.addf %384, %392 : vector<24x128xf32>
    %c23_i32_58 = arith.constant 23 : i32
    %394 = tpu.dynamic_rotate %335 by %c23_i32_58 dim 0 : vector<24x128xf32>, i32 -> vector<24x128xf32>
    %395 = vector.broadcast %45 : f32 to vector<24x128xf32>
    %396 = arith.mulf %395, %394 : vector<24x128xf32>
    %397 = arith.addf %387, %396 : vector<24x128xf32>
    %398 = vector.broadcast %36 : f32 to vector<24x128xf32>
    %399 = arith.mulf %398, %394 : vector<24x128xf32>
    %400 = arith.addf %390, %399 : vector<24x128xf32>
    %401 = vector.broadcast %27 : f32 to vector<24x128xf32>
    %402 = arith.mulf %401, %394 : vector<24x128xf32>
    %403 = arith.addf %393, %402 : vector<24x128xf32>
    %c23_i32_59 = arith.constant 23 : i32
    %404 = tpu.dynamic_rotate %334 by %c23_i32_59 dim 0 : vector<24x128xf32>, i32 -> vector<24x128xf32>
    %405 = vector.broadcast %46 : f32 to vector<24x128xf32>
    %406 = arith.mulf %405, %404 : vector<24x128xf32>
    %407 = arith.addf %397, %406 : vector<24x128xf32>
    %408 = vector.broadcast %37 : f32 to vector<24x128xf32>
    %409 = arith.mulf %408, %404 : vector<24x128xf32>
    %410 = arith.addf %400, %409 : vector<24x128xf32>
    %411 = vector.broadcast %28 : f32 to vector<24x128xf32>
    %412 = arith.mulf %411, %404 : vector<24x128xf32>
    %413 = arith.addf %403, %412 : vector<24x128xf32>
    %c23_i32_60 = arith.constant 23 : i32
    %414 = tpu.dynamic_rotate %336 by %c23_i32_60 dim 0 : vector<24x128xf32>, i32 -> vector<24x128xf32>
    %415 = vector.broadcast %47 : f32 to vector<24x128xf32>
    %416 = arith.mulf %415, %414 : vector<24x128xf32>
    %417 = arith.addf %407, %416 : vector<24x128xf32>
    %418 = vector.broadcast %38 : f32 to vector<24x128xf32>
    %419 = arith.mulf %418, %414 : vector<24x128xf32>
    %420 = arith.addf %410, %419 : vector<24x128xf32>
    %421 = vector.broadcast %29 : f32 to vector<24x128xf32>
    %422 = arith.mulf %421, %414 : vector<24x128xf32>
    %423 = arith.addf %413, %422 : vector<24x128xf32>
    %c0_61 = arith.constant 0 : index
    %c5_62 = arith.constant 5 : index
    %c0_63 = arith.constant 0 : index
    %c0_64 = arith.constant 0 : index
    %424 = vector.load %arg3[%c0_61, %c5_62, %c0_63, %c0_64] : memref<1x7x24x128xf32, #tpu.memory_space<vmem>>, vector<1x1x24x128xf32>
    %425 = vector.shape_cast %424 : vector<1x1x24x128xf32> to vector<24x128xf32>
    %c1_i32_65 = arith.constant 1 : i32
    %426 = tpu.dynamic_rotate %425 by %c1_i32_65 dim 1 : vector<24x128xf32>, i32 -> vector<24x128xf32>
    %c127_i32_66 = arith.constant 127 : i32
    %427 = tpu.dynamic_rotate %425 by %c127_i32_66 dim 1 : vector<24x128xf32>, i32 -> vector<24x128xf32>
    %c1_i32_67 = arith.constant 1 : i32
    %428 = tpu.dynamic_rotate %426 by %c1_i32_67 dim 0 : vector<24x128xf32>, i32 -> vector<24x128xf32>
    %429 = vector.broadcast %39 : f32 to vector<24x128xf32>
    %430 = arith.mulf %429, %428 : vector<24x128xf32>
    %431 = arith.addf %420, %430 : vector<24x128xf32>
    %432 = vector.broadcast %30 : f32 to vector<24x128xf32>
    %433 = arith.mulf %432, %428 : vector<24x128xf32>
    %434 = arith.addf %423, %433 : vector<24x128xf32>
    %c1_i32_68 = arith.constant 1 : i32
    %435 = tpu.dynamic_rotate %425 by %c1_i32_68 dim 0 : vector<24x128xf32>, i32 -> vector<24x128xf32>
    %436 = vector.broadcast %40 : f32 to vector<24x128xf32>
    %437 = arith.mulf %436, %435 : vector<24x128xf32>
    %438 = arith.addf %431, %437 : vector<24x128xf32>
    %439 = vector.broadcast %31 : f32 to vector<24x128xf32>
    %440 = arith.mulf %439, %435 : vector<24x128xf32>
    %441 = arith.addf %434, %440 : vector<24x128xf32>
    %c1_i32_69 = arith.constant 1 : i32
    %442 = tpu.dynamic_rotate %427 by %c1_i32_69 dim 0 : vector<24x128xf32>, i32 -> vector<24x128xf32>
    %443 = vector.broadcast %41 : f32 to vector<24x128xf32>
    %444 = arith.mulf %443, %442 : vector<24x128xf32>
    %445 = arith.addf %438, %444 : vector<24x128xf32>
    %446 = vector.broadcast %32 : f32 to vector<24x128xf32>
    %447 = arith.mulf %446, %442 : vector<24x128xf32>
    %448 = arith.addf %441, %447 : vector<24x128xf32>
    %449 = vector.broadcast %42 : f32 to vector<24x128xf32>
    %450 = arith.mulf %449, %426 : vector<24x128xf32>
    %451 = arith.addf %445, %450 : vector<24x128xf32>
    %452 = vector.broadcast %33 : f32 to vector<24x128xf32>
    %453 = arith.mulf %452, %426 : vector<24x128xf32>
    %454 = arith.addf %448, %453 : vector<24x128xf32>
    %455 = vector.broadcast %43 : f32 to vector<24x128xf32>
    %456 = arith.mulf %455, %425 : vector<24x128xf32>
    %457 = arith.addf %451, %456 : vector<24x128xf32>
    %458 = vector.broadcast %34 : f32 to vector<24x128xf32>
    %459 = arith.mulf %458, %425 : vector<24x128xf32>
    %460 = arith.addf %454, %459 : vector<24x128xf32>
    %461 = vector.broadcast %44 : f32 to vector<24x128xf32>
    %462 = arith.mulf %461, %427 : vector<24x128xf32>
    %463 = arith.addf %457, %462 : vector<24x128xf32>
    %464 = vector.broadcast %35 : f32 to vector<24x128xf32>
    %465 = arith.mulf %464, %427 : vector<24x128xf32>
    %466 = arith.addf %460, %465 : vector<24x128xf32>
    %c23_i32_70 = arith.constant 23 : i32
    %467 = tpu.dynamic_rotate %426 by %c23_i32_70 dim 0 : vector<24x128xf32>, i32 -> vector<24x128xf32>
    %468 = vector.broadcast %45 : f32 to vector<24x128xf32>
    %469 = arith.mulf %468, %467 : vector<24x128xf32>
    %470 = arith.addf %463, %469 : vector<24x128xf32>
    %471 = vector.broadcast %36 : f32 to vector<24x128xf32>
    %472 = arith.mulf %471, %467 : vector<24x128xf32>
    %473 = arith.addf %466, %472 : vector<24x128xf32>
    %c23_i32_71 = arith.constant 23 : i32
    %474 = tpu.dynamic_rotate %425 by %c23_i32_71 dim 0 : vector<24x128xf32>, i32 -> vector<24x128xf32>
    %475 = vector.broadcast %46 : f32 to vector<24x128xf32>
    %476 = arith.mulf %475, %474 : vector<24x128xf32>
    %477 = arith.addf %470, %476 : vector<24x128xf32>
    %478 = vector.broadcast %37 : f32 to vector<24x128xf32>
    %479 = arith.mulf %478, %474 : vector<24x128xf32>
    %480 = arith.addf %473, %479 : vector<24x128xf32>
    %c23_i32_72 = arith.constant 23 : i32
    %481 = tpu.dynamic_rotate %427 by %c23_i32_72 dim 0 : vector<24x128xf32>, i32 -> vector<24x128xf32>
    %482 = vector.broadcast %47 : f32 to vector<24x128xf32>
    %483 = arith.mulf %482, %481 : vector<24x128xf32>
    %484 = arith.addf %477, %483 : vector<24x128xf32>
    %485 = vector.broadcast %38 : f32 to vector<24x128xf32>
    %486 = arith.mulf %485, %481 : vector<24x128xf32>
    %487 = arith.addf %480, %486 : vector<24x128xf32>
    %c0_73 = arith.constant 0 : index
    %c6_74 = arith.constant 6 : index
    %c0_75 = arith.constant 0 : index
    %c0_76 = arith.constant 0 : index
    %488 = vector.load %arg3[%c0_73, %c6_74, %c0_75, %c0_76] : memref<1x7x24x128xf32, #tpu.memory_space<vmem>>, vector<1x1x24x128xf32>
    %489 = vector.shape_cast %488 : vector<1x1x24x128xf32> to vector<24x128xf32>
    %c1_i32_77 = arith.constant 1 : i32
    %490 = tpu.dynamic_rotate %489 by %c1_i32_77 dim 1 : vector<24x128xf32>, i32 -> vector<24x128xf32>
    %c127_i32_78 = arith.constant 127 : i32
    %491 = tpu.dynamic_rotate %489 by %c127_i32_78 dim 1 : vector<24x128xf32>, i32 -> vector<24x128xf32>
    %c1_i32_79 = arith.constant 1 : i32
    %492 = tpu.dynamic_rotate %490 by %c1_i32_79 dim 0 : vector<24x128xf32>, i32 -> vector<24x128xf32>
    %493 = vector.broadcast %39 : f32 to vector<24x128xf32>
    %494 = arith.mulf %493, %492 : vector<24x128xf32>
    %495 = arith.addf %487, %494 : vector<24x128xf32>
    %c1_i32_80 = arith.constant 1 : i32
    %496 = tpu.dynamic_rotate %489 by %c1_i32_80 dim 0 : vector<24x128xf32>, i32 -> vector<24x128xf32>
    %497 = vector.broadcast %40 : f32 to vector<24x128xf32>
    %498 = arith.mulf %497, %496 : vector<24x128xf32>
    %499 = arith.addf %495, %498 : vector<24x128xf32>
    %c1_i32_81 = arith.constant 1 : i32
    %500 = tpu.dynamic_rotate %491 by %c1_i32_81 dim 0 : vector<24x128xf32>, i32 -> vector<24x128xf32>
    %501 = vector.broadcast %41 : f32 to vector<24x128xf32>
    %502 = arith.mulf %501, %500 : vector<24x128xf32>
    %503 = arith.addf %499, %502 : vector<24x128xf32>
    %504 = vector.broadcast %42 : f32 to vector<24x128xf32>
    %505 = arith.mulf %504, %490 : vector<24x128xf32>
    %506 = arith.addf %503, %505 : vector<24x128xf32>
    %507 = vector.broadcast %43 : f32 to vector<24x128xf32>
    %508 = arith.mulf %507, %489 : vector<24x128xf32>
    %509 = arith.addf %506, %508 : vector<24x128xf32>
    %510 = vector.broadcast %44 : f32 to vector<24x128xf32>
    %511 = arith.mulf %510, %491 : vector<24x128xf32>
    %512 = arith.addf %509, %511 : vector<24x128xf32>
    %c23_i32_82 = arith.constant 23 : i32
    %513 = tpu.dynamic_rotate %490 by %c23_i32_82 dim 0 : vector<24x128xf32>, i32 -> vector<24x128xf32>
    %514 = vector.broadcast %45 : f32 to vector<24x128xf32>
    %515 = arith.mulf %514, %513 : vector<24x128xf32>
    %516 = arith.addf %512, %515 : vector<24x128xf32>
    %c23_i32_83 = arith.constant 23 : i32
    %517 = tpu.dynamic_rotate %489 by %c23_i32_83 dim 0 : vector<24x128xf32>, i32 -> vector<24x128xf32>
    %518 = vector.broadcast %46 : f32 to vector<24x128xf32>
    %519 = arith.mulf %518, %517 : vector<24x128xf32>
    %520 = arith.addf %516, %519 : vector<24x128xf32>
    %c23_i32_84 = arith.constant 23 : i32
    %521 = tpu.dynamic_rotate %491 by %c23_i32_84 dim 0 : vector<24x128xf32>, i32 -> vector<24x128xf32>
    %522 = vector.broadcast %47 : f32 to vector<24x128xf32>
    %523 = arith.mulf %522, %521 : vector<24x128xf32>
    %524 = arith.addf %520, %523 : vector<24x128xf32>
    %525 = arith.mulf %235, %20 : vector<24x128xf32>
    %c0_85 = arith.constant 0 : index
    %c0_86 = arith.constant 0 : index
    %c0_87 = arith.constant 0 : index
    %526 = vector.load %arg5[%c0_85, %c0_86, %c0_87] : memref<5x24x128xf32, #tpu.memory_space<vmem>>, vector<1x24x128xf32>
    %527 = vector.shape_cast %526 : vector<1x24x128xf32> to vector<24x128xf32>
    %528 = vector.shape_cast %525 : vector<24x128xf32> to vector<1x24x128xf32>
    tpu.vector_store %arg5[%c0_85, %c0_86, %c0_87], %528 {strides = array<i32>} : memref<5x24x128xf32, #tpu.memory_space<vmem>>, vector<1x24x128xf32>,
    %529 = arith.mulf %326, %20 : vector<24x128xf32>
    %c1_88 = arith.constant 1 : index
    %c0_89 = arith.constant 0 : index
    %c0_90 = arith.constant 0 : index
    %530 = vector.load %arg5[%c1_88, %c0_89, %c0_90] : memref<5x24x128xf32, #tpu.memory_space<vmem>>, vector<1x24x128xf32>
    %531 = vector.shape_cast %530 : vector<1x24x128xf32> to vector<24x128xf32>
    %532 = vector.shape_cast %529 : vector<24x128xf32> to vector<1x24x128xf32>
    tpu.vector_store %arg5[%c1_88, %c0_89, %c0_90], %532 {strides = array<i32>} : memref<5x24x128xf32, #tpu.memory_space<vmem>>, vector<1x24x128xf32>,
    %533 = arith.mulf %417, %20 : vector<24x128xf32>
    %c2_91 = arith.constant 2 : index
    %c0_92 = arith.constant 0 : index
    %c0_93 = arith.constant 0 : index
    %534 = vector.load %arg5[%c2_91, %c0_92, %c0_93] : memref<5x24x128xf32, #tpu.memory_space<vmem>>, vector<1x24x128xf32>
    %535 = vector.shape_cast %534 : vector<1x24x128xf32> to vector<24x128xf32>
    %536 = vector.shape_cast %533 : vector<24x128xf32> to vector<1x24x128xf32>
    tpu.vector_store %arg5[%c2_91, %c0_92, %c0_93], %536 {strides = array<i32>} : memref<5x24x128xf32, #tpu.memory_space<vmem>>, vector<1x24x128xf32>,
    %537 = arith.mulf %484, %20 : vector<24x128xf32>
    %c3_94 = arith.constant 3 : index
    %c0_95 = arith.constant 0 : index
    %c0_96 = arith.constant 0 : index
    %538 = vector.load %arg5[%c3_94, %c0_95, %c0_96] : memref<5x24x128xf32, #tpu.memory_space<vmem>>, vector<1x24x128xf32>
    %539 = vector.shape_cast %538 : vector<1x24x128xf32> to vector<24x128xf32>
    %540 = vector.shape_cast %537 : vector<24x128xf32> to vector<1x24x128xf32>
    tpu.vector_store %arg5[%c3_94, %c0_95, %c0_96], %540 {strides = array<i32>} : memref<5x24x128xf32, #tpu.memory_space<vmem>>, vector<1x24x128xf32>,
    %541 = arith.mulf %524, %20 : vector<24x128xf32>
    %c4_97 = arith.constant 4 : index
    %c0_98 = arith.constant 0 : index
    %c0_99 = arith.constant 0 : index
    %542 = vector.load %arg5[%c4_97, %c0_98, %c0_99] : memref<5x24x128xf32, #tpu.memory_space<vmem>>, vector<1x24x128xf32>
    %543 = vector.shape_cast %542 : vector<1x24x128xf32> to vector<24x128xf32>
    %544 = vector.shape_cast %541 : vector<24x128xf32> to vector<1x24x128xf32>
    tpu.vector_store %arg5[%c4_97, %c0_98, %c0_99], %544 {strides = array<i32>} : memref<5x24x128xf32, #tpu.memory_space<vmem>>, vector<1x24x128xf32>,
    %c27 = arith.constant 27 : index
    %545 = memref.load %arg1[%c27] : memref<81xf32, #tpu.memory_space<smem>>
    %c28 = arith.constant 28 : index
    %546 = memref.load %arg1[%c28] : memref<81xf32, #tpu.memory_space<smem>>
    %c29 = arith.constant 29 : index
    %547 = memref.load %arg1[%c29] : memref<81xf32, #tpu.memory_space<smem>>
    %c30 = arith.constant 30 : index
    %548 = memref.load %arg1[%c30] : memref<81xf32, #tpu.memory_space<smem>>
    %c31 = arith.constant 31 : index
    %549 = memref.load %arg1[%c31] : memref<81xf32, #tpu.memory_space<smem>>
    %c32 = arith.constant 32 : index
    %550 = memref.load %arg1[%c32] : memref<81xf32, #tpu.memory_space<smem>>
    %c33 = arith.constant 33 : index
    %551 = memref.load %arg1[%c33] : memref<81xf32, #tpu.memory_space<smem>>
    %c34 = arith.constant 34 : index
    %552 = memref.load %arg1[%c34] : memref<81xf32, #tpu.memory_space<smem>>
    %c35 = arith.constant 35 : index
    %553 = memref.load %arg1[%c35] : memref<81xf32, #tpu.memory_space<smem>>
    %c36 = arith.constant 36 : index
    %554 = memref.load %arg1[%c36] : memref<81xf32, #tpu.memory_space<smem>>
    %c37 = arith.constant 37 : index
    %555 = memref.load %arg1[%c37] : memref<81xf32, #tpu.memory_space<smem>>
    %c38 = arith.constant 38 : index
    %556 = memref.load %arg1[%c38] : memref<81xf32, #tpu.memory_space<smem>>
    %c39 = arith.constant 39 : index
    %557 = memref.load %arg1[%c39] : memref<81xf32, #tpu.memory_space<smem>>
    %c40 = arith.constant 40 : index
    %558 = memref.load %arg1[%c40] : memref<81xf32, #tpu.memory_space<smem>>
    %c41 = arith.constant 41 : index
    %559 = memref.load %arg1[%c41] : memref<81xf32, #tpu.memory_space<smem>>
    %c42 = arith.constant 42 : index
    %560 = memref.load %arg1[%c42] : memref<81xf32, #tpu.memory_space<smem>>
    %c43 = arith.constant 43 : index
    %561 = memref.load %arg1[%c43] : memref<81xf32, #tpu.memory_space<smem>>
    %c44 = arith.constant 44 : index
    %562 = memref.load %arg1[%c44] : memref<81xf32, #tpu.memory_space<smem>>
    %c45 = arith.constant 45 : index
    %563 = memref.load %arg1[%c45] : memref<81xf32, #tpu.memory_space<smem>>
    %c46 = arith.constant 46 : index
    %564 = memref.load %arg1[%c46] : memref<81xf32, #tpu.memory_space<smem>>
    %c47 = arith.constant 47 : index
    %565 = memref.load %arg1[%c47] : memref<81xf32, #tpu.memory_space<smem>>
    %c48 = arith.constant 48 : index
    %566 = memref.load %arg1[%c48] : memref<81xf32, #tpu.memory_space<smem>>
    %c49 = arith.constant 49 : index
    %567 = memref.load %arg1[%c49] : memref<81xf32, #tpu.memory_space<smem>>
    %c50 = arith.constant 50 : index
    %568 = memref.load %arg1[%c50] : memref<81xf32, #tpu.memory_space<smem>>
    %c51 = arith.constant 51 : index
    %569 = memref.load %arg1[%c51] : memref<81xf32, #tpu.memory_space<smem>>
    %c52 = arith.constant 52 : index
    %570 = memref.load %arg1[%c52] : memref<81xf32, #tpu.memory_space<smem>>
    %c53 = arith.constant 53 : index
    %571 = memref.load %arg1[%c53] : memref<81xf32, #tpu.memory_space<smem>>
    %c1_100 = arith.constant 1 : index
    %572 = memref.load %arg2[%c1_100] : memref<3xf32, #tpu.memory_space<smem>>
    %573 = vector.broadcast %572 : f32 to vector<24x128xf32>
    %c0_101 = arith.constant 0 : index
    %c0_102 = arith.constant 0 : index
    %c0_103 = arith.constant 0 : index
    %574 = vector.load %arg5[%c0_101, %c0_102, %c0_103] : memref<5x24x128xf32, #tpu.memory_space<vmem>>, vector<1x24x128xf32>
    %575 = vector.shape_cast %574 : vector<1x24x128xf32> to vector<24x128xf32>
    %c1_i32_104 = arith.constant 1 : i32
    %576 = tpu.dynamic_rotate %575 by %c1_i32_104 dim 1 : vector<24x128xf32>, i32 -> vector<24x128xf32>
    %c127_i32_105 = arith.constant 127 : i32
    %577 = tpu.dynamic_rotate %575 by %c127_i32_105 dim 1 : vector<24x128xf32>, i32 -> vector<24x128xf32>
    %c1_i32_106 = arith.constant 1 : i32
    %578 = tpu.dynamic_rotate %576 by %c1_i32_106 dim 0 : vector<24x128xf32>, i32 -> vector<24x128xf32>
    %579 = vector.broadcast %545 : f32 to vector<24x128xf32>
    %580 = arith.mulf %579, %578 : vector<24x128xf32>
    %581 = arith.addf %573, %580 : vector<24x128xf32>
    %c1_i32_107 = arith.constant 1 : i32
    %582 = tpu.dynamic_rotate %575 by %c1_i32_107 dim 0 : vector<24x128xf32>, i32 -> vector<24x128xf32>
    %583 = vector.broadcast %546 : f32 to vector<24x128xf32>
    %584 = arith.mulf %583, %582 : vector<24x128xf32>
    %585 = arith.addf %581, %584 : vector<24x128xf32>
    %c1_i32_108 = arith.constant 1 : i32
    %586 = tpu.dynamic_rotate %577 by %c1_i32_108 dim 0 : vector<24x128xf32>, i32 -> vector<24x128xf32>
    %587 = vector.broadcast %547 : f32 to vector<24x128xf32>
    %588 = arith.mulf %587, %586 : vector<24x128xf32>
    %589 = arith.addf %585, %588 : vector<24x128xf32>
    %590 = vector.broadcast %548 : f32 to vector<24x128xf32>
    %591 = arith.mulf %590, %576 : vector<24x128xf32>
    %592 = arith.addf %589, %591 : vector<24x128xf32>
    %593 = vector.broadcast %549 : f32 to vector<24x128xf32>
    %594 = arith.mulf %593, %575 : vector<24x128xf32>
    %595 = arith.addf %592, %594 : vector<24x128xf32>
    %596 = vector.broadcast %550 : f32 to vector<24x128xf32>
    %597 = arith.mulf %596, %577 : vector<24x128xf32>
    %598 = arith.addf %595, %597 : vector<24x128xf32>
    %c23_i32_109 = arith.constant 23 : i32
    %599 = tpu.dynamic_rotate %576 by %c23_i32_109 dim 0 : vector<24x128xf32>, i32 -> vector<24x128xf32>
    %600 = vector.broadcast %551 : f32 to vector<24x128xf32>
    %601 = arith.mulf %600, %599 : vector<24x128xf32>
    %602 = arith.addf %598, %601 : vector<24x128xf32>
    %c23_i32_110 = arith.constant 23 : i32
    %603 = tpu.dynamic_rotate %575 by %c23_i32_110 dim 0 : vector<24x128xf32>, i32 -> vector<24x128xf32>
    %604 = vector.broadcast %552 : f32 to vector<24x128xf32>
    %605 = arith.mulf %604, %603 : vector<24x128xf32>
    %606 = arith.addf %602, %605 : vector<24x128xf32>
    %c23_i32_111 = arith.constant 23 : i32
    %607 = tpu.dynamic_rotate %577 by %c23_i32_111 dim 0 : vector<24x128xf32>, i32 -> vector<24x128xf32>
    %608 = vector.broadcast %553 : f32 to vector<24x128xf32>
    %609 = arith.mulf %608, %607 : vector<24x128xf32>
    %610 = arith.addf %606, %609 : vector<24x128xf32>
    %c1_112 = arith.constant 1 : index
    %c0_113 = arith.constant 0 : index
    %c0_114 = arith.constant 0 : index
    %611 = vector.load %arg5[%c1_112, %c0_113, %c0_114] : memref<5x24x128xf32, #tpu.memory_space<vmem>>, vector<1x24x128xf32>
    %612 = vector.shape_cast %611 : vector<1x24x128xf32> to vector<24x128xf32>
    %c1_i32_115 = arith.constant 1 : i32
    %613 = tpu.dynamic_rotate %612 by %c1_i32_115 dim 1 : vector<24x128xf32>, i32 -> vector<24x128xf32>
    %c127_i32_116 = arith.constant 127 : i32
    %614 = tpu.dynamic_rotate %612 by %c127_i32_116 dim 1 : vector<24x128xf32>, i32 -> vector<24x128xf32>
    %c1_i32_117 = arith.constant 1 : i32
    %615 = tpu.dynamic_rotate %613 by %c1_i32_117 dim 0 : vector<24x128xf32>, i32 -> vector<24x128xf32>
    %616 = vector.broadcast %554 : f32 to vector<24x128xf32>
    %617 = arith.mulf %616, %615 : vector<24x128xf32>
    %618 = arith.addf %610, %617 : vector<24x128xf32>
    %619 = vector.broadcast %545 : f32 to vector<24x128xf32>
    %620 = arith.mulf %619, %615 : vector<24x128xf32>
    %621 = arith.addf %573, %620 : vector<24x128xf32>
    %c1_i32_118 = arith.constant 1 : i32
    %622 = tpu.dynamic_rotate %612 by %c1_i32_118 dim 0 : vector<24x128xf32>, i32 -> vector<24x128xf32>
    %623 = vector.broadcast %555 : f32 to vector<24x128xf32>
    %624 = arith.mulf %623, %622 : vector<24x128xf32>
    %625 = arith.addf %618, %624 : vector<24x128xf32>
    %626 = vector.broadcast %546 : f32 to vector<24x128xf32>
    %627 = arith.mulf %626, %622 : vector<24x128xf32>
    %628 = arith.addf %621, %627 : vector<24x128xf32>
    %c1_i32_119 = arith.constant 1 : i32
    %629 = tpu.dynamic_rotate %614 by %c1_i32_119 dim 0 : vector<24x128xf32>, i32 -> vector<24x128xf32>
    %630 = vector.broadcast %556 : f32 to vector<24x128xf32>
    %631 = arith.mulf %630, %629 : vector<24x128xf32>
    %632 = arith.addf %625, %631 : vector<24x128xf32>
    %633 = vector.broadcast %547 : f32 to vector<24x128xf32>
    %634 = arith.mulf %633, %629 : vector<24x128xf32>
    %635 = arith.addf %628, %634 : vector<24x128xf32>
    %636 = vector.broadcast %557 : f32 to vector<24x128xf32>
    %637 = arith.mulf %636, %613 : vector<24x128xf32>
    %638 = arith.addf %632, %637 : vector<24x128xf32>
    %639 = vector.broadcast %548 : f32 to vector<24x128xf32>
    %640 = arith.mulf %639, %613 : vector<24x128xf32>
    %641 = arith.addf %635, %640 : vector<24x128xf32>
    %642 = vector.broadcast %558 : f32 to vector<24x128xf32>
    %643 = arith.mulf %642, %612 : vector<24x128xf32>
    %644 = arith.addf %638, %643 : vector<24x128xf32>
    %645 = vector.broadcast %549 : f32 to vector<24x128xf32>
    %646 = arith.mulf %645, %612 : vector<24x128xf32>
    %647 = arith.addf %641, %646 : vector<24x128xf32>
    %648 = vector.broadcast %559 : f32 to vector<24x128xf32>
    %649 = arith.mulf %648, %614 : vector<24x128xf32>
    %650 = arith.addf %644, %649 : vector<24x128xf32>
    %651 = vector.broadcast %550 : f32 to vector<24x128xf32>
    %652 = arith.mulf %651, %614 : vector<24x128xf32>
    %653 = arith.addf %647, %652 : vector<24x128xf32>
    %c23_i32_120 = arith.constant 23 : i32
    %654 = tpu.dynamic_rotate %613 by %c23_i32_120 dim 0 : vector<24x128xf32>, i32 -> vector<24x128xf32>
    %655 = vector.broadcast %560 : f32 to vector<24x128xf32>
    %656 = arith.mulf %655, %654 : vector<24x128xf32>
    %657 = arith.addf %650, %656 : vector<24x128xf32>
    %658 = vector.broadcast %551 : f32 to vector<24x128xf32>
    %659 = arith.mulf %658, %654 : vector<24x128xf32>
    %660 = arith.addf %653, %659 : vector<24x128xf32>
    %c23_i32_121 = arith.constant 23 : i32
    %661 = tpu.dynamic_rotate %612 by %c23_i32_121 dim 0 : vector<24x128xf32>, i32 -> vector<24x128xf32>
    %662 = vector.broadcast %561 : f32 to vector<24x128xf32>
    %663 = arith.mulf %662, %661 : vector<24x128xf32>
    %664 = arith.addf %657, %663 : vector<24x128xf32>
    %665 = vector.broadcast %552 : f32 to vector<24x128xf32>
    %666 = arith.mulf %665, %661 : vector<24x128xf32>
    %667 = arith.addf %660, %666 : vector<24x128xf32>
    %c23_i32_122 = arith.constant 23 : i32
    %668 = tpu.dynamic_rotate %614 by %c23_i32_122 dim 0 : vector<24x128xf32>, i32 -> vector<24x128xf32>
    %669 = vector.broadcast %562 : f32 to vector<24x128xf32>
    %670 = arith.mulf %669, %668 : vector<24x128xf32>
    %671 = arith.addf %664, %670 : vector<24x128xf32>
    %672 = vector.broadcast %553 : f32 to vector<24x128xf32>
    %673 = arith.mulf %672, %668 : vector<24x128xf32>
    %674 = arith.addf %667, %673 : vector<24x128xf32>
    %c2_123 = arith.constant 2 : index
    %c0_124 = arith.constant 0 : index
    %c0_125 = arith.constant 0 : index
    %675 = vector.load %arg5[%c2_123, %c0_124, %c0_125] : memref<5x24x128xf32, #tpu.memory_space<vmem>>, vector<1x24x128xf32>
    %676 = vector.shape_cast %675 : vector<1x24x128xf32> to vector<24x128xf32>
    %c1_i32_126 = arith.constant 1 : i32
    %677 = tpu.dynamic_rotate %676 by %c1_i32_126 dim 1 : vector<24x128xf32>, i32 -> vector<24x128xf32>
    %c127_i32_127 = arith.constant 127 : i32
    %678 = tpu.dynamic_rotate %676 by %c127_i32_127 dim 1 : vector<24x128xf32>, i32 -> vector<24x128xf32>
    %c1_i32_128 = arith.constant 1 : i32
    %679 = tpu.dynamic_rotate %677 by %c1_i32_128 dim 0 : vector<24x128xf32>, i32 -> vector<24x128xf32>
    %680 = vector.broadcast %563 : f32 to vector<24x128xf32>
    %681 = arith.mulf %680, %679 : vector<24x128xf32>
    %682 = arith.addf %671, %681 : vector<24x128xf32>
    %683 = vector.broadcast %554 : f32 to vector<24x128xf32>
    %684 = arith.mulf %683, %679 : vector<24x128xf32>
    %685 = arith.addf %674, %684 : vector<24x128xf32>
    %686 = vector.broadcast %545 : f32 to vector<24x128xf32>
    %687 = arith.mulf %686, %679 : vector<24x128xf32>
    %688 = arith.addf %573, %687 : vector<24x128xf32>
    %c1_i32_129 = arith.constant 1 : i32
    %689 = tpu.dynamic_rotate %676 by %c1_i32_129 dim 0 : vector<24x128xf32>, i32 -> vector<24x128xf32>
    %690 = vector.broadcast %564 : f32 to vector<24x128xf32>
    %691 = arith.mulf %690, %689 : vector<24x128xf32>
    %692 = arith.addf %682, %691 : vector<24x128xf32>
    %693 = vector.broadcast %555 : f32 to vector<24x128xf32>
    %694 = arith.mulf %693, %689 : vector<24x128xf32>
    %695 = arith.addf %685, %694 : vector<24x128xf32>
    %696 = vector.broadcast %546 : f32 to vector<24x128xf32>
    %697 = arith.mulf %696, %689 : vector<24x128xf32>
    %698 = arith.addf %688, %697 : vector<24x128xf32>
    %c1_i32_130 = arith.constant 1 : i32
    %699 = tpu.dynamic_rotate %678 by %c1_i32_130 dim 0 : vector<24x128xf32>, i32 -> vector<24x128xf32>
    %700 = vector.broadcast %565 : f32 to vector<24x128xf32>
    %701 = arith.mulf %700, %699 : vector<24x128xf32>
    %702 = arith.addf %692, %701 : vector<24x128xf32>
    %703 = vector.broadcast %556 : f32 to vector<24x128xf32>
    %704 = arith.mulf %703, %699 : vector<24x128xf32>
    %705 = arith.addf %695, %704 : vector<24x128xf32>
    %706 = vector.broadcast %547 : f32 to vector<24x128xf32>
    %707 = arith.mulf %706, %699 : vector<24x128xf32>
    %708 = arith.addf %698, %707 : vector<24x128xf32>
    %709 = vector.broadcast %566 : f32 to vector<24x128xf32>
    %710 = arith.mulf %709, %677 : vector<24x128xf32>
    %711 = arith.addf %702, %710 : vector<24x128xf32>
    %712 = vector.broadcast %557 : f32 to vector<24x128xf32>
    %713 = arith.mulf %712, %677 : vector<24x128xf32>
    %714 = arith.addf %705, %713 : vector<24x128xf32>
    %715 = vector.broadcast %548 : f32 to vector<24x128xf32>
    %716 = arith.mulf %715, %677 : vector<24x128xf32>
    %717 = arith.addf %708, %716 : vector<24x128xf32>
    %718 = vector.broadcast %567 : f32 to vector<24x128xf32>
    %719 = arith.mulf %718, %676 : vector<24x128xf32>
    %720 = arith.addf %711, %719 : vector<24x128xf32>
    %721 = vector.broadcast %558 : f32 to vector<24x128xf32>
    %722 = arith.mulf %721, %676 : vector<24x128xf32>
    %723 = arith.addf %714, %722 : vector<24x128xf32>
    %724 = vector.broadcast %549 : f32 to vector<24x128xf32>
    %725 = arith.mulf %724, %676 : vector<24x128xf32>
    %726 = arith.addf %717, %725 : vector<24x128xf32>
    %727 = vector.broadcast %568 : f32 to vector<24x128xf32>
    %728 = arith.mulf %727, %678 : vector<24x128xf32>
    %729 = arith.addf %720, %728 : vector<24x128xf32>
    %730 = vector.broadcast %559 : f32 to vector<24x128xf32>
    %731 = arith.mulf %730, %678 : vector<24x128xf32>
    %732 = arith.addf %723, %731 : vector<24x128xf32>
    %733 = vector.broadcast %550 : f32 to vector<24x128xf32>
    %734 = arith.mulf %733, %678 : vector<24x128xf32>
    %735 = arith.addf %726, %734 : vector<24x128xf32>
    %c23_i32_131 = arith.constant 23 : i32
    %736 = tpu.dynamic_rotate %677 by %c23_i32_131 dim 0 : vector<24x128xf32>, i32 -> vector<24x128xf32>
    %737 = vector.broadcast %569 : f32 to vector<24x128xf32>
    %738 = arith.mulf %737, %736 : vector<24x128xf32>
    %739 = arith.addf %729, %738 : vector<24x128xf32>
    %740 = vector.broadcast %560 : f32 to vector<24x128xf32>
    %741 = arith.mulf %740, %736 : vector<24x128xf32>
    %742 = arith.addf %732, %741 : vector<24x128xf32>
    %743 = vector.broadcast %551 : f32 to vector<24x128xf32>
    %744 = arith.mulf %743, %736 : vector<24x128xf32>
    %745 = arith.addf %735, %744 : vector<24x128xf32>
    %c23_i32_132 = arith.constant 23 : i32
    %746 = tpu.dynamic_rotate %676 by %c23_i32_132 dim 0 : vector<24x128xf32>, i32 -> vector<24x128xf32>
    %747 = vector.broadcast %570 : f32 to vector<24x128xf32>
    %748 = arith.mulf %747, %746 : vector<24x128xf32>
    %749 = arith.addf %739, %748 : vector<24x128xf32>
    %750 = vector.broadcast %561 : f32 to vector<24x128xf32>
    %751 = arith.mulf %750, %746 : vector<24x128xf32>
    %752 = arith.addf %742, %751 : vector<24x128xf32>
    %753 = vector.broadcast %552 : f32 to vector<24x128xf32>
    %754 = arith.mulf %753, %746 : vector<24x128xf32>
    %755 = arith.addf %745, %754 : vector<24x128xf32>
    %c23_i32_133 = arith.constant 23 : i32
    %756 = tpu.dynamic_rotate %678 by %c23_i32_133 dim 0 : vector<24x128xf32>, i32 -> vector<24x128xf32>
    %757 = vector.broadcast %571 : f32 to vector<24x128xf32>
    %758 = arith.mulf %757, %756 : vector<24x128xf32>
    %759 = arith.addf %749, %758 : vector<24x128xf32>
    %760 = vector.broadcast %562 : f32 to vector<24x128xf32>
    %761 = arith.mulf %760, %756 : vector<24x128xf32>
    %762 = arith.addf %752, %761 : vector<24x128xf32>
    %763 = vector.broadcast %553 : f32 to vector<24x128xf32>
    %764 = arith.mulf %763, %756 : vector<24x128xf32>
    %765 = arith.addf %755, %764 : vector<24x128xf32>
    %c3_134 = arith.constant 3 : index
    %c0_135 = arith.constant 0 : index
    %c0_136 = arith.constant 0 : index
    %766 = vector.load %arg5[%c3_134, %c0_135, %c0_136] : memref<5x24x128xf32, #tpu.memory_space<vmem>>, vector<1x24x128xf32>
    %767 = vector.shape_cast %766 : vector<1x24x128xf32> to vector<24x128xf32>
    %c1_i32_137 = arith.constant 1 : i32
    %768 = tpu.dynamic_rotate %767 by %c1_i32_137 dim 1 : vector<24x128xf32>, i32 -> vector<24x128xf32>
    %c127_i32_138 = arith.constant 127 : i32
    %769 = tpu.dynamic_rotate %767 by %c127_i32_138 dim 1 : vector<24x128xf32>, i32 -> vector<24x128xf32>
    %c1_i32_139 = arith.constant 1 : i32
    %770 = tpu.dynamic_rotate %768 by %c1_i32_139 dim 0 : vector<24x128xf32>, i32 -> vector<24x128xf32>
    %771 = vector.broadcast %563 : f32 to vector<24x128xf32>
    %772 = arith.mulf %771, %770 : vector<24x128xf32>
    %773 = arith.addf %762, %772 : vector<24x128xf32>
    %774 = vector.broadcast %554 : f32 to vector<24x128xf32>
    %775 = arith.mulf %774, %770 : vector<24x128xf32>
    %776 = arith.addf %765, %775 : vector<24x128xf32>
    %c1_i32_140 = arith.constant 1 : i32
    %777 = tpu.dynamic_rotate %767 by %c1_i32_140 dim 0 : vector<24x128xf32>, i32 -> vector<24x128xf32>
    %778 = vector.broadcast %564 : f32 to vector<24x128xf32>
    %779 = arith.mulf %778, %777 : vector<24x128xf32>
    %780 = arith.addf %773, %779 : vector<24x128xf32>
    %781 = vector.broadcast %555 : f32 to vector<24x128xf32>
    %782 = arith.mulf %781, %777 : vector<24x128xf32>
    %783 = arith.addf %776, %782 : vector<24x128xf32>
    %c1_i32_141 = arith.constant 1 : i32
    %784 = tpu.dynamic_rotate %769 by %c1_i32_141 dim 0 : vector<24x128xf32>, i32 -> vector<24x128xf32>
    %785 = vector.broadcast %565 : f32 to vector<24x128xf32>
    %786 = arith.mulf %785, %784 : vector<24x128xf32>
    %787 = arith.addf %780, %786 : vector<24x128xf32>
    %788 = vector.broadcast %556 : f32 to vector<24x128xf32>
    %789 = arith.mulf %788, %784 : vector<24x128xf32>
    %790 = arith.addf %783, %789 : vector<24x128xf32>
    %791 = vector.broadcast %566 : f32 to vector<24x128xf32>
    %792 = arith.mulf %791, %768 : vector<24x128xf32>
    %793 = arith.addf %787, %792 : vector<24x128xf32>
    %794 = vector.broadcast %557 : f32 to vector<24x128xf32>
    %795 = arith.mulf %794, %768 : vector<24x128xf32>
    %796 = arith.addf %790, %795 : vector<24x128xf32>
    %797 = vector.broadcast %567 : f32 to vector<24x128xf32>
    %798 = arith.mulf %797, %767 : vector<24x128xf32>
    %799 = arith.addf %793, %798 : vector<24x128xf32>
    %800 = vector.broadcast %558 : f32 to vector<24x128xf32>
    %801 = arith.mulf %800, %767 : vector<24x128xf32>
    %802 = arith.addf %796, %801 : vector<24x128xf32>
    %803 = vector.broadcast %568 : f32 to vector<24x128xf32>
    %804 = arith.mulf %803, %769 : vector<24x128xf32>
    %805 = arith.addf %799, %804 : vector<24x128xf32>
    %806 = vector.broadcast %559 : f32 to vector<24x128xf32>
    %807 = arith.mulf %806, %769 : vector<24x128xf32>
    %808 = arith.addf %802, %807 : vector<24x128xf32>
    %c23_i32_142 = arith.constant 23 : i32
    %809 = tpu.dynamic_rotate %768 by %c23_i32_142 dim 0 : vector<24x128xf32>, i32 -> vector<24x128xf32>
    %810 = vector.broadcast %569 : f32 to vector<24x128xf32>
    %811 = arith.mulf %810, %809 : vector<24x128xf32>
    %812 = arith.addf %805, %811 : vector<24x128xf32>
    %813 = vector.broadcast %560 : f32 to vector<24x128xf32>
    %814 = arith.mulf %813, %809 : vector<24x128xf32>
    %815 = arith.addf %808, %814 : vector<24x128xf32>
    %c23_i32_143 = arith.constant 23 : i32
    %816 = tpu.dynamic_rotate %767 by %c23_i32_143 dim 0 : vector<24x128xf32>, i32 -> vector<24x128xf32>
    %817 = vector.broadcast %570 : f32 to vector<24x128xf32>
    %818 = arith.mulf %817, %816 : vector<24x128xf32>
    %819 = arith.addf %812, %818 : vector<24x128xf32>
    %820 = vector.broadcast %561 : f32 to vector<24x128xf32>
    %821 = arith.mulf %820, %816 : vector<24x128xf32>
    %822 = arith.addf %815, %821 : vector<24x128xf32>
    %c23_i32_144 = arith.constant 23 : i32
    %823 = tpu.dynamic_rotate %769 by %c23_i32_144 dim 0 : vector<24x128xf32>, i32 -> vector<24x128xf32>
    %824 = vector.broadcast %571 : f32 to vector<24x128xf32>
    %825 = arith.mulf %824, %823 : vector<24x128xf32>
    %826 = arith.addf %819, %825 : vector<24x128xf32>
    %827 = vector.broadcast %562 : f32 to vector<24x128xf32>
    %828 = arith.mulf %827, %823 : vector<24x128xf32>
    %829 = arith.addf %822, %828 : vector<24x128xf32>
    %c4_145 = arith.constant 4 : index
    %c0_146 = arith.constant 0 : index
    %c0_147 = arith.constant 0 : index
    %830 = vector.load %arg5[%c4_145, %c0_146, %c0_147] : memref<5x24x128xf32, #tpu.memory_space<vmem>>, vector<1x24x128xf32>
    %831 = vector.shape_cast %830 : vector<1x24x128xf32> to vector<24x128xf32>
    %c1_i32_148 = arith.constant 1 : i32
    %832 = tpu.dynamic_rotate %831 by %c1_i32_148 dim 1 : vector<24x128xf32>, i32 -> vector<24x128xf32>
    %c127_i32_149 = arith.constant 127 : i32
    %833 = tpu.dynamic_rotate %831 by %c127_i32_149 dim 1 : vector<24x128xf32>, i32 -> vector<24x128xf32>
    %c1_i32_150 = arith.constant 1 : i32
    %834 = tpu.dynamic_rotate %832 by %c1_i32_150 dim 0 : vector<24x128xf32>, i32 -> vector<24x128xf32>
    %835 = vector.broadcast %563 : f32 to vector<24x128xf32>
    %836 = arith.mulf %835, %834 : vector<24x128xf32>
    %837 = arith.addf %829, %836 : vector<24x128xf32>
    %c1_i32_151 = arith.constant 1 : i32
    %838 = tpu.dynamic_rotate %831 by %c1_i32_151 dim 0 : vector<24x128xf32>, i32 -> vector<24x128xf32>
    %839 = vector.broadcast %564 : f32 to vector<24x128xf32>
    %840 = arith.mulf %839, %838 : vector<24x128xf32>
    %841 = arith.addf %837, %840 : vector<24x128xf32>
    %c1_i32_152 = arith.constant 1 : i32
    %842 = tpu.dynamic_rotate %833 by %c1_i32_152 dim 0 : vector<24x128xf32>, i32 -> vector<24x128xf32>
    %843 = vector.broadcast %565 : f32 to vector<24x128xf32>
    %844 = arith.mulf %843, %842 : vector<24x128xf32>
    %845 = arith.addf %841, %844 : vector<24x128xf32>
    %846 = vector.broadcast %566 : f32 to vector<24x128xf32>
    %847 = arith.mulf %846, %832 : vector<24x128xf32>
    %848 = arith.addf %845, %847 : vector<24x128xf32>
    %849 = vector.broadcast %567 : f32 to vector<24x128xf32>
    %850 = arith.mulf %849, %831 : vector<24x128xf32>
    %851 = arith.addf %848, %850 : vector<24x128xf32>
    %852 = vector.broadcast %568 : f32 to vector<24x128xf32>
    %853 = arith.mulf %852, %833 : vector<24x128xf32>
    %854 = arith.addf %851, %853 : vector<24x128xf32>
    %c23_i32_153 = arith.constant 23 : i32
    %855 = tpu.dynamic_rotate %832 by %c23_i32_153 dim 0 : vector<24x128xf32>, i32 -> vector<24x128xf32>
    %856 = vector.broadcast %569 : f32 to vector<24x128xf32>
    %857 = arith.mulf %856, %855 : vector<24x128xf32>
    %858 = arith.addf %854, %857 : vector<24x128xf32>
    %c23_i32_154 = arith.constant 23 : i32
    %859 = tpu.dynamic_rotate %831 by %c23_i32_154 dim 0 : vector<24x128xf32>, i32 -> vector<24x128xf32>
    %860 = vector.broadcast %570 : f32 to vector<24x128xf32>
    %861 = arith.mulf %860, %859 : vector<24x128xf32>
    %862 = arith.addf %858, %861 : vector<24x128xf32>
    %c23_i32_155 = arith.constant 23 : i32
    %863 = tpu.dynamic_rotate %833 by %c23_i32_155 dim 0 : vector<24x128xf32>, i32 -> vector<24x128xf32>
    %864 = vector.broadcast %571 : f32 to vector<24x128xf32>
    %865 = arith.mulf %864, %863 : vector<24x128xf32>
    %866 = arith.addf %862, %865 : vector<24x128xf32>
    %867 = arith.mulf %759, %20 : vector<24x128xf32>
    %c0_156 = arith.constant 0 : index
    %c0_157 = arith.constant 0 : index
    %c0_158 = arith.constant 0 : index
    %868 = vector.load %arg6[%c0_156, %c0_157, %c0_158] : memref<3x24x128xf32, #tpu.memory_space<vmem>>, vector<1x24x128xf32>
    %869 = vector.shape_cast %868 : vector<1x24x128xf32> to vector<24x128xf32>
    %870 = vector.shape_cast %867 : vector<24x128xf32> to vector<1x24x128xf32>
    tpu.vector_store %arg6[%c0_156, %c0_157, %c0_158], %870 {strides = array<i32>} : memref<3x24x128xf32, #tpu.memory_space<vmem>>, vector<1x24x128xf32>,
    %871 = arith.mulf %826, %20 : vector<24x128xf32>
    %c1_159 = arith.constant 1 : index
    %c0_160 = arith.constant 0 : index
    %c0_161 = arith.constant 0 : index
    %872 = vector.load %arg6[%c1_159, %c0_160, %c0_161] : memref<3x24x128xf32, #tpu.memory_space<vmem>>, vector<1x24x128xf32>
    %873 = vector.shape_cast %872 : vector<1x24x128xf32> to vector<24x128xf32>
    %874 = vector.shape_cast %871 : vector<24x128xf32> to vector<1x24x128xf32>
    tpu.vector_store %arg6[%c1_159, %c0_160, %c0_161], %874 {strides = array<i32>} : memref<3x24x128xf32, #tpu.memory_space<vmem>>, vector<1x24x128xf32>,
    %875 = arith.mulf %866, %20 : vector<24x128xf32>
    %c2_162 = arith.constant 2 : index
    %c0_163 = arith.constant 0 : index
    %c0_164 = arith.constant 0 : index
    %876 = vector.load %arg6[%c2_162, %c0_163, %c0_164] : memref<3x24x128xf32, #tpu.memory_space<vmem>>, vector<1x24x128xf32>
    %877 = vector.shape_cast %876 : vector<1x24x128xf32> to vector<24x128xf32>
    %878 = vector.shape_cast %875 : vector<24x128xf32> to vector<1x24x128xf32>
    tpu.vector_store %arg6[%c2_162, %c0_163, %c0_164], %878 {strides = array<i32>} : memref<3x24x128xf32, #tpu.memory_space<vmem>>, vector<1x24x128xf32>,
    %c54 = arith.constant 54 : index
    %879 = memref.load %arg1[%c54] : memref<81xf32, #tpu.memory_space<smem>>
    %c55 = arith.constant 55 : index
    %880 = memref.load %arg1[%c55] : memref<81xf32, #tpu.memory_space<smem>>
    %c56 = arith.constant 56 : index
    %881 = memref.load %arg1[%c56] : memref<81xf32, #tpu.memory_space<smem>>
    %c57 = arith.constant 57 : index
    %882 = memref.load %arg1[%c57] : memref<81xf32, #tpu.memory_space<smem>>
    %c58 = arith.constant 58 : index
    %883 = memref.load %arg1[%c58] : memref<81xf32, #tpu.memory_space<smem>>
    %c59 = arith.constant 59 : index
    %884 = memref.load %arg1[%c59] : memref<81xf32, #tpu.memory_space<smem>>
    %c60 = arith.constant 60 : index
    %885 = memref.load %arg1[%c60] : memref<81xf32, #tpu.memory_space<smem>>
    %c61 = arith.constant 61 : index
    %886 = memref.load %arg1[%c61] : memref<81xf32, #tpu.memory_space<smem>>
    %c62 = arith.constant 62 : index
    %887 = memref.load %arg1[%c62] : memref<81xf32, #tpu.memory_space<smem>>
    %c63 = arith.constant 63 : index
    %888 = memref.load %arg1[%c63] : memref<81xf32, #tpu.memory_space<smem>>
    %c64 = arith.constant 64 : index
    %889 = memref.load %arg1[%c64] : memref<81xf32, #tpu.memory_space<smem>>
    %c65 = arith.constant 65 : index
    %890 = memref.load %arg1[%c65] : memref<81xf32, #tpu.memory_space<smem>>
    %c66 = arith.constant 66 : index
    %891 = memref.load %arg1[%c66] : memref<81xf32, #tpu.memory_space<smem>>
    %c67 = arith.constant 67 : index
    %892 = memref.load %arg1[%c67] : memref<81xf32, #tpu.memory_space<smem>>
    %c68 = arith.constant 68 : index
    %893 = memref.load %arg1[%c68] : memref<81xf32, #tpu.memory_space<smem>>
    %c69 = arith.constant 69 : index
    %894 = memref.load %arg1[%c69] : memref<81xf32, #tpu.memory_space<smem>>
    %c70 = arith.constant 70 : index
    %895 = memref.load %arg1[%c70] : memref<81xf32, #tpu.memory_space<smem>>
    %c71 = arith.constant 71 : index
    %896 = memref.load %arg1[%c71] : memref<81xf32, #tpu.memory_space<smem>>
    %c72 = arith.constant 72 : index
    %897 = memref.load %arg1[%c72] : memref<81xf32, #tpu.memory_space<smem>>
    %c73 = arith.constant 73 : index
    %898 = memref.load %arg1[%c73] : memref<81xf32, #tpu.memory_space<smem>>
    %c74 = arith.constant 74 : index
    %899 = memref.load %arg1[%c74] : memref<81xf32, #tpu.memory_space<smem>>
    %c75 = arith.constant 75 : index
    %900 = memref.load %arg1[%c75] : memref<81xf32, #tpu.memory_space<smem>>
    %c76 = arith.constant 76 : index
    %901 = memref.load %arg1[%c76] : memref<81xf32, #tpu.memory_space<smem>>
    %c77 = arith.constant 77 : index
    %902 = memref.load %arg1[%c77] : memref<81xf32, #tpu.memory_space<smem>>
    %c78 = arith.constant 78 : index
    %903 = memref.load %arg1[%c78] : memref<81xf32, #tpu.memory_space<smem>>
    %c79 = arith.constant 79 : index
    %904 = memref.load %arg1[%c79] : memref<81xf32, #tpu.memory_space<smem>>
    %c80 = arith.constant 80 : index
    %905 = memref.load %arg1[%c80] : memref<81xf32, #tpu.memory_space<smem>>
    %c2_165 = arith.constant 2 : index
    %906 = memref.load %arg2[%c2_165] : memref<3xf32, #tpu.memory_space<smem>>
    %907 = vector.broadcast %906 : f32 to vector<24x128xf32>
    %c0_166 = arith.constant 0 : index
    %c0_167 = arith.constant 0 : index
    %c0_168 = arith.constant 0 : index
    %908 = vector.load %arg6[%c0_166, %c0_167, %c0_168] : memref<3x24x128xf32, #tpu.memory_space<vmem>>, vector<1x24x128xf32>
    %909 = vector.shape_cast %908 : vector<1x24x128xf32> to vector<24x128xf32>
    %c1_i32_169 = arith.constant 1 : i32
    %910 = tpu.dynamic_rotate %909 by %c1_i32_169 dim 1 : vector<24x128xf32>, i32 -> vector<24x128xf32>
    %c127_i32_170 = arith.constant 127 : i32
    %911 = tpu.dynamic_rotate %909 by %c127_i32_170 dim 1 : vector<24x128xf32>, i32 -> vector<24x128xf32>
    %c1_i32_171 = arith.constant 1 : i32
    %912 = tpu.dynamic_rotate %910 by %c1_i32_171 dim 0 : vector<24x128xf32>, i32 -> vector<24x128xf32>
    %913 = vector.broadcast %879 : f32 to vector<24x128xf32>
    %914 = arith.mulf %913, %912 : vector<24x128xf32>
    %915 = arith.addf %907, %914 : vector<24x128xf32>
    %c1_i32_172 = arith.constant 1 : i32
    %916 = tpu.dynamic_rotate %909 by %c1_i32_172 dim 0 : vector<24x128xf32>, i32 -> vector<24x128xf32>
    %917 = vector.broadcast %880 : f32 to vector<24x128xf32>
    %918 = arith.mulf %917, %916 : vector<24x128xf32>
    %919 = arith.addf %915, %918 : vector<24x128xf32>
    %c1_i32_173 = arith.constant 1 : i32
    %920 = tpu.dynamic_rotate %911 by %c1_i32_173 dim 0 : vector<24x128xf32>, i32 -> vector<24x128xf32>
    %921 = vector.broadcast %881 : f32 to vector<24x128xf32>
    %922 = arith.mulf %921, %920 : vector<24x128xf32>
    %923 = arith.addf %919, %922 : vector<24x128xf32>
    %924 = vector.broadcast %882 : f32 to vector<24x128xf32>
    %925 = arith.mulf %924, %910 : vector<24x128xf32>
    %926 = arith.addf %923, %925 : vector<24x128xf32>
    %927 = vector.broadcast %883 : f32 to vector<24x128xf32>
    %928 = arith.mulf %927, %909 : vector<24x128xf32>
    %929 = arith.addf %926, %928 : vector<24x128xf32>
    %930 = vector.broadcast %884 : f32 to vector<24x128xf32>
    %931 = arith.mulf %930, %911 : vector<24x128xf32>
    %932 = arith.addf %929, %931 : vector<24x128xf32>
    %c23_i32_174 = arith.constant 23 : i32
    %933 = tpu.dynamic_rotate %910 by %c23_i32_174 dim 0 : vector<24x128xf32>, i32 -> vector<24x128xf32>
    %934 = vector.broadcast %885 : f32 to vector<24x128xf32>
    %935 = arith.mulf %934, %933 : vector<24x128xf32>
    %936 = arith.addf %932, %935 : vector<24x128xf32>
    %c23_i32_175 = arith.constant 23 : i32
    %937 = tpu.dynamic_rotate %909 by %c23_i32_175 dim 0 : vector<24x128xf32>, i32 -> vector<24x128xf32>
    %938 = vector.broadcast %886 : f32 to vector<24x128xf32>
    %939 = arith.mulf %938, %937 : vector<24x128xf32>
    %940 = arith.addf %936, %939 : vector<24x128xf32>
    %c23_i32_176 = arith.constant 23 : i32
    %941 = tpu.dynamic_rotate %911 by %c23_i32_176 dim 0 : vector<24x128xf32>, i32 -> vector<24x128xf32>
    %942 = vector.broadcast %887 : f32 to vector<24x128xf32>
    %943 = arith.mulf %942, %941 : vector<24x128xf32>
    %944 = arith.addf %940, %943 : vector<24x128xf32>
    %c1_177 = arith.constant 1 : index
    %c0_178 = arith.constant 0 : index
    %c0_179 = arith.constant 0 : index
    %945 = vector.load %arg6[%c1_177, %c0_178, %c0_179] : memref<3x24x128xf32, #tpu.memory_space<vmem>>, vector<1x24x128xf32>
    %946 = vector.shape_cast %945 : vector<1x24x128xf32> to vector<24x128xf32>
    %c1_i32_180 = arith.constant 1 : i32
    %947 = tpu.dynamic_rotate %946 by %c1_i32_180 dim 1 : vector<24x128xf32>, i32 -> vector<24x128xf32>
    %c127_i32_181 = arith.constant 127 : i32
    %948 = tpu.dynamic_rotate %946 by %c127_i32_181 dim 1 : vector<24x128xf32>, i32 -> vector<24x128xf32>
    %c1_i32_182 = arith.constant 1 : i32
    %949 = tpu.dynamic_rotate %947 by %c1_i32_182 dim 0 : vector<24x128xf32>, i32 -> vector<24x128xf32>
    %950 = vector.broadcast %888 : f32 to vector<24x128xf32>
    %951 = arith.mulf %950, %949 : vector<24x128xf32>
    %952 = arith.addf %944, %951 : vector<24x128xf32>
    %c1_i32_183 = arith.constant 1 : i32
    %953 = tpu.dynamic_rotate %946 by %c1_i32_183 dim 0 : vector<24x128xf32>, i32 -> vector<24x128xf32>
    %954 = vector.broadcast %889 : f32 to vector<24x128xf32>
    %955 = arith.mulf %954, %953 : vector<24x128xf32>
    %956 = arith.addf %952, %955 : vector<24x128xf32>
    %c1_i32_184 = arith.constant 1 : i32
    %957 = tpu.dynamic_rotate %948 by %c1_i32_184 dim 0 : vector<24x128xf32>, i32 -> vector<24x128xf32>
    %958 = vector.broadcast %890 : f32 to vector<24x128xf32>
    %959 = arith.mulf %958, %957 : vector<24x128xf32>
    %960 = arith.addf %956, %959 : vector<24x128xf32>
    %961 = vector.broadcast %891 : f32 to vector<24x128xf32>
    %962 = arith.mulf %961, %947 : vector<24x128xf32>
    %963 = arith.addf %960, %962 : vector<24x128xf32>
    %964 = vector.broadcast %892 : f32 to vector<24x128xf32>
    %965 = arith.mulf %964, %946 : vector<24x128xf32>
    %966 = arith.addf %963, %965 : vector<24x128xf32>
    %967 = vector.broadcast %893 : f32 to vector<24x128xf32>
    %968 = arith.mulf %967, %948 : vector<24x128xf32>
    %969 = arith.addf %966, %968 : vector<24x128xf32>
    %c23_i32_185 = arith.constant 23 : i32
    %970 = tpu.dynamic_rotate %947 by %c23_i32_185 dim 0 : vector<24x128xf32>, i32 -> vector<24x128xf32>
    %971 = vector.broadcast %894 : f32 to vector<24x128xf32>
    %972 = arith.mulf %971, %970 : vector<24x128xf32>
    %973 = arith.addf %969, %972 : vector<24x128xf32>
    %c23_i32_186 = arith.constant 23 : i32
    %974 = tpu.dynamic_rotate %946 by %c23_i32_186 dim 0 : vector<24x128xf32>, i32 -> vector<24x128xf32>
    %975 = vector.broadcast %895 : f32 to vector<24x128xf32>
    %976 = arith.mulf %975, %974 : vector<24x128xf32>
    %977 = arith.addf %973, %976 : vector<24x128xf32>
    %c23_i32_187 = arith.constant 23 : i32
    %978 = tpu.dynamic_rotate %948 by %c23_i32_187 dim 0 : vector<24x128xf32>, i32 -> vector<24x128xf32>
    %979 = vector.broadcast %896 : f32 to vector<24x128xf32>
    %980 = arith.mulf %979, %978 : vector<24x128xf32>
    %981 = arith.addf %977, %980 : vector<24x128xf32>
    %c2_188 = arith.constant 2 : index
    %c0_189 = arith.constant 0 : index
    %c0_190 = arith.constant 0 : index
    %982 = vector.load %arg6[%c2_188, %c0_189, %c0_190] : memref<3x24x128xf32, #tpu.memory_space<vmem>>, vector<1x24x128xf32>
    %983 = vector.shape_cast %982 : vector<1x24x128xf32> to vector<24x128xf32>
    %c1_i32_191 = arith.constant 1 : i32
    %984 = tpu.dynamic_rotate %983 by %c1_i32_191 dim 1 : vector<24x128xf32>, i32 -> vector<24x128xf32>
    %c127_i32_192 = arith.constant 127 : i32
    %985 = tpu.dynamic_rotate %983 by %c127_i32_192 dim 1 : vector<24x128xf32>, i32 -> vector<24x128xf32>
    %c1_i32_193 = arith.constant 1 : i32
    %986 = tpu.dynamic_rotate %984 by %c1_i32_193 dim 0 : vector<24x128xf32>, i32 -> vector<24x128xf32>
    %987 = vector.broadcast %897 : f32 to vector<24x128xf32>
    %988 = arith.mulf %987, %986 : vector<24x128xf32>
    %989 = arith.addf %981, %988 : vector<24x128xf32>
    %c1_i32_194 = arith.constant 1 : i32
    %990 = tpu.dynamic_rotate %983 by %c1_i32_194 dim 0 : vector<24x128xf32>, i32 -> vector<24x128xf32>
    %991 = vector.broadcast %898 : f32 to vector<24x128xf32>
    %992 = arith.mulf %991, %990 : vector<24x128xf32>
    %993 = arith.addf %989, %992 : vector<24x128xf32>
    %c1_i32_195 = arith.constant 1 : i32
    %994 = tpu.dynamic_rotate %985 by %c1_i32_195 dim 0 : vector<24x128xf32>, i32 -> vector<24x128xf32>
    %995 = vector.broadcast %899 : f32 to vector<24x128xf32>
    %996 = arith.mulf %995, %994 : vector<24x128xf32>
    %997 = arith.addf %993, %996 : vector<24x128xf32>
    %998 = vector.broadcast %900 : f32 to vector<24x128xf32>
    %999 = arith.mulf %998, %984 : vector<24x128xf32>
    %1000 = arith.addf %997, %999 : vector<24x128xf32>
    %1001 = vector.broadcast %901 : f32 to vector<24x128xf32>
    %1002 = arith.mulf %1001, %983 : vector<24x128xf32>
    %1003 = arith.addf %1000, %1002 : vector<24x128xf32>
    %1004 = vector.broadcast %902 : f32 to vector<24x128xf32>
    %1005 = arith.mulf %1004, %985 : vector<24x128xf32>
    %1006 = arith.addf %1003, %1005 : vector<24x128xf32>
    %c23_i32_196 = arith.constant 23 : i32
    %1007 = tpu.dynamic_rotate %984 by %c23_i32_196 dim 0 : vector<24x128xf32>, i32 -> vector<24x128xf32>
    %1008 = vector.broadcast %903 : f32 to vector<24x128xf32>
    %1009 = arith.mulf %1008, %1007 : vector<24x128xf32>
    %1010 = arith.addf %1006, %1009 : vector<24x128xf32>
    %c23_i32_197 = arith.constant 23 : i32
    %1011 = tpu.dynamic_rotate %983 by %c23_i32_197 dim 0 : vector<24x128xf32>, i32 -> vector<24x128xf32>
    %1012 = vector.broadcast %904 : f32 to vector<24x128xf32>
    %1013 = arith.mulf %1012, %1011 : vector<24x128xf32>
    %1014 = arith.addf %1010, %1013 : vector<24x128xf32>
    %c23_i32_198 = arith.constant 23 : i32
    %1015 = tpu.dynamic_rotate %985 by %c23_i32_198 dim 0 : vector<24x128xf32>, i32 -> vector<24x128xf32>
    %1016 = vector.broadcast %905 : f32 to vector<24x128xf32>
    %1017 = arith.mulf %1016, %1015 : vector<24x128xf32>
    %1018 = arith.addf %1014, %1017 : vector<24x128xf32>
    %1019 = arith.negf %1018 : vector<24x128xf32>
    %1020 = math.exp %1019 : vector<24x128xf32>
    %cst = arith.constant 1.000000e+00 : f32
    %1021 = vector.broadcast %cst : f32 to vector<24x128xf32>
    %1022 = arith.addf %1021, %1020 : vector<24x128xf32>
    %1023 = arith.divf %1021, %1022 : vector<24x128xf32>
    %c0_199 = arith.constant 0 : index
    %c0_200 = arith.constant 0 : index
    %c0_201 = arith.constant 0 : index
    %1024 = vector.load %arg4[%c0_199, %c0_200, %c0_201] : memref<1x24x128xf32, #tpu.memory_space<vmem>>, vector<1x24x128xf32>
    %1025 = vector.shape_cast %1024 : vector<1x24x128xf32> to vector<24x128xf32>
    %1026 = vector.shape_cast %1023 : vector<24x128xf32> to vector<1x24x128xf32>
    tpu.vector_store %arg4[%c0_199, %c0_200, %c0_201], %1026 {strides = array<i32>} : memref<1x24x128xf32, #tpu.memory_space<vmem>>, vector<1x24x128xf32>,
    return
  }
  func.func @transform_0(%arg0: i32) -> i32 {
    %c0_i32 = arith.constant 0 : i32
    %c0_i32_0 = arith.constant 0 : i32
    return %c0_i32 : i32
  }
  func.func @transform_1(%arg0: i32) -> i32 {
    %c0_i32 = arith.constant 0 : i32
    %c0_i32_0 = arith.constant 0 : i32
    return %c0_i32 : i32
  }
  func.func @transform_2(%arg0: i32) -> (i32, i32, i32, i32) {
    %c0_i32 = arith.constant 0 : i32
    %c0_i32_0 = arith.constant 0 : i32
    %c0_i32_1 = arith.constant 0 : i32
    %c0_i32_2 = arith.constant 0 : i32
    return %arg0, %c0_i32, %c0_i32_0, %c0_i32_1 : i32, i32, i32, i32
  }
  func.func @transform_3(%arg0: i32) -> (i32, i32, i32) {
    %c0_i32 = arith.constant 0 : i32
    %c0_i32_0 = arith.constant 0 : i32
    %c0_i32_1 = arith.constant 0 : i32
    return %arg0, %c0_i32, %c0_i32_0 : i32, i32, i32
  }
}

</mosaic_0001>

<bundles_post_ra>
// kernel: tpu_custom_call.1
= control target key start
LH: loop header
LB: loop body
LE: loop exit
PB: predicated region body
PF: predicated region fallthrough
CT: control target
= control target key end

     0   :  { %8 = vsyncpa [#allocation7], 0  ;;  %s6732_s0 = inlined_call_operand.hbm [shape: f32[81], index: 0, kind: input, shape index: {}]   ;;  %s6733_s1 = inlined_call_operand.vmem [shape: f32[3], index: 1, kind: input, shape index: {}]   ;;  %s6734_s2 = inlined_call_operand.hbm [shape: f32[1,7,24,128], index: 2, kind: input, shape index: {}]   ;;  %s6735_s3 = inlined_call_operand.hbm [shape: f32[1,24,128], index: 3, kind: output, shape index: {}]  }
   0x1   :  { %9 = vsyncpa [#allocation8], 0 }
   0x2   :  { %10 = vsyncpa [#allocation5], 0 }
   0x3   :  { %11 = vsyncpa [#allocation6], 0  ;;  %s26_s14 = sshll.u32 %s6733_s1, 4  ;;  %s2759_s15 = smov [#allocation4]   ;;  %s27_s14 = int_to_ptr.vmem [resolvable:$true] %s26_s14 }
   0x4   :  { %19 = dma.hbm_to_smem %s6732_s0, 16, %s2759_s15, [#allocation7]  }
   0x5   :  { %s2699_s18 = scalar_lea.vmem %s27_s14, 16  ;;  %p2704_p1 = scmp.lt.s32.totalorder %s27_s14, %s27_s14 }
   0x6   :  { %p2700_p0 = scmp.ne.s32.totalorder %s27_s14, %s2699_s18  ;;  %p2705_p2 = scmp.lt.s32.totalorder %s2699_s18, %s2699_s18 }
   0x8   :  { %p2706_p3 = por %p2705_p2, %p2704_p1 }
   0xa   :  { %p2707_p4 = pnand %p2706_p3, %p2700_p0 }
   0xc   :  { %2710 = shalt.err (!%p2707_p4)
}
   0xd   :  { %s2760_s19 = smov [#allocation9]   ;;  %s2761_s20 = smov [#allocation10]  }
   0xe   :  { %29 = dma.vmem_to_smem %s27_s14, 16, %s2760_s19, [#allocation8]  }
   0xf   :  { %s35_s21 = sshll.u32 %s2761_s20, 4  ;;  %s36_s21 = int_to_ptr.vmem [resolvable:$true] %s35_s21 }
  0x10   :  { %s2719_s22 = scalar_lea.vmem %s36_s21, 2688  ;;  %p2724_p6 = scmp.lt.s32.totalorder %s36_s21, %s36_s21 }
  0x11   :  { %p2720_p5 = scmp.ne.s32.totalorder %s36_s21, %s2719_s22  ;;  %p2725_p7 = scmp.lt.s32.totalorder %s2719_s22, %s2719_s22 }
  0x13   :  { %p2726_p8 = por %p2725_p7, %p2724_p6 }
  0x15   :  { %p2727_p9 = pnand %p2726_p8, %p2720_p5 }
  0x17   :  { %2730 = shalt.err (!%p2727_p9)
}
  0x18   :  { %s2762_s0 = smov 128   ;;  %s2763_s1 = smov 8  }
  0x19   :  { %41 = dma.hbm_to_vmem [thread:$0]  %s6734_s2, 2688, %s36_s21, [#allocation5], %s2762_s0, %s2762_s0, %s2763_s1  }
  0x1a   :  { %2751 = dma.done.wait [#allocation7], 16  }
  0x1b   :  { %2752 = vsyncadd [#allocation7], 4294967280 }
  0x1c   :  { %2753 = dma.done.wait [#allocation8], 16  }
  0x1d   :  { %2754 = vsyncadd [#allocation8], 4294967280 }
  0x1e   :  { %2755 = dma.done.wait [#allocation5], 2688  }
  0x1f   :  { %2756 = vsyncadd [#allocation5], 4294964608 }
  0x20   :  { %51 = sfence }
  0x21   :  { %v2800_v0 = vld [vmem:[#allocation10 + $0x10] sm:$0xff]  ;;  %v2802_v1 = vld [vmem:[#allocation10] sm:$0xff]  ;;  %v6736_v2 = vlaneseq  ;;  %s2764_s25 = smov 1   ;;  %v2813_v6 = vld [vmem:[#allocation10 + $0x8] sm:$0xff]  ;;  %s2765_s2 = smov 127  }
  0x22   :  { %119 = vrot.lane.b32.xlu1 %v2800_v0, %s2764_s25  ;;  %v204_v3 = vrot.slane %v2800_v0, 1  ;;  %115 = vrot.lane.b32.xlu0 %v2802_v1, %s2764_s25  ;;  %v202_v4 = vrot.slane %v2802_v1, 1  ;;  %v2815_v7 = vld [vmem:[#allocation10 + $0x18] sm:$0xff]  ;;  %v2819_v9 = vld [vmem:[#allocation10 + $0x28] sm:$0xff]  ;;  %v2838_v13 = vld [vmem:[#allocation10 + $0x20] sm:$0xff]  ;;  %v143_v14 = vrot.slane %v2800_v0, 7 }
  0x23   :  { %v2811_v5 = vshrl.u32 %v6736_v2, 7  ;;  %v359_v8 = vrot.slane %v2815_v7, 1  ;;  %v361_v11 = vrot.slane %v2819_v9, 1  ;;  %v141_v15 = vrot.slane %v2802_v1, 7  ;;  %v2880_v26 = vld [vmem:[#allocation10 + $0x38] sm:$0xff]  ;;  %v2882_v27 = vld [vmem:[#allocation10 + $0x30] sm:$0xff] }
  0x24   :  { %v142_v16 = vrot.slane %v2813_v6, 7  ;;  %v203_v17 = vrot.slane %v2813_v6, 1  ;;  %v263_v18 = vrot.slane %v2815_v7, 7  ;;  %v265_v19 = vrot.slane %v2819_v9, 7  ;;  %v2900_v31 = vld [vmem:[#allocation10 + $0x40] sm:$0xff]  ;;  %v2911_v33 = vld [vmem:[#allocation10 + $0x50] sm:$0xff] }
  0x25   :  { %vm191_vm0 = vcmp.lt.s32.totalorder %v2811_v5, 7  ;;  %vm130_vm1 = vcmp.lt.s32.totalorder %v2811_v5, 1  ;;  %v264_v21 = vrot.slane %v2838_v13, 7  ;;  %v360_v32 = vrot.slane %v2838_v13, 1  ;;  %v2913_v34 = vld [vmem:[#allocation10 + $0x48] sm:$0xff]  ;;  %v2927_v37 = vld [vmem:[#allocation10 + $0x58] sm:$0xff] }
  0x26   :  { %v2823_v10 = vsel %vm191_vm0, %v204_v3, %v202_v4  ;;  %121 = vrot.lane.b32.xlu1 %v2802_v1, %s2765_s2  ;;  %117 = vrot.lane.b32.xlu0 %v2813_v6, %s2764_s25  ;;  %v2832_v12 = vsel %vm191_vm0, %v361_v11, %v359_v8  ;;  %v2857_v20 = vsel %vm130_vm1, %v143_v14, %v141_v15  ;;  %v439_v38 = vrot.slane %v2880_v26, 7  ;;  %v2940_v41 = vld [vmem:[#allocation10 + $0x68] sm:$0xff]  ;;  %v2942_v42 = vld [vmem:[#allocation10 + $0x60] sm:$0xff]  ;;  %v2960_v46 = vld [vmem:[#allocation10 + $0x70] sm:$0xff]  ;;  %s2582_s26 = sld [smem:[#allocation4 + $0x4]] }
  0x27   :  { %v2862_v22 = vsel %vm130_vm1, %v142_v16, %v143_v14  ;;  %v2866_v23 = vsel %vm130_vm1, %v141_v15, %v142_v16  ;;  %v2870_v24 = vsel %vm191_vm0, %v203_v17, %v204_v3  ;;  %v2874_v25 = vsel %vm191_vm0, %v202_v4, %v203_v17  ;;  %6849 = vst [vmem:[#allocation16_spill] sm:$0xff] %v2913_v34  ;;  %v2970_v47 = vld [vmem:[#allocation10 + $0x80] sm:$0xff]  ;;  %v2972_v48 = vld [vmem:[#allocation10 + $0x78] sm:$0xff]  ;;  %v2978_v49 = vld [vmem:[#allocation10 + $0x88] sm:$0xff]  ;;  %s2585_s27 = sld [smem:[#allocation4 + $0x7]] }
  0x28   :  { %v2886_v28 = vsel %vm130_vm1, %v265_v19, %v263_v18  ;;  %v2890_v29 = vsel %vm130_vm1, %v264_v21, %v265_v19  ;;  %v2894_v30 = vsel %vm130_vm1, %v263_v18, %v264_v21  ;;  %v2917_v35 = vsel %vm191_vm0, %v360_v32, %v361_v11  ;;  %6850 = vst [vmem:[#allocation17_spill] sm:$0xff] %v2927_v37  ;;  %v2999_v55 = vld [vmem:[#allocation10 + $0x98] sm:$0xff]  ;;  %v3001_v56 = vld [vmem:[#allocation10 + $0x90] sm:$0xff]  ;;  %v3007_v57 = vld [vmem:[#allocation10 + $0xa0] sm:$0xff]  ;;  %s2591_s28 = sld [smem:[#allocation4 + $0xd]] }
  0x29   :  { %v2921_v36 = vsel %vm191_vm0, %v359_v8, %v360_v32  ;;  %v438_v39 = vrot.slane %v2882_v27, 7  ;;  %v440_v40 = vrot.slane %v2900_v31, 7  ;;  %6851 = vst [vmem:[#allocation18_spill] sm:$0xff] %v2940_v41  ;;  %6852 = vst [vmem:[#allocation19_spill] sm:$0xff] %v2942_v42  ;;  %v570_v50 = vrot.slane %v2882_v27, 1  ;;  %s2594_s29 = sld [smem:[#allocation4 + $0x10]] }
  0x2a   :  { %125 = vrot.lane.b32.xlu1 %v2800_v0, %s2765_s2  ;;  %123 = vrot.lane.b32.xlu0 %v2813_v6, %s2765_s2  ;;  %6853 = vst [vmem:[#allocation20_spill] sm:$0xff] %v2960_v46  ;;  %6854 = vst [vmem:[#allocation21_spill] sm:$0xff] %v2970_v47  ;;  %v571_v51 = vrot.slane %v2880_v26, 1  ;;  %v572_v52 = vrot.slane %v2900_v31, 1  ;;  %s3013_s30 = sld [smem:[#allocation4 + $0x16]]  ;;  %vm58_vm6 = vcmp.ge.s32.totalorder %v2811_v5, 1 }
  0x2b   :  { %v2946_v43 = vsel %vm130_vm1, %v440_v40, %v438_v39  ;;  %v2950_v44 = vsel %vm130_vm1, %v439_v38, %v440_v40  ;;  %v2954_v45 = vsel %vm130_vm1, %v438_v39, %v439_v38  ;;  %6855 = vst [vmem:[#allocation22_spill] sm:$0xff] %v2972_v48  ;;  %6856 = vst [vmem:[#allocation23_spill] sm:$0xff] %v2978_v49  ;;  %s3019_s4 = sld [smem:[#allocation4 + $0x19]] }
  0x2c   :  { %v2989_v53 = vsel %vm191_vm0, %v571_v51, %v572_v52  ;;  %v2993_v54 = vsel %vm191_vm0, %v570_v50, %v571_v51  ;;  %6858 = vst [vmem:[#allocation25_spill] sm:$0xff] %v2999_v55  ;;  %6859 = vst [vmem:[#allocation26_spill] sm:$0xff] %v3001_v56  ;;  %v3017_v58 = vsel %vm191_vm0, %v572_v52, %v570_v50  ;;  %s3021_s5 = sld [smem:[#allocation4 + $0x3]]  ;;  %v3035_v59 = vstv %s2582_s26 }
  0x2d   :  { %6857 = vst [vmem:[#allocation24_spill] sm:$0xff] %v2993_v54  ;;  %6860 = vst [vmem:[#allocation27_spill] sm:$0xff] %v3007_v57  ;;  %s3027_s6 = sld [smem:[#allocation4]]  ;;  %v3039_v60 = vstv %s2585_s27  ;;  %v3047_v61 = vmul.f32 %v3035_v59, %v2800_v0  ;;  %v3057_v3 = vmul.f32 %v3035_v59, %v2802_v1  ;;  %v3065_v8 = vmul.f32 %v2815_v7, %v3035_v59 }
  0x2e   :  { %234 = vrot.lane.b32.xlu1 %v2838_v13, %s2764_s25  ;;  %232 = vrot.lane.b32.xlu0 %v2815_v7, %s2764_s25  ;;  %6861 = vst [vmem:[#allocation28_spill] sm:$0xff] %v3017_v58  ;;  %s3029_s7 = sld [smem:[#allocation4 + $0x6]]  ;;  %6862 = vst [vmem:[#allocation29_spill] sm:$0xff] %v3035_v59  ;;  %v3049_v62 = vstv %s2591_s28  ;;  %v3061_v4 = vmul.f32 %v3039_v60, %v2823_v10  ;;  %v3069_v0 = vmul.f32 %v2819_v9, %v3035_v59 }
  0x2f   :  { %s3031_s8 = sld [smem:[#allocation9]]  ;;  %6863 = vst [vmem:[#allocation30_spill] sm:$0xff] %v3039_v60  ;;  %6864 = vst [vmem:[#allocation31_spill] sm:$0xff] %v3049_v62  ;;  %v3051_v63 = vstv %s2594_s29  ;;  %v3075_v11 = vmul.f32 %v2832_v12, %v3039_v60  ;;  %v3084_v15 = vmul.f32 %v3049_v62, %v2815_v7  ;;  %v3088_v16 = vmul.f32 %v3049_v62, %v2819_v9 }
  0x30   :  { %s3033_s9 = sld [smem:[#allocation4 + $0x5]]  ;;  %6865 = vst [vmem:[#allocation32_spill] sm:$0xff] %v3051_v63  ;;  %v3092_v17 = vmul.f32 %v3051_v63, %v2832_v12  ;;  %v3110_v40 = vstv %s3013_s30  ;;  %v3114_v50 = vmul.f32 %v2972_v48, %v3049_v62  ;;  %v6738_v51 = vrot.slane %v3001_v56, 1 }
  0x31   :  { %s3037_s10 = sld [smem:[#allocation4 + $0x1]]  ;;  %6866 = vst [vmem:[#allocation33_spill] sm:$0xff] %v3075_v11  ;;  %6868 = vst [vmem:[#allocation35_spill] sm:$0xff] %v3110_v40  ;;  %v6737_v52 = vrot.slane %v3007_v57, 1  ;;  %v3122_v38 = vmul.f32 %v2972_v48, %v3110_v40  ;;  %v3128_v12 = vmul.f32 %v2978_v49, %v3110_v40  ;;  %v3134_v32 = vmul.f32 %v2978_v49, %v3049_v62 }
  0x32   :  { %238 = vrot.lane.b32.xlu1 %v2815_v7, %s2765_s2  ;;  %236 = vrot.lane.b32.xlu0 %v2819_v9, %s2764_s25  ;;  %s3041_s11 = sld [smem:[#allocation4 + $0x2]]  ;;  %6867 = vst [vmem:[#allocation34_spill] sm:$0xff] %v3092_v17  ;;  %6869 = vst [vmem:[#allocation36_spill] sm:$0xff] %v3114_v50  ;;  %v3149_v7 = vmul.f32 %v3001_v56, %v3110_v40  ;;  %v3152_v19 = vstv %s3019_s4  ;;  %v3185_v14 = vmul.f32 %v3035_v59, %v2813_v6 }
  0x33   :  { %s3043_s12 = sld [smem:[#allocation4 + $0x8]]  ;;  %6870 = vst [vmem:[#allocation37_spill] sm:$0xff] %v3122_v38  ;;  %6871 = vst [vmem:[#allocation38_spill] sm:$0xff] %v3128_v12  ;;  %v3170_v21 = vstv %s3027_s6 }
  0x34   :  { %s3053_s13 = sld [smem:[#allocation4 + $0xc]]  ;;  %6872 = vst [vmem:[#allocation39_spill] sm:$0xff] %v3134_v32  ;;  %6873 = vst [vmem:[#allocation40_spill] sm:$0xff] %v3149_v7  ;;  %v3178_v1 = vstv %s3029_s7 }
  0x35   :  { %s3071_s14 = sld [smem:[#allocation4 + $0x9]]  ;;  %6874 = vst [vmem:[#allocation41_spill] sm:$0xff] %v3152_v19  ;;  %v3167_v2 = vstv %s3031_s8  ;;  %6879 = vst [vmem:[#allocation46_spill] sm:$0xff] %v3170_v21 }
  0x36   :  { %242 = vrot.lane.b32.xlu1 %v2819_v9, %s2765_s2  ;;  %240 = vrot.lane.b32.xlu0 %v2838_v13, %s2765_s2  ;;  %s3080_s15 = sld [smem:[#allocation4 + $0xf]]  ;;  %v1295_v9 = vsel %vm191_vm0, %v6737_v52, %v6738_v51  ;;  %v3161_v52 = vmul.f32 %v3007_v57, %v3110_v40  ;;  %v3164_v51 = vstv %s3021_s5  ;;  %6878 = vst [vmem:[#allocation45_spill] sm:$0xff] %v3167_v2  ;;  %v3181_v18 = vstv %s3033_s9 }
  0x37   :  { %s3095_s16 = sld [smem:[#allocation4 + $0xe]]  ;;  %v3155_v39 = vstv %s3037_s10  ;;  %6877 = vst [vmem:[#allocation44_spill] sm:$0xff] %v3164_v51  ;;  %v3175_v10 = vmul.f32 %v1295_v9, %v3152_v19 }
  0x38   :  { %s3101_s17 = sld [smem:[#allocation4 + $0xa]]  ;;  %6875 = vst [vmem:[#allocation42_spill] sm:$0xff] %v3155_v39  ;;  %6876 = vst [vmem:[#allocation43_spill] sm:$0xff] %v3161_v52  ;;  %v3191_v52 = vmul.f32 %v3155_v39, %v2857_v20  ;;  %v3198_v9 = vmul.f32 %v3155_v39, %v2866_v23  ;;  %v3208_v7 = vmul.f32 %v3155_v39, %v2862_v22 }
  0x39   :  { %s3107_s18 = sld [smem:[#allocation4 + $0xb]]  ;;  %6880 = vst [vmem:[#allocation47_spill] sm:$0xff] %v3175_v10  ;;  %v3204_v6 = vstv %s3043_s12  ;;  %v3212_v20 = vmul.f32 %v3039_v60, %v2874_v25  ;;  %v3228_v32 = vmul.f32 %v2886_v28, %v3155_v39  ;;  %v3232_v22 = vmul.f32 %v2894_v30, %v3155_v39 }
  0x3a   :  { %403 = vrot.lane.b32.xlu1 %v2880_v26, %s2764_s25  ;;  %401 = vrot.lane.b32.xlu0 %v2882_v27, %s2764_s25  ;;  %s3118_s19 = sld [smem:[#allocation4 + $0x11]]  ;;  %6883 = vst [vmem:[#allocation50_spill] sm:$0xff] %v3204_v6  ;;  %v3221_v23 = vstv %s3053_s13  ;;  %v3248_v50 = vmul.f32 %v2890_v29, %v3155_v39 }
  0x3b   :  { %s3130_s20 = sld [smem:[#allocation4 + $0x15]]  ;;  %6884 = vst [vmem:[#allocation51_spill] sm:$0xff] %v3221_v23 }
  0x3c   :  { %s3144_s21 = sld [smem:[#allocation4 + $0x12]] }
  0x3d   :  { %s3157_s22 = sld [smem:[#allocation4 + $0x18]]  ;;  %v3240_v25 = vstv %s3095_s16 }
  0x3e   :  { %407 = vrot.lane.b32.xlu1 %v2882_v27, %s2765_s2  ;;  %405 = vrot.lane.b32.xlu0 %v2900_v31, %s2764_s25  ;;  %s3172_s23 = sld [smem:[#allocation4 + $0x13]]  ;;  %v3201_v10 = vstv %s3101_s17 }
  0x3f   :  { %s3187_s24 = sld [smem:[#allocation4 + $0x17]]  ;;  %6882 = vst [vmem:[#allocation49_spill] sm:$0xff] %v3201_v10  ;;  %v3244_v12 = vmul.f32 %v3201_v10, %v2886_v28  ;;  %v3251_v38 = vstv %s3107_s18  ;;  %v3266_v28 = vmul.f32 %v3049_v62, %v2838_v13 }
  0x40   :  { %s3218_s26 = sld [smem:[#allocation4 + $0x14]] }
  0x41   :  { %s3234_s27 = sld [smem:[#allocation4 + $0x1a]]  ;;  %v3289_v11 = vstv %s3130_s20 }
  0x42   :  { %411 = vrot.lane.b32.xlu1 %v2900_v31, %s2765_s2  ;;  %409 = vrot.lane.b32.xlu0 %v2880_v26, %s2765_s2  ;;  %6890 = vst [vmem:[#allocation57_spill] sm:$0xff] %v3289_v11  ;;  %v3295_v17 = vstv %s3144_s21  ;;  %v3317_v11 = vmul.f32 %v2954_v45, %v3155_v39  ;;  %s5085_s28 = sld [smem:[#allocation4 + $0x1f]] }
  0x43   :  { %6892 = vst [vmem:[#allocation59_spill] sm:$0xff] %v3295_v17  ;;  %v6940_v17 = vrot.slane %v2913_v34, 1  ;;  %s5087_s29 = sld [smem:[#allocation4 + $0x1c]] }
  0x44   :  { %6898 = vst [vmem:[#allocation65_spill] sm:$0xff] %v3317_v11  ;;  %s5101_s30 = sld [smem:[#allocation4 + $0x22]] }
  0x45   :  { %s5103_s4 = sld [smem:[#allocation4 + $0x28]] }
  0x46   :  { %626 = vrot.lane.b32.xlu1 %v2911_v33, %s2764_s25  ;;  %624 = vrot.lane.b32.xlu0 %v2913_v34, %s2764_s25  ;;  %v3340_v11 = vstv %s3218_s26  ;;  %s5105_s5 = sld [smem:[#allocation4 + $0x25]] }
  0x47   :  { %6904 = vst [vmem:[#allocation71_spill] sm:$0xff] %v3340_v11  ;;  %s5111_s6 = sld [smem:[#allocation4 + $0x2b]] }
  0x48   :  { %s2608_s7 = sld [smem:[#allocation4 + $0x1e]] }
  0x49   :  { %s5127_s8 = sld [smem:[#allocation4 + $0x2e]] }
  0x4a   :  { %630 = vrot.lane.b32.xlu1 %v2913_v34, %s2765_s2  ;;  %628 = vrot.lane.b32.xlu0 %v2927_v37, %s2764_s25  ;;  %s2605_s9 = sld [smem:[#allocation4 + $0x1b]] }
  0x4b   :  { %s2611_s10 = sld [smem:[#allocation4 + $0x21]] }
  0x4c   :  { %s2610_s12 = sld [smem:[#allocation4 + $0x20]] }
  0x4d   :  { %s2607_s13 = sld [smem:[#allocation4 + $0x1d]] }
  0x4e   :  { %634 = vrot.lane.b32.xlu1 %v2927_v37, %s2765_s2  ;;  %632 = vrot.lane.b32.xlu0 %v2911_v33, %s2765_s2  ;;  %s2614_s16 = sld [smem:[#allocation4 + $0x24]] }
  0x4f   :  { %s2620_s17 = sld [smem:[#allocation4 + $0x2a]] }
  0x50   :  { %s5156_s18 = sld [smem:[#allocation4 + $0x29]] }
  0x51   :  { %s5163_s20 = sld [smem:[#allocation4 + $0x2c]] }
  0x52   :  { %840 = vrot.lane.b32.xlu1 %v2940_v41, %s2764_s25  ;;  %838 = vrot.lane.b32.xlu0 %v2942_v42, %s2764_s25  ;;  %s5168_s21 = sld [smem:[#allocation4 + $0x30]] }
  0x53   :  { %s5224_s26 = sld [smem:[#allocation4 + $0x31]] }
  0x56   :  { %844 = vrot.lane.b32.xlu1 %v2942_v42, %s2765_s2  ;;  %842 = vrot.lane.b32.xlu0 %v2960_v46, %s2764_s25  ;;  %v3286_v42 = vmul.f32 %v2917_v35, %v3039_v60 }
  0x58   :  { %6889 = vst [vmem:[#allocation56_spill] sm:$0xff] %v3286_v42 }
  0x5a   :  { %848 = vrot.lane.b32.xlu1 %v2960_v46, %s2765_s2  ;;  %846 = vrot.lane.b32.xlu0 %v2940_v41, %s2765_s2  ;;  %v3270_v41 = vmul.f32 %v2838_v13, %v3035_v59  ;;  %v3274_v46 = vmul.f32 %v3051_v63, %v2921_v36  ;;  %v3292_v13 = vstv %s3172_s23  ;;  %s5191_s23 = sld [smem:[#allocation4 + $0x33]] }
  0x5b   :  { %6891 = vst [vmem:[#allocation58_spill] sm:$0xff] %v3292_v13 }
  0x5c   :  { %6887 = vst [vmem:[#allocation54_spill] sm:$0xff] %v3274_v46  ;;  %v3301_v46 = vstv %s3187_s24  ;;  %s5207_s24 = sld [smem:[#allocation4 + $0x32]] }
  0x5d   :  { %6894 = vst [vmem:[#allocation61_spill] sm:$0xff] %v3301_v46  ;;  %v3325_v46 = vmul.f32 %v3292_v13, %v2946_v43 }
  0x5e   :  { %1054 = vrot.lane.b32.xlu1 %v2970_v47, %s2764_s25  ;;  %1052 = vrot.lane.b32.xlu0 %v2972_v48, %s2764_s25 }
  0x5f   :  { %6900 = vst [vmem:[#allocation67_spill] sm:$0xff] %v3325_v46  ;;  %v3351_v46 = vmul.f32 %v3292_v13, %v2954_v45 }
  0x61   :  { %6907 = vst [vmem:[#allocation74_spill] sm:$0xff] %v3351_v46 }
  0x62   :  { %1058 = vrot.lane.b32.xlu1 %v2972_v48, %s2765_s2  ;;  %1056 = vrot.lane.b32.xlu0 %v2978_v49, %s2764_s25  ;;  %v3262_v48 = vmul.f32 %v3201_v10, %v2890_v29  ;;  %v3282_v29 = vmul.f32 %v2921_v36, %v3039_v60  ;;  %v3305_v36 = vmul.f32 %v2946_v43, %v3155_v39 }
  0x64   :  { %6895 = vst [vmem:[#allocation62_spill] sm:$0xff] %v3305_v36  ;;  %v3329_v36 = vmul.f32 %v2882_v27, %v3035_v59 }
  0x66   :  { %1062 = vrot.lane.b32.xlu1 %v2978_v49, %s2765_s2  ;;  %1060 = vrot.lane.b32.xlu0 %v2970_v47, %s2765_s2  ;;  %v3254_v47 = vstv %s3118_s19  ;;  %v3258_v49 = vmul.f32 %v3201_v10, %v2894_v30  ;;  %v3278_v30 = vmul.f32 %v3051_v63, %v2917_v35  ;;  %v3313_v35 = vmul.f32 %v3110_v40, %v2882_v27  ;;  %s5158_s19 = sld [smem:[#allocation4 + $0x26]] }
  0x67   :  { %6886 = vst [vmem:[#allocation53_spill] sm:$0xff] %v3254_v47  ;;  %v3298_v47 = vstv %s3157_s22  ;;  %6901 = vst [vmem:[#allocation68_spill] sm:$0xff] %v3329_v36  ;;  %v3355_v36 = vmul.f32 %v3292_v13, %v2950_v44  ;;  %s5179_s22 = sld [smem:[#allocation4 + $0x2d]] }
  0x68   :  { %6888 = vst [vmem:[#allocation55_spill] sm:$0xff] %v3278_v30  ;;  %6893 = vst [vmem:[#allocation60_spill] sm:$0xff] %v3298_v47  ;;  %v3309_v30 = vmul.f32 %v2946_v43, %v3201_v10  ;;  %v3321_v47 = vmul.f32 %v2950_v44, %v3155_v39  ;;  %v3347_v43 = vstv %s3234_s27  ;;  %s5249_s27 = sld [smem:[#allocation4 + $0x2f]] }
  0x69   :  { %6897 = vst [vmem:[#allocation64_spill] sm:$0xff] %v3313_v35  ;;  %v3337_v35 = vmul.f32 %v2950_v44, %v3201_v10  ;;  %6906 = vst [vmem:[#allocation73_spill] sm:$0xff] %v3347_v43  ;;  %v3375_v44 = vmul.f32 %v2900_v31, %v3049_v62  ;;  %v3379_v43 = vmul.f32 %v2900_v31, %v3035_v59 }
  0x6a   :  { %1214 = vrot.lane.b32.xlu1 %v2999_v55, %s2764_s25  ;;  %1212 = vrot.lane.b32.xlu0 %v3001_v56, %s2764_s25  ;;  %6896 = vst [vmem:[#allocation63_spill] sm:$0xff] %v3309_v30  ;;  %6899 = vst [vmem:[#allocation66_spill] sm:$0xff] %v3321_v47  ;;  %v3333_v30 = vmul.f32 %v2954_v45, %v3201_v10  ;;  %v3344_v47 = vmul.f32 %v2882_v27, %v3049_v62 }
  0x6b   :  { %6903 = vst [vmem:[#allocation70_spill] sm:$0xff] %v3337_v35  ;;  %6908 = vst [vmem:[#allocation75_spill] sm:$0xff] %v3355_v36  ;;  %v3363_v35 = vmul.f32 %v3110_v40, %v2900_v31  ;;  %v3367_v27 = vmul.f32 %v2880_v26, %v3035_v59  ;;  %v3371_v45 = vmul.f32 %v2880_v26, %v3049_v62  ;;  %v6920_v31 = vrot.slane %v2911_v33, 7 }
  0x6c   :  { %6902 = vst [vmem:[#allocation69_spill] sm:$0xff] %v3333_v30  ;;  %6905 = vst [vmem:[#allocation72_spill] sm:$0xff] %v3344_v47  ;;  %v3359_v30 = vmul.f32 %v3110_v40, %v2880_v26  ;;  %v3393_v26 = vmul.f32 %v2993_v54, %v3051_v63 }
  0x6d   :  { %6910 = vst [vmem:[#allocation77_spill] sm:$0xff] %v3363_v35  ;;  %6911 = vst [vmem:[#allocation78_spill] sm:$0xff] %v3367_v27  ;;  %v6916_v35 = vrot.slane %v2927_v37, 7  ;;  %v3389_v27 = vmul.f32 %v3152_v19, %v2989_v53 }
  0x6e   :  { %1218 = vrot.lane.b32.xlu1 %v3001_v56, %s2765_s2  ;;  %1216 = vrot.lane.b32.xlu0 %v3007_v57, %s2764_s25  ;;  %v3224_v56 = vstv %s3071_s14  ;;  %6909 = vst [vmem:[#allocation76_spill] sm:$0xff] %v3359_v30  ;;  %6912 = vst [vmem:[#allocation79_spill] sm:$0xff] %v3371_v45  ;;  %v6915_v30 = vrot.slane %v2913_v34, 7  ;;  %s2613_s14 = sld [smem:[#allocation4 + $0x23]] }
  0x6f   :  { %6885 = vst [vmem:[#allocation52_spill] sm:$0xff] %v3224_v56  ;;  %6913 = vst [vmem:[#allocation80_spill] sm:$0xff] %v3375_v44  ;;  %v3397_v44 = vmul.f32 %v2989_v53, %v3051_v63 }
  0x70   :  { %6914 = vst [vmem:[#allocation81_spill] sm:$0xff] %v3379_v43  ;;  %v665_v47 = vsel %vm130_vm1, %v6916_v35, %v6915_v30  ;;  %6917 = vst [vmem:[#allocation82_spill] sm:$0xff] %v3389_v27  ;;  %v6921_v43 = vmov %v6915_v30  ;;  %v3407_v30 = vmul.f32 %v2993_v54, %v3039_v60  ;;  %v3411_v35 = vmul.f32 %v2989_v53, %v3039_v60 }
  0x71   :  { %6918 = vst [vmem:[#allocation83_spill] sm:$0xff] %v3393_v26  ;;  %6919 = vst [vmem:[#allocation84_spill] sm:$0xff] %v3397_v44  ;;  %v664_v45 = vsel %vm130_vm1, %v6921_v43, %v6920_v31  ;;  %v3415_v27 = vmul.f32 %v3017_v58, %v3051_v63  ;;  %v6925_v44 = vrot.slane %v2927_v37, 7  ;;  %v6926_v26 = vmov %v6920_v31 }
  0x72   :  { %1222 = vrot.lane.b32.xlu1 %v3007_v57, %s2765_s2  ;;  %1220 = vrot.lane.b32.xlu0 %v2999_v55, %s2765_s2  ;;  %v3194_v57 = vstv %s3041_s11  ;;  %v3216_v55 = vmul.f32 %v3039_v60, %v2870_v24  ;;  %v3237_v24 = vstv %s3080_s15  ;;  %6922 = vst [vmem:[#allocation85_spill] sm:$0xff] %v3407_v30  ;;  %6923 = vst [vmem:[#allocation86_spill] sm:$0xff] %v3411_v35  ;;  %v787_v35 = vrot.slane %v2911_v33, 1  ;;  %s2632_s11 = sld [smem:[#allocation9 + $0x1]] }
  0x73   :  { %6881 = vst [vmem:[#allocation48_spill] sm:$0xff] %v3194_v57  ;;  %6924 = vst [vmem:[#allocation87_spill] sm:$0xff] %v3415_v27  ;;  %v663_v36 = vsel %vm130_vm1, %v6926_v26, %v6925_v44  ;;  %v3429_v54 = vmul.f32 %v3017_v58, %v3039_v60  ;;  %v3432_v53 = vmul.f32 %v665_v47, %v3292_v13  ;;  %s2617_s15 = sld [smem:[#allocation4 + $0x27]] }
  0x74   :  { %v3435_v27 = vmul.f32 %v665_v47, %v3155_v39  ;;  %v3441_v26 = vmul.f32 %v665_v47, %v3201_v10  ;;  %v3444_v46 = vmul.f32 %v664_v45, %v3155_v39  ;;  %v3448_v58 = vmul.f32 %v2913_v34, %v3110_v40 }
  0x75   :  { %6927 = vst [vmem:[#allocation88_spill] sm:$0xff] %v3429_v54  ;;  %6928 = vst [vmem:[#allocation89_spill] sm:$0xff] %v3432_v53  ;;  %v3452_v53 = vmul.f32 %v2913_v34, %v3035_v59  ;;  %v3456_v54 = vmul.f32 %v663_v36, %v3155_v39  ;;  %v3472_v39 = vmul.f32 %v664_v45, %v3292_v13 }
  0x76   :  { %6929 = vst [vmem:[#allocation90_spill] sm:$0xff] %v3435_v27  ;;  %6930 = vst [vmem:[#allocation91_spill] sm:$0xff] %v3441_v26  ;;  %v3462_v26 = vmul.f32 %v2913_v34, %v3049_v62 }
  0x77   :  { %6931 = vst [vmem:[#allocation92_spill] sm:$0xff] %v3444_v46  ;;  %6932 = vst [vmem:[#allocation93_spill] sm:$0xff] %v3448_v58  ;;  %v3465_v46 = vmul.f32 %v664_v45, %v3201_v10  ;;  %v3468_v58 = vmul.f32 %v663_v36, %v3201_v10  ;;  %v3491_v45 = vmul.f32 %v2911_v33, %v3049_v62 }
  0x78   :  { %6933 = vst [vmem:[#allocation94_spill] sm:$0xff] %v3452_v53  ;;  %6934 = vst [vmem:[#allocation95_spill] sm:$0xff] %v3456_v54  ;;  %v3475_v54 = vmul.f32 %v663_v36, %v3292_v13  ;;  %v3495_v36 = vmul.f32 %v2911_v33, %v3035_v59  ;;  %v3503_v13 = vmul.f32 %v2927_v37, %v3035_v59 }
  0x79   :  { %6935 = vst [vmem:[#allocation96_spill] sm:$0xff] %v3462_v26  ;;  %6936 = vst [vmem:[#allocation97_spill] sm:$0xff] %v3465_v46  ;;  %v790_v26 = vsel %vm191_vm0, %v6940_v17, %v787_v35  ;;  %v3483_v46 = vmul.f32 %v2911_v33, %v3110_v40  ;;  %v3499_v17 = vmul.f32 %v2927_v37, %v3049_v62 }
  0x7a   :  { %6937 = vst [vmem:[#allocation98_spill] sm:$0xff] %v3468_v58  ;;  %6938 = vst [vmem:[#allocation99_spill] sm:$0xff] %v3472_v39  ;;  %v3513_v33 = vmul.f32 %v790_v26, %v3152_v19  ;;  %v3520_v62 = vmul.f32 %v790_v26, %v3039_v60 }
  0x7b   :  { %6939 = vst [vmem:[#allocation100_spill] sm:$0xff] %v3475_v54  ;;  %6941 = vst [vmem:[#allocation101_spill] sm:$0xff] %v3483_v46 }
  0x7c   :  { %6943 = vst [vmem:[#allocation103_spill] sm:$0xff] %v3491_v45  ;;  %6944 = vst [vmem:[#allocation104_spill] sm:$0xff] %v3495_v36 }
  0x7d   :  { %6945 = vst [vmem:[#allocation105_spill] sm:$0xff] %v3499_v17  ;;  %6946 = vst [vmem:[#allocation106_spill] sm:$0xff] %v3503_v13 }
  0x7e   :  { %6949 = vst [vmem:[#allocation108_spill] sm:$0xff] %v3513_v33  ;;  %6951 = vst [vmem:[#allocation110_spill] sm:$0xff] %v3520_v62 }
  0x94   :  { %v3423_v43 = vpop.permute.xlu1 %119  ;;  %v3425_v31 = vpop.permute.xlu0 %115 }
  0x95   :  { %v129_v30 = vrot.slane %v3423_v43, 7  ;;  %v127_v44 = vrot.slane %v3425_v31, 7  ;;  %v190_v45 = vrot.slane %v3423_v43, 1  ;;  %v188_v13 = vrot.slane %v3425_v31, 1 }
  0x96   :  { %v170_v62 = vmul.f32 %v3164_v51, %v3423_v43 }
  0x97   :  { %v133_v47 = vsel %vm130_vm1, %v129_v30, %v127_v44 }
  0x98   :  { %v135_v53 = vmul.f32 %v3170_v21, %v133_v47  ;;  %v122_v11 = vpop.permute.xlu1 %121  ;;  %v118_v27 = vpop.permute.xlu0 %117  ;;  %v3487_v47 = vmul.f32 %v2927_v37, %v3110_v40  ;;  %v6947_v40 = vrot.slane %v2927_v37, 1 }
  0x99   :  { %v128_v10 = vrot.slane %v118_v27, 7  ;;  %v189_v58 = vrot.slane %v118_v27, 1 }
  0x9a   :  { %6942 = vst [vmem:[#allocation102_spill] sm:$0xff] %v3487_v47  ;;  %v3509_v47 = vsel %vm191_vm0, %v787_v35, %v6947_v40  ;;  %v138_v59 = vadd.f32 %v135_v53, %v3167_v2 }
  0x9b   :  { %6948 = vst [vmem:[#allocation107_spill] sm:$0xff] %v3509_v47  ;;  %v3517_v36 = vmul.f32 %v3509_v47, %v3152_v19  ;;  %v131_v40 = vsel %vm130_vm1, %v128_v10, %v129_v30  ;;  %v132_v35 = vsel %vm130_vm1, %v127_v44, %v128_v10  ;;  %v3535_v53 = vmul.f32 %v3509_v47, %v3039_v60 }
  0x9c   :  { %v126_v17 = vpop.permute.xlu1 %125  ;;  %v124_v46 = vpop.permute.xlu0 %123  ;;  %v136_v33 = vmul.f32 %v3170_v21, %v132_v35  ;;  %v137_v19 = vmul.f32 %v3170_v21, %v131_v40  ;;  %v154_v30 = vrot.slane %v122_v11, 7  ;;  %v168_v10 = vmul.f32 %v3164_v51, %v3425_v31 }
  0x9d   :  { %6950 = vst [vmem:[#allocation109_spill] sm:$0xff] %v3517_v36  ;;  %v3531_v36 = vmul.f32 %v790_v26, %v3051_v63  ;;  %6953 = vst [vmem:[#allocation112_spill] sm:$0xff] %v3535_v53  ;;  %v156_v54 = vrot.slane %v126_v17, 7  ;;  %v155_v35 = vrot.slane %v124_v46, 7  ;;  %v194_v26 = vsel %vm191_vm0, %v190_v45, %v188_v13 }
  0x9e   :  { %v139_v44 = vadd.f32 %v136_v33, %v3167_v2  ;;  %v140_v40 = vadd.f32 %v137_v19, %v3167_v2  ;;  %v217_v43 = vrot.slane %v126_v17, 1  ;;  %v216_v42 = vrot.slane %v124_v46, 1 }
  0x9f   :  { %6952 = vst [vmem:[#allocation111_spill] sm:$0xff] %v3531_v36  ;;  %v151_v36 = vadd.f32 %v3191_v52, %v138_v59  ;;  %v159_v53 = vsel %vm130_vm1, %v156_v54, %v154_v30  ;;  %v215_v33 = vrot.slane %v122_v11, 1  ;;  %v192_v19 = vsel %vm191_vm0, %v189_v58, %v190_v45 }
  0xa0   :  { %v161_v39 = vmul.f32 %v3194_v57, %v159_v53  ;;  %v152_v60 = vadd.f32 %v3198_v9, %v139_v44  ;;  %v153_v31 = vadd.f32 %v3208_v7, %v140_v40  ;;  %v157_v37 = vsel %vm130_vm1, %v155_v35, %v156_v54  ;;  %v3557_v52 = vpop.permute.xlu0 %232  ;;  %v3563_v44 = vpop.permute.xlu1 %234 }
  0xa1   :  { %v158_v59 = vsel %vm130_vm1, %v154_v30, %v155_v35  ;;  %v193_v53 = vsel %vm191_vm0, %v188_v13, %v189_v58  ;;  %v163_v7 = vmul.f32 %v3194_v57, %v157_v37  ;;  %v198_v45 = vmul.f32 %v3178_v1, %v194_v26 }
  0xa2   :  { %v164_v34 = vadd.f32 %v161_v39, %v151_v36  ;;  %v162_v9 = vmul.f32 %v3194_v57, %v158_v59  ;;  %v182_v40 = vmul.f32 %v3181_v18, %v122_v11  ;;  %v169_v54 = vmul.f32 %v3164_v51, %v118_v27 }
  0xa3   :  { %v220_v30 = vsel %vm191_vm0, %v217_v43, %v215_v33  ;;  %v166_v63 = vadd.f32 %v163_v7, %v153_v31  ;;  %v219_v58 = vsel %vm191_vm0, %v215_v33, %v216_v42  ;;  %v196_v39 = vmul.f32 %v3178_v1, %v193_v53 }
  0xa4   :  { %v171_v35 = vadd.f32 %v168_v10, %v164_v34  ;;  %v165_v47 = vadd.f32 %v162_v9, %v152_v60  ;;  %v197_v37 = vmul.f32 %v3178_v1, %v192_v19  ;;  %v184_v13 = vmul.f32 %v3181_v18, %v126_v17  ;;  %v3583_v19 = vpop.permute.xlu0 %236 }
  0xa5   :  { %v218_v11 = vsel %vm191_vm0, %v216_v42, %v217_v43  ;;  %v173_v26 = vadd.f32 %v170_v62, %v166_v63  ;;  %v183_v34 = vmul.f32 %v3181_v18, %v124_v46  ;;  %v224_v60 = vmul.f32 %v3204_v6, %v220_v30  ;;  %v3588_v62 = vpop.permute.xlu1 %238 }
  0xa6   :  { %v178_v27 = vadd.f32 %v3057_v3, %v171_v35  ;;  %v172_v36 = vadd.f32 %v169_v54, %v165_v47  ;;  %v222_v10 = vmul.f32 %v3204_v6, %v219_v58  ;;  %v245_v31 = vrot.slane %v3563_v44, 7 }
  0xa7   :  { %v244_v33 = vrot.slane %v3557_v52, 7  ;;  %v180_v42 = vadd.f32 %v3047_v61, %v173_v26  ;;  %v223_v3 = vmul.f32 %v3204_v6, %v218_v11  ;;  %v3592_v46 = vmul.f32 %v3221_v23, %v3563_v44 }
  0xa8   :  { %v179_v17 = vadd.f32 %v3185_v14, %v172_v36  ;;  %v185_v43 = vadd.f32 %v182_v40, %v178_v27  ;;  %v3596_v63 = vmul.f32 %v3563_v44, %v3164_v51  ;;  %v341_v47 = vrot.slane %v3563_v44, 1 }
  0xa9   :  { %v340_v59 = vrot.slane %v3557_v52, 1  ;;  %v187_v53 = vadd.f32 %v184_v13, %v180_v42  ;;  %v246_v9 = vrot.slane %v3583_v19, 7  ;;  %v248_v7 = vsel %vm130_vm1, %v244_v33, %v245_v31  ;;  %v3626_v26 = vpop.permute.xlu1 %242 }
  0xaa   :  { %v186_v14 = vadd.f32 %v183_v34, %v179_v17  ;;  %v199_v61 = vadd.f32 %v196_v39, %v185_v43  ;;  %v302_v40 = vmul.f32 %v3221_v23, %v3557_v52  ;;  %v308_v54 = vmul.f32 %v3557_v52, %v3164_v51 }
  0xab   :  { %v282_v30 = vrot.slane %v3588_v62, 7  ;;  %v201_v44 = vadd.f32 %v198_v45, %v187_v53  ;;  %v247_v39 = vsel %vm130_vm1, %v245_v31, %v246_v9  ;;  %v344_v13 = vsel %vm191_vm0, %v340_v59, %v341_v47 }
  0xac   :  { %v200_v35 = vadd.f32 %v197_v37, %v186_v14  ;;  %v212_v58 = vadd.f32 %v3212_v20, %v199_v61  ;;  %v3615_v11 = vmul.f32 %v3240_v25, %v3588_v62  ;;  %v3619_v27 = vmul.f32 %v3588_v62, %v3181_v18 }
  0xad   :  { %v249_v52 = vsel %vm130_vm1, %v246_v9, %v244_v33  ;;  %v214_v37 = vadd.f32 %v3061_v4, %v201_v44  ;;  %v252_v34 = vmul.f32 %v3224_v56, %v248_v7  ;;  %v258_v31 = vmul.f32 %v248_v7, %v3170_v21 }
  0xae   :  { %v213_v45 = vadd.f32 %v3216_v55, %v200_v35  ;;  %v225_v20 = vadd.f32 %v222_v10, %v212_v58  ;;  %v251_v36 = vmul.f32 %v3224_v56, %v249_v52  ;;  %v257_v17 = vmul.f32 %v249_v52, %v3170_v21  ;;  %v3639_v58 = vpop.permute.xlu0 %240 }
  0xaf   :  { %v259_v42 = vmul.f32 %v247_v39, %v3170_v21  ;;  %v227_v14 = vadd.f32 %v224_v60, %v214_v37  ;;  %v253_v33 = vmul.f32 %v3224_v56, %v247_v39  ;;  %v347_v10 = vmul.f32 %v3237_v24, %v344_v13 }
  0xb0   :  { %v226_v43 = vadd.f32 %v223_v3, %v213_v45  ;;  %v254_v55 = vadd.f32 %v251_v36, %v225_v20  ;;  %v353_v4 = vmul.f32 %v344_v13, %v3178_v1  ;;  %v260_v53 = vadd.f32 %v257_v17, %v3167_v2 }
  0xb1   :  { %v284_v61 = vrot.slane %v3626_v26, 7  ;;  %v256_v35 = vadd.f32 %v253_v33, %v227_v14  ;;  %v342_v7 = vrot.slane %v3583_v19, 1  ;;  %v261_v60 = vadd.f32 %v258_v31, %v3167_v2 }
  0xb2   :  { %v255_v9 = vadd.f32 %v252_v34, %v226_v43  ;;  %v273_v44 = vadd.f32 %v3244_v12, %v254_v55  ;;  %v262_v3 = vadd.f32 %v259_v42, %v3167_v2  ;;  %v279_v39 = vadd.f32 %v3228_v32, %v260_v53 }
  0xb3   :  { %v287_v13 = vsel %vm130_vm1, %v284_v61, %v282_v30  ;;  %v275_v37 = vadd.f32 %v3262_v48, %v256_v35  ;;  %v378_v12 = vrot.slane %v3588_v62, 1  ;;  %v304_v36 = vmul.f32 %v3221_v23, %v3583_v19 }
  0xb4   :  { %v289_v52 = vmul.f32 %v3251_v38, %v287_v13  ;;  %v295_v45 = vmul.f32 %v287_v13, %v3194_v57  ;;  %v274_v20 = vadd.f32 %v3258_v49, %v255_v9  ;;  %v310_v34 = vmul.f32 %v3583_v19, %v3164_v51 }
  0xb5   :  { %v283_v32 = vrot.slane %v3639_v58, 7  ;;  %v343_v31 = vsel %vm191_vm0, %v341_v47, %v342_v7  ;;  %v345_v17 = vsel %vm191_vm0, %v342_v7, %v340_v59  ;;  %v280_v48 = vadd.f32 %v3232_v22, %v261_v60 }
  0xb6   :  { %v292_v42 = vadd.f32 %v289_v52, %v273_v44  ;;  %v298_v49 = vadd.f32 %v295_v45, %v279_v39  ;;  %v281_v62 = vadd.f32 %v3248_v50, %v262_v3  ;;  %v348_v59 = vmul.f32 %v3237_v24, %v343_v31 }
  0xb7   :  { %v285_v43 = vsel %vm130_vm1, %v283_v32, %v284_v61  ;;  %v286_v19 = vsel %vm130_vm1, %v282_v30, %v283_v32  ;;  %v330_v53 = vmul.f32 %v3240_v25, %v3626_v26  ;;  %v380_v35 = vrot.slane %v3626_v26, 1 }
  0xb8   :  { %v305_v14 = vadd.f32 %v302_v40, %v292_v42  ;;  %v311_v33 = vadd.f32 %v308_v54, %v298_v49  ;;  %v290_v55 = vmul.f32 %v3251_v38, %v286_v19  ;;  %v291_v47 = vmul.f32 %v3251_v38, %v285_v43  ;;  %v6954_v49 = vld [vmem:[#allocation54_spill] sm:$0xff] }
  0xb9   :  { %v296_v22 = vmul.f32 %v286_v19, %v3194_v57  ;;  %v297_v50 = vmul.f32 %v285_v43, %v3194_v57  ;;  %v336_v54 = vmul.f32 %v3626_v26, %v3181_v18  ;;  %v379_v45 = vrot.slane %v3639_v58, 1  ;;  %v6958_v19 = vld [vmem:[#allocation16_spill] sm:$0xff] }
  0xba   :  { %v318_v61 = vadd.f32 %v3084_v15, %v305_v14  ;;  %v324_v9 = vadd.f32 %v3065_v8, %v311_v33  ;;  %v293_v30 = vadd.f32 %v290_v55, %v274_v20  ;;  %v294_v40 = vadd.f32 %v291_v47, %v275_v37  ;;  %v6960_v14 = vld [vmem:[#allocation17_spill] sm:$0xff] }
  0xbb   :  { %v299_v7 = vadd.f32 %v296_v22, %v280_v48  ;;  %v300_v44 = vadd.f32 %v297_v50, %v281_v62  ;;  %v329_v8 = vmul.f32 %v3240_v25, %v3639_v58  ;;  %v6955_v48 = vld [vmem:[#allocation32_spill] sm:$0xff]  ;;  %v6956_v62 = vld [vmem:[#allocation107_spill] sm:$0xff]  ;;  %v349_v33 = vmul.f32 %v3237_v24, %v345_v17  ;;  %v6963_v22 = vld [vmem:[#allocation53_spill] sm:$0xff] }
  0xbc   :  { %v306_v60 = vadd.f32 %v3592_v46, %v293_v30  ;;  %v307_v3 = vadd.f32 %v304_v36, %v294_v40  ;;  %v331_v39 = vadd.f32 %v3615_v11, %v318_v61  ;;  %v337_v13 = vadd.f32 %v3619_v27, %v324_v9  ;;  %v3687_v46 = vpop.permute.xlu1 %403  ;;  %v6964_v40 = vld [vmem:[#allocation55_spill] sm:$0xff] }
  0xbd   :  { %v312_v15 = vadd.f32 %v3596_v63, %v299_v7  ;;  %v313_v52 = vadd.f32 %v310_v34, %v300_v44  ;;  %v383_v11 = vsel %vm191_vm0, %v380_v35, %v378_v12  ;;  %v335_v36 = vmul.f32 %v3639_v58, %v3181_v18 }
  0xbe   :  { %v319_v20 = vadd.f32 %v3266_v28, %v306_v60  ;;  %v320_v26 = vadd.f32 %v3088_v16, %v307_v3  ;;  %v350_v37 = vadd.f32 %v347_v10, %v331_v39  ;;  %v356_v32 = vadd.f32 %v353_v4, %v337_v13  ;;  %v6965_v60 = vld [vmem:[#allocation56_spill] sm:$0xff] }
  0xbf   :  { %v325_v27 = vadd.f32 %v3270_v41, %v312_v15  ;;  %v326_v63 = vadd.f32 %v3069_v0, %v313_v52  ;;  %v354_v10 = vmul.f32 %v343_v31, %v3178_v1  ;;  %v3700_v43 = vmul.f32 %v6956_v62, %v6955_v48  ;;  %v3713_v31 = vpop.permute.xlu0 %401  ;;  %v6966_v52 = vld [vmem:[#allocation57_spill] sm:$0xff] }
  0xc0   :  { %v332_v34 = vadd.f32 %v329_v8, %v319_v20  ;;  %v333_v42 = vadd.f32 %v330_v53, %v320_v26  ;;  %v369_v28 = vadd.f32 %v6954_v49, %v350_v37  ;;  %v375_v16 = vadd.f32 %v3282_v29, %v356_v32 }
  0xc1   :  { %v338_v4 = vadd.f32 %v335_v36, %v325_v27  ;;  %6957 = vst [vmem:[#allocation54_spill] sm:$0xff] %v3700_v43  ;;  %v6959_v41 = vrot.slane %v6958_v19, 1  ;;  %v6961_v0 = vrot.slane %v6960_v14, 1  ;;  %v339_v55 = vadd.f32 %v336_v54, %v326_v63  ;;  %v3722_v54 = vpop.permute.xlu1 %407  ;;  %v6967_v36 = vld [vmem:[#allocation34_spill] sm:$0xff]  ;;  %v6968_v19 = vld [vmem:[#allocation33_spill] sm:$0xff]  ;;  %v6983_v43 = vld [vmem:[#allocation64_spill] sm:$0xff] }
  0xc2   :  { %v351_v47 = vadd.f32 %v348_v59, %v332_v34  ;;  %v382_v29 = vsel %vm191_vm0, %v378_v12, %v379_v45  ;;  %v355_v53 = vmul.f32 %v345_v17, %v3178_v1  ;;  %v387_v50 = vmul.f32 %v6963_v22, %v383_v11 }
  0xc3   :  { %v3708_v58 = vsel %vm191_vm0, %v6961_v0, %v6959_v41  ;;  %v357_v61 = vadd.f32 %v354_v10, %v338_v4  ;;  %v381_v9 = vsel %vm191_vm0, %v379_v45, %v380_v35  ;;  %v352_v30 = vadd.f32 %v349_v33, %v333_v42  ;;  %v3746_v63 = vpop.permute.xlu0 %405  ;;  %v6969_v0 = vld [vmem:[#allocation59_spill] sm:$0xff] }
  0xc4   :  { %6962 = vst [vmem:[#allocation107_spill] sm:$0xff] %v3708_v58  ;;  %v370_v7 = vadd.f32 %v6964_v40, %v351_v47  ;;  %v414_v44 = vrot.slane %v3687_v46, 7  ;;  %v413_v59 = vrot.slane %v3713_v31, 7  ;;  %v393_v12 = vmul.f32 %v383_v11, %v3204_v6 }
  0xc5   :  { %v376_v3 = vadd.f32 %v6965_v60, %v357_v61  ;;  %v385_v17 = vmul.f32 %v6963_v22, %v382_v29  ;;  %v391_v39 = vmul.f32 %v382_v29, %v3204_v6  ;;  %v358_v13 = vadd.f32 %v355_v53, %v339_v55  ;;  %v3761_v14 = vpop.permute.xlu1 %411 }
  0xc6   :  { %v386_v35 = vmul.f32 %v6963_v22, %v381_v9  ;;  %v392_v15 = vmul.f32 %v381_v9, %v3204_v6  ;;  %v3732_v8 = vmul.f32 %v6966_v52, %v3687_v46  ;;  %v3736_v26 = vmul.f32 %v3687_v46, %v3221_v23 }
  0xc7   :  { %v388_v45 = vadd.f32 %v385_v17, %v369_v28  ;;  %v394_v20 = vadd.f32 %v391_v39, %v375_v16  ;;  %v3740_v37 = vmul.f32 %v3687_v46, %v3164_v51  ;;  %v6788_v32 = vrot.slane %v3687_v46, 1 }
  0xc8   :  { %v417_v11 = vsel %vm130_vm1, %v413_v59, %v414_v44  ;;  %v6786_v27 = vrot.slane %v3713_v31, 1  ;;  %v371_v34 = vadd.f32 %v6967_v36, %v352_v30  ;;  %v489_v42 = vmul.f32 %v6966_v52, %v3713_v31 }
  0xc9   :  { %v495_v49 = vmul.f32 %v3713_v31, %v3221_v23  ;;  %v501_v28 = vmul.f32 %v3713_v31, %v3164_v51  ;;  %v6787_v16 = vrot.slane %v3722_v54, 7  ;;  %v389_v10 = vadd.f32 %v386_v35, %v370_v7 }
  0xca   :  { %v395_v4 = vadd.f32 %v392_v15, %v376_v3  ;;  %v3758_v62 = vmul.f32 %v3722_v54, %v3240_v25  ;;  %v377_v41 = vadd.f32 %v6968_v19, %v358_v13  ;;  %v421_v33 = vmul.f32 %v6969_v0, %v417_v11 }
  0xcb   :  { %v427_v55 = vmul.f32 %v417_v11, %v3224_v56  ;;  %v433_v47 = vmul.f32 %v417_v11, %v3170_v21  ;;  %v415_v29 = vrot.slane %v3746_v63, 7  ;;  %v3773_v53 = vsel %vm191_vm0, %v6786_v27, %v6788_v32 }
  0xcc   :  { %v3777_v61 = vmul.f32 %v3722_v54, %v3181_v18  ;;  %v390_v30 = vadd.f32 %v387_v50, %v371_v34  ;;  %v396_v40 = vadd.f32 %v393_v12, %v377_v41  ;;  %v465_v3 = vrot.slane %v3761_v14, 7 }
  0xcd   :  { %v416_v7 = vsel %vm130_vm1, %v414_v44, %v415_v29  ;;  %v418_v60 = vsel %vm130_vm1, %v415_v29, %v413_v59  ;;  %v424_v15 = vadd.f32 %v421_v33, %v389_v10  ;;  %v430_v11 = vadd.f32 %v427_v55, %v395_v4  ;;  %v6970_v33 = vld [vmem:[#allocation67_spill] sm:$0xff] }
  0xce   :  { %v420_v17 = vmul.f32 %v6969_v0, %v418_v60  ;;  %v422_v39 = vmul.f32 %v6969_v0, %v416_v7  ;;  %v426_v13 = vmul.f32 %v418_v60, %v3224_v56  ;;  %v428_v35 = vmul.f32 %v416_v7, %v3224_v56 }
  0xcf   :  { %v436_v50 = vadd.f32 %v433_v47, %v3167_v2  ;;  %v432_v12 = vmul.f32 %v418_v60, %v3170_v21  ;;  %v434_v59 = vmul.f32 %v416_v7, %v3170_v21  ;;  %v3794_v19 = vmul.f32 %v3773_v53, %v3237_v24  ;;  %v6973_v60 = vld [vmem:[#allocation71_spill] sm:$0xff] }
  0xd0   :  { %v423_v44 = vadd.f32 %v420_v17, %v388_v45  ;;  %v425_v36 = vadd.f32 %v422_v39, %v390_v30  ;;  %v429_v34 = vadd.f32 %v426_v13, %v394_v20  ;;  %v3798_v41 = vmul.f32 %v3773_v53, %v3178_v1  ;;  %v6971_v45 = vld [vmem:[#allocation63_spill] sm:$0xff]  ;;  %v6972_v30 = vld [vmem:[#allocation62_spill] sm:$0xff]  ;;  %v3812_v13 = vpop.permute.xlu0 %409 }
  0xd1   :  { %v431_v29 = vadd.f32 %v428_v35, %v396_v40  ;;  %v435_v10 = vadd.f32 %v432_v12, %v3167_v2  ;;  %v468_v20 = vsel %vm130_vm1, %v465_v3, %v6787_v16  ;;  %v437_v35 = vadd.f32 %v434_v59, %v3167_v2  ;;  %v6974_v12 = vld [vmem:[#allocation74_spill] sm:$0xff]  ;;  %v6985_v2 = vld [vmem:[#allocation72_spill] sm:$0xff] }
  0xd2   :  { %v448_v55 = vadd.f32 %v6970_v33, %v423_v44  ;;  %v454_v47 = vadd.f32 %v6971_v45, %v429_v34  ;;  %v470_v17 = vmul.f32 %v6973_v60, %v468_v20  ;;  %v476_v39 = vmul.f32 %v468_v20, %v3251_v38  ;;  %v6975_v34 = vld [vmem:[#allocation75_spill] sm:$0xff]  ;;  %v6976_v45 = vld [vmem:[#allocation69_spill] sm:$0xff] }
  0xd3   :  { %v460_v7 = vadd.f32 %v6972_v30, %v435_v10  ;;  %v482_v40 = vmul.f32 %v468_v20, %v3194_v57  ;;  %v449_v44 = vadd.f32 %v6974_v12, %v424_v15  ;;  %v450_v33 = vadd.f32 %v6975_v34, %v425_v36  ;;  %v6977_v10 = vld [vmem:[#allocation70_spill] sm:$0xff] }
  0xd4   :  { %v455_v9 = vadd.f32 %v6976_v45, %v430_v11  ;;  %v473_v27 = vadd.f32 %v470_v17, %v448_v55  ;;  %v479_v16 = vadd.f32 %v476_v39, %v454_v47  ;;  %v456_v30 = vadd.f32 %v6977_v10, %v431_v29  ;;  %v6980_v17 = vld [vmem:[#allocation65_spill] sm:$0xff] }
  0xd5   :  { %v485_v32 = vadd.f32 %v482_v40, %v460_v7  ;;  %v491_v4 = vmul.f32 %v6966_v52, %v3746_v63  ;;  %v497_v20 = vmul.f32 %v3746_v63, %v3221_v23  ;;  %v503_v59 = vmul.f32 %v3746_v63, %v3164_v51  ;;  %v6981_v40 = vld [vmem:[#allocation66_spill] sm:$0xff] }
  0xd6   :  { %v464_v15 = vrot.slane %v3812_v13, 7  ;;  %v6978_v36 = vrot.slane %v3746_v63, 1  ;;  %v6979_v11 = vrot.slane %v3687_v46, 1  ;;  %v492_v47 = vadd.f32 %v489_v42, %v473_v27  ;;  %v6986_v27 = vld [vmem:[#allocation68_spill] sm:$0xff] }
  0xd7   :  { %v498_v29 = vadd.f32 %v495_v49, %v479_v16  ;;  %v504_v7 = vadd.f32 %v501_v28, %v485_v32  ;;  %v461_v39 = vadd.f32 %v6980_v17, %v436_v50  ;;  %v462_v12 = vadd.f32 %v6981_v40, %v437_v35 }
  0xd8   :  { %v548_v55 = vsel %vm191_vm0, %v6979_v11, %v6978_v36  ;;  %v466_v34 = vsel %vm130_vm1, %v464_v15, %v465_v3  ;;  %v6982_v45 = vrot.slane %v3722_v54, 7  ;;  %v3841_v46 = vadd.f32 %v6983_v43, %v492_v47 }
  0xd9   :  { %v517_v36 = vadd.f32 %v6985_v2, %v498_v29  ;;  %v523_v42 = vadd.f32 %v6986_v27, %v504_v7  ;;  %v472_v49 = vmul.f32 %v6973_v60, %v466_v34  ;;  %v478_v16 = vmul.f32 %v466_v34, %v3251_v38 }
  0xda   :  { %v467_v10 = vsel %vm130_vm1, %v6982_v45, %v464_v15  ;;  %6984 = vst [vmem:[#allocation16_spill] sm:$0xff] %v3841_v46  ;;  %v597_v50 = vrot.slane %v3761_v14, 1  ;;  %v484_v43 = vmul.f32 %v466_v34, %v3194_v57  ;;  %v6987_v15 = vld [vmem:[#allocation61_spill] sm:$0xff] }
  0xdb   :  { %v471_v32 = vmul.f32 %v6973_v60, %v467_v10  ;;  %v477_v28 = vmul.f32 %v467_v10, %v3251_v38  ;;  %v483_v3 = vmul.f32 %v467_v10, %v3194_v57  ;;  %v528_v2 = vmul.f32 %v6987_v15, %v3812_v13  ;;  %v6988_v57 = vld [vmem:[#allocation76_spill] sm:$0xff] }
  0xdc   :  { %v475_v11 = vadd.f32 %v472_v49, %v450_v33  ;;  %v481_v29 = vadd.f32 %v478_v16, %v456_v30  ;;  %v487_v17 = vadd.f32 %v484_v43, %v462_v12  ;;  %v536_v45 = vadd.f32 %v3758_v62, %v517_v36  ;;  %v6991_v62 = vld [vmem:[#allocation79_spill] sm:$0xff]  ;;  %v6992_v36 = vld [vmem:[#allocation80_spill] sm:$0xff]  ;;  %v6993_v49 = vld [vmem:[#allocation78_spill] sm:$0xff] }
  0xdd   :  { %v474_v35 = vadd.f32 %v471_v32, %v449_v44  ;;  %v480_v47 = vadd.f32 %v477_v28, %v455_v9  ;;  %v486_v7 = vadd.f32 %v483_v3, %v461_v39  ;;  %v540_v10 = vmul.f32 %v3812_v13, %v3181_v18 }
  0xde   :  { %v494_v27 = vadd.f32 %v491_v4, %v475_v11  ;;  %v500_v32 = vadd.f32 %v497_v20, %v481_v29  ;;  %v506_v46 = vadd.f32 %v503_v59, %v487_v17  ;;  %v534_v9 = vmul.f32 %v3812_v13, %v3240_v25  ;;  %v6994_v20 = vld [vmem:[#allocation81_spill] sm:$0xff]  ;;  %v6995_v59 = vld [vmem:[#allocation60_spill] sm:$0xff] }
  0xdf   :  { %v493_v40 = vadd.f32 %v3732_v8, %v474_v35  ;;  %v499_v44 = vadd.f32 %v3736_v26, %v480_v47  ;;  %v505_v34 = vadd.f32 %v3740_v37, %v486_v7  ;;  %v542_v30 = vadd.f32 %v3777_v61, %v523_v42  ;;  %v6989_v8 = vld [vmem:[#allocation77_spill] sm:$0xff]  ;;  %v6996_v47 = vld [vmem:[#allocation83_spill] sm:$0xff] }
  0xe0   :  { %v3865_v39 = vadd.f32 %v6989_v8, %v494_v27  ;;  %v519_v4 = vadd.f32 %v6992_v36, %v500_v32  ;;  %v525_v28 = vadd.f32 %v6994_v20, %v506_v46  ;;  %v553_v16 = vmul.f32 %v6995_v59, %v548_v55 }
  0xe1   :  { %v512_v33 = vadd.f32 %v6988_v57, %v493_v40  ;;  %v518_v12 = vadd.f32 %v6991_v62, %v499_v44  ;;  %v524_v26 = vadd.f32 %v6993_v49, %v505_v34  ;;  %v561_v57 = vadd.f32 %v3794_v19, %v536_v45  ;;  %v6998_v19 = vld [vmem:[#allocation30_spill] sm:$0xff]  ;;  %v7004_v44 = vld [vmem:[#allocation85_spill] sm:$0xff]  ;;  %v3896_v34 = vpop.permute.xlu1 %626 }
  0xe2   :  { %6990 = vst [vmem:[#allocation17_spill] sm:$0xff] %v3865_v39  ;;  %v559_v61 = vmul.f32 %v548_v55, %v3237_v24  ;;  %v565_v42 = vmul.f32 %v548_v55, %v3178_v1  ;;  %v567_v11 = vadd.f32 %v3798_v41, %v542_v30  ;;  %v3879_v7 = vmul.f32 %v3708_v58, %v6955_v48  ;;  %v7012_v49 = vld [vmem:[#allocation86_spill] sm:$0xff] }
  0xe3   :  { %v531_v37 = vadd.f32 %v528_v2, %v512_v33  ;;  %v537_v3 = vadd.f32 %v534_v9, %v518_v12  ;;  %v543_v35 = vadd.f32 %v540_v10, %v524_v26  ;;  %v586_v29 = vadd.f32 %v6996_v47, %v561_v57  ;;  %v7002_v10 = vld [vmem:[#allocation82_spill] sm:$0xff]  ;;  %v7005_v33 = vld [vmem:[#allocation19_spill] sm:$0xff]  ;;  %v7007_v9 = vld [vmem:[#allocation20_spill] sm:$0xff] }
  0xe4   :  { %6997 = vst [vmem:[#allocation55_spill] sm:$0xff] %v3879_v7  ;;  %v596_v17 = vrot.slane %v3812_v13, 1  ;;  %v3884_v40 = vmul.f32 %v3708_v58, %v6998_v19  ;;  %v7000_v45 = vrot.slane %v3713_v31, 1  ;;  %v7001_v55 = vrot.slane %v3746_v63, 1  ;;  %v7011_v12 = vld [vmem:[#allocation84_spill] sm:$0xff]  ;;  %v7018_v47 = vld [vmem:[#allocation73_spill] sm:$0xff] }
  0xe5   :  { %v556_v43 = vadd.f32 %v553_v16, %v531_v37  ;;  %v562_v46 = vadd.f32 %v559_v61, %v537_v3  ;;  %v568_v2 = vadd.f32 %v565_v42, %v543_v35  ;;  %v592_v32 = vadd.f32 %v7004_v44, %v567_v11  ;;  %v3928_v3 = vpop.permute.xlu0 %624 }
  0xe6   :  { %6999 = vst [vmem:[#allocation56_spill] sm:$0xff] %v3884_v40  ;;  %v550_v41 = vsel %vm191_vm0, %v7001_v55, %v7000_v45  ;;  %v7006_v13 = vrot.slane %v7005_v33, 7  ;;  %v7008_v30 = vrot.slane %v7007_v9, 7  ;;  %v541_v31 = vmul.f32 %v3761_v14, %v3181_v18 }
  0xe7   :  { %v3893_v27 = vadd.f32 %v7002_v10, %v556_v43  ;;  %v7010_v63 = vrot.slane %v3722_v54, 1  ;;  %v587_v36 = vadd.f32 %v7011_v12, %v562_v46  ;;  %v593_v26 = vadd.f32 %v7012_v49, %v568_v2 }
  0xe8   :  { %v3904_v8 = vsel %vm130_vm1, %v7008_v30, %v7006_v13  ;;  %v3916_v20 = vmul.f32 %v6995_v59, %v3773_v53  ;;  %v3920_v37 = vmul.f32 %v6987_v15, %v3722_v54  ;;  %v3924_v16 = vmul.f32 %v6987_v15, %v3761_v14 }
  0xe9   :  { %7003 = vst [vmem:[#allocation34_spill] sm:$0xff] %v3893_v27  ;;  %7009 = vst [vmem:[#allocation33_spill] sm:$0xff] %v3904_v8  ;;  %v600_v62 = vsel %vm191_vm0, %v597_v50, %v7010_v63  ;;  %v535_v57 = vmul.f32 %v3761_v14, %v3240_v25  ;;  %v3931_v35 = vmul.f32 %v6995_v59, %v550_v41  ;;  %v7017_v42 = vmov %v7010_v63  ;;  %v3973_v49 = vpop.permute.xlu0 %628  ;;  %v7025_v8 = vld [vmem:[#allocation45_spill] sm:$0xff] }
  0xea   :  { %7013 = vst [vmem:[#allocation67_spill] sm:$0xff] %v3916_v20  ;;  %7014 = vst [vmem:[#allocation63_spill] sm:$0xff] %v3920_v37  ;;  %v560_v61 = vmul.f32 %v550_v41, %v3237_v24  ;;  %v598_v53 = vsel %vm191_vm0, %v596_v17, %v597_v50  ;;  %v599_v43 = vsel %vm191_vm0, %v7017_v42, %v596_v17  ;;  %v637_v10 = vrot.slane %v3896_v34, 7 }
  0xeb   :  { %7015 = vst [vmem:[#allocation62_spill] sm:$0xff] %v3924_v16  ;;  %7016 = vst [vmem:[#allocation71_spill] sm:$0xff] %v3931_v35  ;;  %v566_v11 = vmul.f32 %v550_v41, %v3178_v1  ;;  %v3942_v46 = vmul.f32 %v7018_v47, %v600_v62  ;;  %v610_v14 = vmul.f32 %v600_v62, %v6963_v22  ;;  %v636_v44 = vrot.slane %v3928_v3, 7 }
  0xec   :  { %v538_v2 = vadd.f32 %v535_v57, %v519_v4  ;;  %v616_v45 = vmul.f32 %v600_v62, %v3204_v6  ;;  %v544_v55 = vadd.f32 %v541_v31, %v525_v28  ;;  %v3949_v50 = vmul.f32 %v3896_v34, %v6966_v52  ;;  %v3958_v4 = vpop.permute.xlu1 %630 }
  0xed   :  { %7019 = vst [vmem:[#allocation74_spill] sm:$0xff] %v3942_v46  ;;  %v608_v54 = vmul.f32 %v599_v43, %v6963_v22  ;;  %v615_v17 = vmul.f32 %v598_v53, %v3204_v6  ;;  %v3955_v41 = vmul.f32 %v3896_v34, %v3221_v23  ;;  %v3961_v28 = vmul.f32 %v7018_v47, %v599_v43 }
  0xee   :  { %v3964_v13 = vmul.f32 %v7018_v47, %v598_v53  ;;  %v609_v30 = vmul.f32 %v598_v53, %v6963_v22  ;;  %v614_v31 = vmul.f32 %v599_v43, %v3204_v6  ;;  %v3970_v62 = vmul.f32 %v3896_v34, %v3164_v51 }
  0xef   :  { %7020 = vst [vmem:[#allocation75_spill] sm:$0xff] %v3961_v28  ;;  %v611_v63 = vadd.f32 %v608_v54, %v586_v29  ;;  %v563_v57 = vadd.f32 %v560_v61, %v538_v2  ;;  %v3977_v46 = vmul.f32 %v3928_v3, %v6966_v52  ;;  %v762_v53 = vrot.slane %v3928_v3, 1  ;;  %v7022_v54 = vld [vmem:[#allocation87_spill] sm:$0xff] }
  0xf0   :  { %7021 = vst [vmem:[#allocation69_spill] sm:$0xff] %v3964_v13  ;;  %v612_v42 = vadd.f32 %v609_v30, %v587_v36  ;;  %v617_v58 = vadd.f32 %v614_v31, %v592_v32  ;;  %v618_v35 = vadd.f32 %v615_v17, %v593_v26  ;;  %v640_v29 = vsel %vm130_vm1, %v636_v44, %v637_v10  ;;  %v3996_v30 = vpop.permute.xlu1 %634 }
  0xf1   :  { %v569_v43 = vadd.f32 %v566_v11, %v544_v55  ;;  %v588_v16 = vadd.f32 %v7022_v54, %v563_v57  ;;  %v643_v12 = vmul.f32 %v640_v29, %v6969_v0  ;;  %v714_v61 = vmul.f32 %v3928_v3, %v3221_v23  ;;  %v7023_v11 = vld [vmem:[#allocation88_spill] sm:$0xff] }
  0xf2   :  { %v720_v32 = vmul.f32 %v3928_v3, %v3164_v51  ;;  %v638_v36 = vrot.slane %v3973_v49, 7  ;;  %v649_v2 = vmul.f32 %v640_v29, %v3224_v56  ;;  %v684_v26 = vrot.slane %v3958_v4, 7 }
  0xf3   :  { %v3993_v17 = vmul.f32 %v3958_v4, %v6987_v15  ;;  %v594_v55 = vadd.f32 %v7023_v11, %v569_v43  ;;  %v655_v31 = vmul.f32 %v640_v29, %v3170_v21  ;;  %v7024_v57 = vrot.slane %v3896_v34, 1 }
  0xf4   :  { %v4005_v54 = vmul.f32 %v3958_v4, %v3240_v25  ;;  %v641_v39 = vsel %vm130_vm1, %v638_v36, %v636_v44  ;;  %v4011_v28 = vmul.f32 %v3958_v4, %v3181_v18  ;;  %v646_v20 = vadd.f32 %v643_v12, %v612_v42 }
  0xf5   :  { %v766_v3 = vsel %vm191_vm0, %v762_v53, %v7024_v57  ;;  %v642_v29 = vmul.f32 %v641_v39, %v6969_v0  ;;  %v648_v11 = vmul.f32 %v641_v39, %v3224_v56  ;;  %v639_v57 = vsel %vm130_vm1, %v637_v10, %v638_v36  ;;  %v7026_v10 = vld [vmem:[#allocation89_spill] sm:$0xff] }
  0xf6   :  { %v654_v37 = vmul.f32 %v641_v39, %v3170_v21  ;;  %v686_v13 = vrot.slane %v3996_v30, 7  ;;  %v613_v27 = vadd.f32 %v610_v14, %v588_v16  ;;  %v644_v44 = vmul.f32 %v639_v57, %v6969_v0  ;;  %v7027_v39 = vld [vmem:[#allocation91_spill] sm:$0xff] }
  0xf7   :  { %v645_v19 = vadd.f32 %v642_v29, %v611_v63  ;;  %v651_v48 = vadd.f32 %v648_v11, %v617_v58  ;;  %v652_v33 = vadd.f32 %v649_v2, %v618_v35  ;;  %v619_v9 = vadd.f32 %v616_v45, %v594_v55  ;;  %v7028_v58 = vld [vmem:[#allocation90_spill] sm:$0xff]  ;;  %v7029_v55 = vld [vmem:[#allocation48_spill] sm:$0xff] }
  0xf8   :  { %v650_v43 = vmul.f32 %v639_v57, %v3224_v56  ;;  %v657_v40 = vadd.f32 %v654_v37, %v7025_v8  ;;  %v658_v12 = vadd.f32 %v655_v31, %v7025_v8  ;;  %v656_v42 = vmul.f32 %v639_v57, %v3170_v21  ;;  %v7034_v21 = vld [vmem:[#allocation92_spill] sm:$0xff] }
  0xf9   :  { %v669_v36 = vadd.f32 %v7026_v10, %v645_v19  ;;  %v675_v7 = vadd.f32 %v7027_v39, %v651_v48  ;;  %v4028_v16 = vmul.f32 %v766_v3, %v6995_v59  ;;  %v4031_v14 = vmul.f32 %v766_v3, %v3237_v24 }
  0xfa   :  { %v681_v35 = vadd.f32 %v7028_v58, %v657_v40  ;;  %v689_v45 = vsel %vm130_vm1, %v686_v13, %v684_v26  ;;  %v647_v37 = vadd.f32 %v644_v44, %v613_v27  ;;  %v4040_v48 = vmul.f32 %v766_v3, %v3178_v1  ;;  %v4045_v40 = vpop.permute.xlu0 %632  ;;  %v7031_v58 = vld [vmem:[#allocation100_spill] sm:$0xff] }
  0xfb   :  { %v690_v63 = vmul.f32 %v689_v45, %v6973_v60  ;;  %v696_v2 = vmul.f32 %v689_v45, %v3251_v38  ;;  %v702_v19 = vmul.f32 %v689_v45, %v7029_v55  ;;  %v653_v31 = vadd.f32 %v650_v43, %v619_v9 }
  0xfc   :  { %v710_v29 = vmul.f32 %v3973_v49, %v6966_v52  ;;  %v764_v11 = vrot.slane %v3973_v49, 1  ;;  %v659_v57 = vadd.f32 %v656_v42, %v7025_v8  ;;  %v716_v39 = vmul.f32 %v3973_v49, %v3221_v23  ;;  %v7035_v23 = vld [vmem:[#allocation95_spill] sm:$0xff] }
  0xfd   :  { %v693_v27 = vadd.f32 %v690_v63, %v669_v36  ;;  %v699_v44 = vadd.f32 %v696_v2, %v675_v7  ;;  %v705_v10 = vadd.f32 %v702_v19, %v681_v35  ;;  %v722_v3 = vmul.f32 %v3973_v49, %v3164_v51  ;;  %v7030_v36 = vld [vmem:[#allocation99_spill] sm:$0xff]  ;;  %v7032_v49 = vld [vmem:[#allocation97_spill] sm:$0xff]  ;;  %v7033_v19 = vld [vmem:[#allocation98_spill] sm:$0xff] }
  0xfe   :  { %v4054_v9 = vmul.f32 %v3996_v30, %v6987_v15  ;;  %v4058_v43 = vmul.f32 %v3996_v30, %v3240_v25  ;;  %v767_v42 = vsel %vm191_vm0, %v764_v11, %v762_v53  ;;  %v670_v7 = vadd.f32 %v7030_v36, %v646_v20 }
  0xff   :  { %v671_v35 = vadd.f32 %v7031_v58, %v647_v37  ;;  %v685_v45 = vrot.slane %v4045_v40, 7  ;;  %v711_v63 = vadd.f32 %v3977_v46, %v693_v27  ;;  %v676_v2 = vadd.f32 %v7032_v49, %v652_v33  ;;  %v7039_v58 = vld [vmem:[#allocation96_spill] sm:$0xff] }
 0x100   :  { %v677_v8 = vadd.f32 %v7033_v19, %v653_v31  ;;  %v682_v56 = vadd.f32 %v7034_v21, %v658_v12  ;;  %v717_v0 = vadd.f32 %v714_v61, %v699_v44  ;;  %v723_v51 = vadd.f32 %v720_v32, %v705_v10 }
 0x101   :  { %v683_v52 = vadd.f32 %v7035_v23, %v659_v57  ;;  %v687_v53 = vsel %vm130_vm1, %v685_v45, %v686_v13  ;;  %v688_v20 = vsel %vm130_vm1, %v684_v26, %v685_v45  ;;  %v7036_v31 = vrot.slane %v3896_v34, 1  ;;  %v7038_v26 = vld [vmem:[#allocation93_spill] sm:$0xff] }
 0x102   :  { %v692_v37 = vmul.f32 %v687_v53, %v6973_v60  ;;  %v698_v46 = vmul.f32 %v687_v53, %v3251_v38  ;;  %v704_v33 = vmul.f32 %v687_v53, %v7029_v55  ;;  %v691_v61 = vmul.f32 %v688_v20, %v6973_v60 }
 0x103   :  { %v765_v21 = vsel %vm191_vm0, %v7036_v31, %v764_v11  ;;  %v697_v23 = vmul.f32 %v688_v20, %v3251_v38  ;;  %v703_v13 = vmul.f32 %v688_v20, %v7029_v55  ;;  %v4085_v32 = vmul.f32 %v767_v42, %v6995_v59  ;;  %v7040_v11 = vld [vmem:[#allocation94_spill] sm:$0xff] }
 0x104   :  { %v729_v12 = vadd.f32 %v7038_v26, %v711_v63  ;;  %v695_v57 = vadd.f32 %v692_v37, %v671_v35  ;;  %v701_v27 = vadd.f32 %v698_v46, %v677_v8  ;;  %v694_v44 = vadd.f32 %v691_v61, %v670_v7  ;;  %v7041_v63 = vld [vmem:[#allocation101_spill] sm:$0xff]  ;;  %v7042_v37 = vld [vmem:[#allocation103_spill] sm:$0xff]  ;;  %v7045_v26 = vld [vmem:[#allocation102_spill] sm:$0xff] }
 0x105   :  { %7037 = vst [vmem:[#allocation70_spill] sm:$0xff] %v4085_v32  ;;  %v700_v10 = vadd.f32 %v697_v23, %v676_v2  ;;  %v706_v36 = vadd.f32 %v703_v13, %v682_v56  ;;  %v707_v34 = vadd.f32 %v704_v33, %v683_v52  ;;  %v735_v45 = vadd.f32 %v7039_v58, %v717_v0 }
 0x106   :  { %v741_v49 = vadd.f32 %v7040_v11, %v723_v51  ;;  %v812_v19 = vrot.slane %v3996_v30, 1  ;;  %v751_v53 = vmul.f32 %v4045_v40, %v3240_v25  ;;  %v712_v20 = vadd.f32 %v3949_v50, %v694_v44  ;;  %v7043_v50 = vld [vmem:[#allocation104_spill] sm:$0xff] }
 0x107   :  { %v718_v31 = vadd.f32 %v3955_v41, %v700_v10  ;;  %v724_v35 = vadd.f32 %v3970_v62, %v706_v36  ;;  %v757_v8 = vmul.f32 %v4045_v40, %v3181_v18  ;;  %v713_v56 = vadd.f32 %v710_v29, %v695_v57  ;;  %v7046_v57 = vld [vmem:[#allocation105_spill] sm:$0xff] }
 0x108   :  { %v719_v52 = vadd.f32 %v716_v39, %v701_v27  ;;  %v745_v0 = vmul.f32 %v4045_v40, %v6987_v15  ;;  %v747_v51 = vadd.f32 %v3993_v17, %v729_v12  ;;  %v725_v7 = vadd.f32 %v722_v3, %v707_v34  ;;  %v7047_v34 = vld [vmem:[#allocation106_spill] sm:$0xff] }
 0x109   :  { %v730_v2 = vadd.f32 %v7041_v63, %v712_v20  ;;  %v736_v46 = vadd.f32 %v7042_v37, %v718_v31  ;;  %v742_v33 = vadd.f32 %v7043_v50, %v724_v35  ;;  %v776_v41 = vmul.f32 %v767_v42, %v3237_v24  ;;  %v4130_v35 = vpop.permute.xlu0 %838  ;;  %v7055_v50 = vld [vmem:[#allocation54_spill] sm:$0xff] }
 0x10a   :  { %v7044_v62 = vrot.slane %v3958_v4, 1  ;;  %v753_v39 = vadd.f32 %v4005_v54, %v735_v45  ;;  %v759_v61 = vadd.f32 %v4011_v28, %v741_v49  ;;  %v781_v13 = vmul.f32 %v765_v21, %v3178_v1 }
 0x10b   :  { %v748_v23 = vadd.f32 %v745_v0, %v730_v2  ;;  %v754_v17 = vadd.f32 %v751_v53, %v736_v46  ;;  %v760_v3 = vadd.f32 %v757_v8, %v742_v33  ;;  %v731_v12 = vadd.f32 %v7045_v26, %v713_v56  ;;  %v7050_v56 = vld [vmem:[#allocation108_spill] sm:$0xff]  ;;  %v7052_v2 = vld [vmem:[#allocation111_spill] sm:$0xff] }
 0x10c   :  { %v815_v29 = vsel %vm191_vm0, %v812_v19, %v7044_v62  ;;  %v737_v27 = vadd.f32 %v7046_v57, %v719_v52  ;;  %v769_v44 = vmul.f32 %v765_v21, %v6995_v59  ;;  %v811_v10 = vrot.slane %v4045_v40, 1 }
 0x10d   :  { %v758_v36 = vmul.f32 %v3996_v30, %v3181_v18  ;;  %v743_v54 = vadd.f32 %v7047_v34, %v725_v7  ;;  %v771_v28 = vadd.f32 %v4028_v16, %v747_v51  ;;  %v775_v58 = vmul.f32 %v765_v21, %v3237_v24  ;;  %v4141_v21 = vpop.permute.xlu1 %840  ;;  %v7051_v7 = vld [vmem:[#allocation109_spill] sm:$0xff] }
 0x10e   :  { %v782_v45 = vmul.f32 %v767_v42, %v3178_v1  ;;  %v772_v11 = vadd.f32 %v769_v44, %v748_v23  ;;  %v777_v49 = vadd.f32 %v4031_v14, %v753_v39  ;;  %v783_v53 = vadd.f32 %v4040_v48, %v759_v61 }
 0x10f   :  { %v4125_v20 = vmul.f32 %v815_v29, %v7018_v47  ;;  %v4128_v40 = vmul.f32 %v815_v29, %v6963_v22  ;;  %v778_v30 = vadd.f32 %v775_v58, %v754_v17  ;;  %v784_v31 = vadd.f32 %v781_v13, %v760_v3  ;;  %v7057_v13 = vld [vmem:[#allocation57_spill] sm:$0xff] }
 0x110   :  { %v4133_v16 = vmul.f32 %v815_v29, %v3204_v6  ;;  %v4136_v42 = vadd.f32 %v4054_v9, %v731_v12  ;;  %v755_v14 = vadd.f32 %v4058_v43, %v737_v27  ;;  %v813_v48 = vsel %vm191_vm0, %v811_v10, %v812_v19  ;;  %v7053_v9 = vld [vmem:[#allocation110_spill] sm:$0xff]  ;;  %v7058_v12 = vld [vmem:[#allocation51_spill] sm:$0xff]  ;;  %v7059_v27 = vld [vmem:[#allocation44_spill] sm:$0xff] }
 0x111   :  { %7048 = vst [vmem:[#allocation65_spill] sm:$0xff] %v4125_v20  ;;  %v761_v8 = vadd.f32 %v758_v36, %v743_v54  ;;  %v795_v52 = vadd.f32 %v7050_v56, %v771_v28  ;;  %v851_v0 = vrot.slane %v4141_v21, 7  ;;  %v850_v51 = vrot.slane %v4130_v35, 7  ;;  %v4175_v36 = vpop.permute.xlu0 %842 }
 0x112   :  { %7049 = vst [vmem:[#allocation66_spill] sm:$0xff] %v4136_v42  ;;  %v796_v63 = vadd.f32 %v7051_v7, %v772_v11  ;;  %v801_v37 = vadd.f32 %v7052_v2, %v777_v49  ;;  %v807_v46 = vadd.f32 %v7053_v9, %v783_v53  ;;  %v7054_v43 = vmov %v7044_v62  ;;  %v7056_v62 = vld [vmem:[#allocation112_spill] sm:$0xff]  ;;  %v4182_v53 = vpop.permute.xlu1 %844  ;;  %v7064_v9 = vld [vmem:[#allocation46_spill] sm:$0xff] }
 0x113   :  { %v814_v19 = vsel %vm191_vm0, %v7054_v43, %v811_v10  ;;  %v802_v33 = vadd.f32 %v7055_v50, %v778_v30  ;;  %v808_v29 = vadd.f32 %v7056_v62, %v784_v31  ;;  %v823_v39 = vmul.f32 %v813_v48, %v6963_v22  ;;  %v7063_v7 = vld [vmem:[#allocation52_spill] sm:$0xff]  ;;  %v7066_v50 = vld [vmem:[#allocation55_spill] sm:$0xff] }
 0x114   :  { %v829_v61 = vmul.f32 %v813_v48, %v3204_v6  ;;  %v816_v23 = vmul.f32 %v814_v19, %v7018_v47  ;;  %v817_v17 = vmul.f32 %v813_v48, %v7018_v47  ;;  %v822_v3 = vmul.f32 %v814_v19, %v6963_v22  ;;  %v7062_v48 = vld [vmem:[#allocation59_spill] sm:$0xff]  ;;  %v7067_v62 = vld [vmem:[#allocation56_spill] sm:$0xff] }
 0x115   :  { %v4162_v4 = vmul.f32 %v4141_v21, %v7057_v13  ;;  %v828_v26 = vmul.f32 %v814_v19, %v3204_v6  ;;  %v4167_v57 = vmul.f32 %v4141_v21, %v7058_v12  ;;  %v4171_v44 = vmul.f32 %v4141_v21, %v7059_v27 }
 0x116   :  { %v854_v10 = vsel %vm130_vm1, %v850_v51, %v851_v0  ;;  %v4177_v34 = vadd.f32 %v816_v23, %v795_v52  ;;  %v4179_v54 = vadd.f32 %v817_v17, %v796_v63  ;;  %v825_v28 = vadd.f32 %v822_v3, %v801_v37  ;;  %v7068_v23 = vld [vmem:[#allocation45_spill] sm:$0xff] }
 0x117   :  { %v977_v58 = vrot.slane %v4141_v21, 1  ;;  %v826_v11 = vadd.f32 %v823_v39, %v802_v33  ;;  %v832_v49 = vadd.f32 %v829_v61, %v808_v29  ;;  %v779_v30 = vadd.f32 %v776_v41, %v755_v14 }
 0x118   :  { %7060 = vst [vmem:[#allocation64_spill] sm:$0xff] %v4177_v34  ;;  %7061 = vst [vmem:[#allocation72_spill] sm:$0xff] %v4179_v54  ;;  %v785_v31 = vadd.f32 %v782_v45, %v761_v8  ;;  %v857_v56 = vmul.f32 %v854_v10, %v7062_v48  ;;  %v863_v2 = vmul.f32 %v854_v10, %v7063_v7  ;;  %v852_v52 = vrot.slane %v4175_v36, 7  ;;  %v7075_v34 = vld [vmem:[#allocation42_spill] sm:$0xff] }
 0x119   :  { %v869_v43 = vmul.f32 %v854_v10, %v7064_v9  ;;  %v831_v19 = vadd.f32 %v828_v26, %v807_v46  ;;  %v4190_v63 = vmul.f32 %v4130_v35, %v7057_v13  ;;  %v4194_v21 = vmul.f32 %v4130_v35, %v7058_v12 }
 0x11a   :  { %v976_v41 = vrot.slane %v4130_v35, 1  ;;  %v4199_v45 = vmul.f32 %v4130_v35, %v7059_v27  ;;  %v4204_v8 = vmul.f32 %v4182_v53, %v6987_v15  ;;  %v855_v37 = vsel %vm130_vm1, %v852_v52, %v850_v51 }
 0x11b   :  { %v4210_v46 = vmul.f32 %v4182_v53, %v3240_v25  ;;  %v803_v33 = vadd.f32 %v7066_v50, %v779_v30  ;;  %v809_v29 = vadd.f32 %v7067_v62, %v785_v31  ;;  %v856_v35 = vmul.f32 %v855_v37, %v7062_v48  ;;  %v4232_v30 = vpop.permute.xlu1 %848 }
 0x11c   :  { %v4215_v39 = vadd.f32 %v857_v56, %v826_v11  ;;  %v4217_v61 = vadd.f32 %v863_v2, %v832_v49  ;;  %v4220_v17 = vadd.f32 %v869_v43, %v7068_v23  ;;  %v4224_v51 = vmul.f32 %v4182_v53, %v3181_v18 }
 0x11d   :  { %7065 = vst [vmem:[#allocation68_spill] sm:$0xff] %v4210_v46  ;;  %v980_v3 = vsel %vm191_vm0, %v976_v41, %v977_v58  ;;  %v853_v10 = vsel %vm130_vm1, %v851_v0, %v852_v52  ;;  %v862_v11 = vmul.f32 %v855_v37, %v7063_v7  ;;  %v859_v56 = vadd.f32 %v856_v35, %v825_v28  ;;  %v7071_v0 = vld [vmem:[#allocation58_spill] sm:$0xff]  ;;  %v7072_v52 = vld [vmem:[#allocation33_spill] sm:$0xff] }
 0x11e   :  { %7069 = vst [vmem:[#allocation61_spill] sm:$0xff] %v4224_v51  ;;  %v4235_v49 = vmul.f32 %v980_v3, %v6995_v59  ;;  %v4238_v31 = vmul.f32 %v980_v3, %v3237_v24  ;;  %v868_v2 = vmul.f32 %v855_v37, %v7064_v9  ;;  %v827_v43 = vadd.f32 %v4128_v40, %v803_v33 }
 0x11f   :  { %v833_v50 = vadd.f32 %v4133_v16, %v809_v29  ;;  %v978_v62 = vrot.slane %v4175_v36, 1  ;;  %v880_v26 = vmul.f32 %v7072_v52, %v7071_v0  ;;  %v858_v14 = vmul.f32 %v853_v10, %v7062_v48  ;;  %v7074_v16 = vld [vmem:[#allocation49_spill] sm:$0xff] }
 0x120   :  { %7070 = vst [vmem:[#allocation76_spill] sm:$0xff] %v4238_v31  ;;  %v864_v20 = vmul.f32 %v853_v10, %v7063_v7  ;;  %v870_v32 = vmul.f32 %v853_v10, %v7064_v9  ;;  %v6807_v42 = vrot.slane %v4232_v30, 7  ;;  %v4251_v28 = vmul.f32 %v980_v3, %v3178_v1  ;;  %v7082_v48 = vld [vmem:[#allocation29_spill] sm:$0xff]  ;;  %v7086_v31 = vld [vmem:[#allocation20_spill] sm:$0xff] }
 0x121   :  { %v865_v37 = vadd.f32 %v862_v11, %v831_v19  ;;  %v4255_v40 = vmul.f32 %v4175_v36, %v7057_v13  ;;  %v886_v33 = vmul.f32 %v7072_v52, %v7074_v16  ;;  %v871_v29 = vadd.f32 %v868_v2, %v7068_v23 }
 0x122   :  { %7073 = vst [vmem:[#allocation77_spill] sm:$0xff] %v4251_v28  ;;  %v883_v35 = vadd.f32 %v880_v26, %v859_v56  ;;  %v892_v54 = vmul.f32 %v7072_v52, %v7075_v34  ;;  %v7076_v9 = vrot.slane %v4182_v53, 7  ;;  %v4270_v3 = vmul.f32 %v4175_v36, %v7058_v12 }
 0x123   :  { %v4274_v10 = vmul.f32 %v4175_v36, %v7059_v27  ;;  %v981_v26 = vsel %vm191_vm0, %v978_v62, %v976_v41  ;;  %v861_v56 = vadd.f32 %v858_v14, %v827_v43  ;;  %v867_v2 = vadd.f32 %v864_v20, %v833_v50  ;;  %v7080_v43 = vld [vmem:[#allocation35_spill] sm:$0xff] }
 0x124   :  { %v903_v19 = vsel %vm130_vm1, %v6807_v42, %v7076_v9  ;;  %v873_v52 = vadd.f32 %v870_v32, %v7068_v23  ;;  %v4282_v9 = vsel %vm191_vm0, %v977_v58, %v978_v62  ;;  %v4285_v42 = vmul.f32 %v981_v26, %v6995_v59  ;;  %v2685_v23 = vld [vmem:[#allocation10 + $0x60] sm:$0xff]  ;;  %v7081_v50 = vld [vmem:[#allocation31_spill] sm:$0xff] }
 0x125   :  { %v904_v11 = vmul.f32 %v903_v19, %v6973_v60  ;;  %v4288_v7 = vmul.f32 %v981_v26, %v3237_v24  ;;  %v889_v27 = vadd.f32 %v886_v33, %v865_v37  ;;  %v910_v36 = vmul.f32 %v903_v19, %v3251_v38 }
 0x126   :  { %7077 = vst [vmem:[#allocation79_spill] sm:$0xff] %v4285_v42  ;;  %v4292_v41 = vmul.f32 %v981_v26, %v3178_v1  ;;  %v895_v14 = vadd.f32 %v892_v54, %v871_v29  ;;  %v916_v32 = vmul.f32 %v903_v19, %v7029_v55  ;;  %v940_v58 = vmul.f32 %v2685_v23, %v7080_v43 }
 0x127   :  { %7078 = vst [vmem:[#allocation80_spill] sm:$0xff] %v4288_v7  ;;  %v907_v20 = vadd.f32 %v904_v11, %v883_v35  ;;  %v4297_v62 = vmul.f32 %v2685_v23, %v7081_v50  ;;  %v4300_v28 = vmul.f32 %v2685_v23, %v7082_v48  ;;  %v4304_v37 = vmul.f32 %v4232_v30, %v6987_v15  ;;  %v4316_v11 = vld [vmem:[#allocation10 + $0x68] sm:$0xff] }
 0x128   :  { %7079 = vst [vmem:[#allocation78_spill] sm:$0xff] %v4292_v41  ;;  %v4308_v33 = vmul.f32 %v4232_v30, %v3240_v25  ;;  %v4312_v54 = vmul.f32 %v4232_v30, %v3181_v18  ;;  %v7085_v35 = vlaneseq  ;;  %v913_v26 = vadd.f32 %v910_v36, %v889_v27  ;;  %v4319_v41 = vld [vmem:[#allocation10 + $0x70] sm:$0xff]  ;;  %v7091_v36 = vld [vmem:[#allocation19_spill] sm:$0xff] }
 0x129   :  { %v7087_v51 = vrot.slane %v7086_v31, 7  ;;  %v919_v12 = vadd.f32 %v916_v32, %v895_v14  ;;  %v925_v29 = vadd.f32 %v4190_v63, %v907_v20  ;;  %v7092_v23 = vrot.slane %v7091_v36, 7 }
 0x12a   :  { %7083 = vst [vmem:[#allocation81_spill] sm:$0xff] %v4308_v33  ;;  %7084 = vst [vmem:[#allocation60_spill] sm:$0xff] %v4312_v54  ;;  %v57_v19 = vand.u32 127, %v7085_v35  ;;  %v7088_v33 = vld [vmem:[#allocation18_spill] sm:$0xff]  ;;  %v4329_v35 = vpop.permute.xlu0 %846  ;;  %v7093_v63 = vrot.slane %v4182_v53, 1  ;;  %v7094_v14 = vrot.slane %v4232_v30, 1 }
 0x12b   :  { %v7089_v46 = vrot.slane %v7088_v33, 7  ;;  %v4352_v33 = vadd.f32 %v4194_v21, %v913_v26  ;;  %v7096_v21 = vrot.slane %v4182_v53, 7 }
 0x12c   :  { %v4348_v20 = vsel %vm191_vm0, %v7094_v14, %v7093_v63  ;;  %vm67_vm2 = vcmp.ge.s32.totalorder %v57_v19, 1  ;;  %vm68_vm3 = vcmp.le.s32.totalorder %v57_v19, 16  ;;  %vm70_vm4 = vcmp.ge.s32.totalorder %v57_v19, 19 }
 0x12d   :  { %v877_v54 = vsel %vm130_vm1, %v7089_v46, %v7087_v51  ;;  %v7090_v27 = vmov %v7089_v46  ;;  %vm71_vm5 = vcmp.le.s32.totalorder %v57_v19, 34  ;;  %v7095_v14 = vrot.slane %v4232_v30, 7  ;;  %vm4385_vm7 = vmand %vm67_vm2, %vm68_vm3 }
 0x12e   :  { %v878_v13 = vsel %vm130_vm1, %v7092_v23, %v7090_v27  ;;  %v882_v7 = vmul.f32 %v877_v54, %v7071_v0  ;;  %v888_v46 = vmul.f32 %v877_v54, %v7074_v16  ;;  %v894_v32 = vmul.f32 %v877_v54, %v7075_v34  ;;  %vm72_vm8 = vmand %vm70_vm4, %vm71_vm5 }
 0x12f   :  { %v881_v31 = vmul.f32 %v878_v13, %v7071_v0  ;;  %v887_v42 = vmul.f32 %v878_v13, %v7074_v16  ;;  %v893_v51 = vmul.f32 %v878_v13, %v7075_v34  ;;  %v899_v23 = vrot.slane %v4329_v35, 7  ;;  %vm4407_vm9 = vmor %vm4385_vm7, %vm72_vm8 }
 0x130   :  { %v943_v13 = vadd.f32 %v940_v58, %v925_v29  ;;  %v885_v16 = vadd.f32 %v882_v7, %v861_v56  ;;  %v891_v6 = vadd.f32 %v888_v46, %v867_v2  ;;  %v897_v58 = vadd.f32 %v894_v32, %v873_v52  ;;  %vm74_vm10 = vmand %vm58_vm6, %vm4407_vm9 }
 0x131   :  { %v884_v27 = vadd.f32 %v881_v31, %v4215_v39  ;;  %v890_v0 = vadd.f32 %v887_v42, %v4217_v61  ;;  %v896_v63 = vadd.f32 %v893_v51, %v4220_v17  ;;  %v901_v34 = vsel %vm130_vm1, %v899_v23, %v7095_v14 }
 0x132   :  { %v902_v54 = vsel %vm130_vm1, %v7096_v21, %v899_v23  ;;  %v906_v42 = vmul.f32 %v901_v34, %v6973_v60  ;;  %v912_v61 = vmul.f32 %v901_v34, %v3251_v38  ;;  %v918_v56 = vmul.f32 %v901_v34, %v7029_v55 }
 0x133   :  { %v905_v7 = vmul.f32 %v902_v54, %v6973_v60  ;;  %v911_v39 = vmul.f32 %v902_v54, %v3251_v38  ;;  %v917_v17 = vmul.f32 %v902_v54, %v7029_v55  ;;  %v941_v2 = vmul.f32 %v4316_v11, %v7080_v43 }
 0x134   :  { %v909_v26 = vadd.f32 %v906_v42, %v885_v16  ;;  %v947_v52 = vmul.f32 %v4316_v11, %v7081_v50  ;;  %v942_v51 = vmul.f32 %v4319_v41, %v7080_v43  ;;  %v953_v32 = vmul.f32 %v4316_v11, %v7082_v48 }
 0x135   :  { %v908_v29 = vadd.f32 %v905_v7, %v884_v27  ;;  %v914_v31 = vadd.f32 %v911_v39, %v890_v0  ;;  %v920_v46 = vadd.f32 %v917_v17, %v896_v63  ;;  %v959_v23 = vmul.f32 %v4329_v35, %v6987_v15 }
 0x136   :  { %v927_v16 = vadd.f32 %v4255_v40, %v909_v26  ;;  %v965_v63 = vmul.f32 %v4329_v35, %v3240_v25  ;;  %v937_v14 = vadd.f32 %v4199_v45, %v919_v12  ;;  %v915_v34 = vadd.f32 %v912_v61, %v891_v6 }
 0x137   :  { %v926_v0 = vadd.f32 %v4162_v4, %v908_v29  ;;  %v932_v27 = vadd.f32 %v4167_v57, %v914_v31  ;;  %v921_v21 = vadd.f32 %v918_v56, %v897_v58  ;;  %v938_v54 = vadd.f32 %v4171_v44, %v920_v46 }
 0x138   :  { %v961_v4 = vadd.f32 %v4204_v8, %v943_v13  ;;  %v971_v40 = vmul.f32 %v4329_v35, %v3181_v18  ;;  %v4403_v57 = vmul.f32 %v4348_v20, %v7018_v47  ;;  %v945_v39 = vadd.f32 %v942_v51, %v927_v16  ;;  %v7108_v16 = vld [vmem:[#allocation50_spill] sm:$0xff] }
 0x139   :  { %v944_v7 = vadd.f32 %v941_v2, %v926_v0  ;;  %v950_v42 = vadd.f32 %v947_v52, %v932_v27  ;;  %v956_v12 = vadd.f32 %v953_v32, %v938_v54  ;;  %v948_v44 = vmul.f32 %v4319_v41, %v7081_v50  ;;  %v7112_v54 = vld [vmem:[#allocation79_spill] sm:$0xff] }
 0x13a   :  { %7099 = vst [vmem:[#allocation83_spill] sm:$0xff] %v4403_v57  ;;  %v989_v18 = vmul.f32 %v4282_v9, %v3237_v24  ;;  %v933_v19 = vadd.f32 %v4270_v3, %v915_v34  ;;  %v939_v13 = vadd.f32 %v4274_v10, %v921_v21  ;;  %v954_v58 = vmul.f32 %v4319_v41, %v7082_v48 }
 0x13b   :  { %v962_v45 = vadd.f32 %v959_v23, %v944_v7  ;;  %v968_v8 = vadd.f32 %v965_v63, %v950_v42  ;;  %v983_v61 = vmul.f32 %v4282_v9, %v6995_v59  ;;  %v974_v17 = vadd.f32 %v971_v40, %v956_v12  ;;  %v7107_v23 = vld [vmem:[#allocation32_spill] sm:$0xff] }
 0x13c   :  { %v985_v56 = vadd.f32 %v4235_v49, %v961_v4  ;;  %v995_v2 = vmul.f32 %v4282_v9, %v3178_v1  ;;  %v7102_v29 = vrot.slane %v4319_v41, 1  ;;  %v7103_v26 = vrot.slane %v4316_v11, 1  ;;  %v7106_v9 = vld [vmem:[#allocation41_spill] sm:$0xff]  ;;  %v4475_v4 = vpop.permute.xlu1 %1054 }
 0x13d   :  { %v963_v48 = vadd.f32 %v4304_v37, %v945_v39  ;;  %v7105_v49 = vrot.slane %v7091_v36, 1  ;;  %v1025_v52 = vrot.slane %v4329_v35, 1  ;;  %v986_v46 = vadd.f32 %v983_v61, %v962_v45 }
 0x13e   :  { %v1003_v3 = vsel %vm191_vm0, %v7103_v26, %v7102_v29  ;;  %v7104_v10 = vmov %v7103_v26  ;;  %v992_v51 = vadd.f32 %v989_v18, %v968_v8  ;;  %v949_v37 = vadd.f32 %v4297_v62, %v4352_v33  ;;  %v7111_v33 = vld [vmem:[#allocation30_spill] sm:$0xff] }
 0x13f   :  { %v4441_v1 = vsel %vm191_vm0, %v7105_v49, %v7104_v10  ;;  %v1007_v31 = vmul.f32 %v1003_v3, %v7106_v9  ;;  %v1013_v55 = vmul.f32 %v1003_v3, %v7107_v23  ;;  %v955_v11 = vadd.f32 %v4300_v28, %v937_v14  ;;  %v7117_v26 = vld [vmem:[#allocation34_spill] sm:$0xff]  ;;  %v7119_v10 = vld [vmem:[#allocation16_spill] sm:$0xff]  ;;  %v7120_v49 = vld [vmem:[#allocation63_spill] sm:$0xff] }
 0x140   :  { %v1006_v32 = vmul.f32 %v4441_v1, %v7106_v9  ;;  %v4453_v0 = vmul.f32 %v4348_v20, %v6963_v22  ;;  %v4457_v27 = vmul.f32 %v4348_v20, %v7108_v16  ;;  %v6816_v35 = vmov 0.0  }
 0x141   :  { %v4460_v63 = vsel %vm74_vm10, 1.0, %v6816_v35  ;;  %v4465_v34 = vsel %vm4407_vm9, 1.0, %v6816_v35  ;;  %v998_v62 = vadd.f32 %v995_v2, %v974_v17  ;;  %v1019_v28 = vmul.f32 %v1003_v3, %v7111_v33  ;;  %v7118_v3 = vld [vmem:[#allocation69_spill] sm:$0xff] }
 0x142   :  { %7109 = vst [vmem:[#allocation82_spill] sm:$0xff] %v4460_v63  ;;  %7110 = vst [vmem:[#allocation85_spill] sm:$0xff] %v4465_v34  ;;  %v951_v14 = vadd.f32 %v948_v44, %v933_v19  ;;  %v957_v21 = vadd.f32 %v954_v58, %v939_v13  ;;  %v4469_v7 = vadd.f32 %v7112_v54, %v963_v48  ;;  %v7113_v20 = vrot.slane %v4232_v30, 1  ;;  %v7115_v30 = vld [vmem:[#allocation57_spill] sm:$0xff] }
 0x143   :  { %v1009_v40 = vadd.f32 %v1006_v32, %v985_v56  ;;  %v1010_v39 = vadd.f32 %v1007_v31, %v986_v46  ;;  %v1016_v12 = vadd.f32 %v1013_v55, %v992_v51  ;;  %v6817_v45 = vrot.slane %v4475_v4, 7  ;;  %v7116_v56 = vld [vmem:[#allocation51_spill] sm:$0xff] }
 0x144   :  { %v1027_v42 = vsel %vm191_vm0, %v1025_v52, %v7113_v20  ;;  %v7114_v8 = vrot.slane %v4182_v53, 1  ;;  %v4486_v13 = vmul.f32 %v4475_v4, %v7115_v30  ;;  %v1022_v58 = vadd.f32 %v1019_v28, %v998_v62  ;;  %v4494_v53 = vpop.permute.xlu0 %1052 }
 0x145   :  { %v1031_v18 = vmul.f32 %v1027_v42, %v7018_v47  ;;  %v1037_v19 = vmul.f32 %v1027_v42, %v6963_v22  ;;  %v1043_v17 = vmul.f32 %v1027_v42, %v7108_v16  ;;  %v4492_v2 = vmul.f32 %v4475_v4, %v7116_v56  ;;  %v7122_v42 = vld [vmem:[#allocation67_spill] sm:$0xff] }
 0x146   :  { %v1028_v44 = vsel %vm191_vm0, %v7114_v8, %v1025_v52  ;;  %v1064_v29 = vrot.slane %v4494_v53, 7  ;;  %v606_v48 = vadd.f32 %v7118_v3, %v7117_v26  ;;  %v530_v31 = vadd.f32 %v7120_v49, %v7119_v10  ;;  %v7121_v52 = vld [vmem:[#allocation24_spill] sm:$0xff]  ;;  %v7124_v10 = vld [vmem:[#allocation81_spill] sm:$0xff] }
 0x147   :  { %v1030_v61 = vmul.f32 %v1028_v44, %v7018_v47  ;;  %v577_v46 = vmul.f32 %v7106_v9, %v7121_v52  ;;  %v1036_v32 = vmul.f32 %v1028_v44, %v6963_v22  ;;  %v1042_v55 = vmul.f32 %v1028_v44, %v7108_v16  ;;  %v7125_v44 = vld [vmem:[#allocation61_spill] sm:$0xff] }
 0x148   :  { %v6819_v62 = vrot.slane %v4475_v4, 1  ;;  %v4506_v28 = vadd.f32 %v1031_v18, %v1010_v39  ;;  %v1040_v54 = vadd.f32 %v1037_v19, %v1016_v12  ;;  %v4509_v20 = vmul.f32 %v4465_v34, %v606_v48  ;;  %v4526_v19 = vpop.permute.xlu0 %1056 }
 0x149   :  { %v1033_v51 = vadd.f32 %v1030_v61, %v1009_v40  ;;  %v555_v8 = vadd.f32 %v7122_v42, %v530_v31  ;;  %v1046_v26 = vadd.f32 %v1043_v17, %v1022_v58  ;;  %v4514_v3 = vmul.f32 %v4494_v53, %v7115_v30  ;;  %v7123_v40 = vld [vmem:[#allocation68_spill] sm:$0xff] }
 0x14a   :  { %v967_v61 = vadd.f32 %v7123_v40, %v949_v37  ;;  %v969_v49 = vadd.f32 %v7124_v10, %v951_v14  ;;  %v1068_v16 = vsel %vm130_vm1, %v1064_v29, %v6817_v45  ;;  %v6818_v39 = vrot.slane %v4494_v53, 1  ;;  %1382 = vrot.lane.b32.xlu1 %v4509_v20, %s2764_s25  ;;  %v7126_v58 = vld [vmem:[#allocation60_spill] sm:$0xff]  ;;  %v7132_v10 = vld [vmem:[#allocation77_spill] sm:$0xff] }
 0x14b   :  { %v580_v12 = vadd.f32 %v577_v46, %v555_v8  ;;  %v973_v18 = vadd.f32 %v7125_v44, %v955_v11  ;;  %v975_v17 = vadd.f32 %v7126_v58, %v957_v21  ;;  %v7127_v37 = vld [vmem:[#allocation76_spill] sm:$0xff]  ;;  %v7128_v14 = vrot.slane %v7091_v36, 1  ;;  %v7130_v46 = vld [vmem:[#allocation75_spill] sm:$0xff] }
 0x14c   :  { %v991_v48 = vadd.f32 %v7127_v37, %v967_v61  ;;  %v7129_v31 = vrot.slane %v4319_v41, 1  ;;  %v1012_v42 = vmul.f32 %v4441_v1, %v7107_v23  ;;  %v7131_v11 = vld [vmem:[#allocation80_spill] sm:$0xff]  ;;  %v7133_v61 = vld [vmem:[#allocation59_spill] sm:$0xff]  ;;  %v4547_v37 = vpop.permute.xlu1 %1058  ;;  %v4552_v35 = vmul.f32 %v4460_v63, %v1033_v51 }
 0x14d   :  { %v605_v8 = vadd.f32 %v7130_v46, %v580_v12  ;;  %v993_v40 = vadd.f32 %v7131_v11, %v969_v49  ;;  %v997_v44 = vadd.f32 %v7132_v10, %v973_v18  ;;  %v1071_v36 = vmul.f32 %v1068_v16, %v7133_v61  ;;  %v7134_v58 = vld [vmem:[#allocation52_spill] sm:$0xff] }
 0x14e   :  { %v4536_v52 = vsel %vm191_vm0, %v7129_v31, %v7128_v14  ;;  %v1077_v41 = vmul.f32 %v1068_v16, %v7134_v58  ;;  %v1015_v14 = vadd.f32 %v1012_v42, %v991_v48  ;;  %v1018_v31 = vmul.f32 %v4441_v1, %v7111_v33  ;;  %7135 = vst [vmem:[#allocation84_spill] sm:$0xff] %v4552_v35  ;;  %v7137_v1 = vld [vmem:[#allocation78_spill] sm:$0xff]  ;;  %v4573_v46 = vld [vmem:[#allocation10 + $0xa0] sm:$0xff]  ;;  %v7146_v35 = vld [vmem:[#allocation23_spill] sm:$0xff] }
 0x14f   :  { %v1014_v21 = vmul.f32 %v4536_v52, %v7107_v23  ;;  %v4556_v49 = vmul.f32 %v4494_v53, %v7116_v56  ;;  %v4559_v12 = vmul.f32 %v4460_v63, %v605_v8  ;;  %v1066_v18 = vrot.slane %v4526_v19, 7  ;;  %7138 = vst [vmem:[#allocation87_spill] sm:$0xff] %v4573_v46 }
 0x150   :  { %v4568_v16 = vsel %vm191_vm0, %v6818_v39, %v6819_v62  ;;  %v999_v51 = vadd.f32 %v7137_v1, %v975_v17  ;;  %v1020_v48 = vmul.f32 %v4536_v52, %v7111_v33  ;;  %v1021_v42 = vadd.f32 %v1018_v31, %v997_v44  ;;  %v7141_v62 = vld [vmem:[#allocation17_spill] sm:$0xff] }
 0x151   :  { %7136 = vst [vmem:[#allocation86_spill] sm:$0xff] %v4559_v12  ;;  %1380 = vrot.lane.b32.xlu0 %v4559_v12, %s2764_s25  ;;  %v1017_v11 = vadd.f32 %v1014_v21, %v993_v40  ;;  %v1039_v10 = vadd.f32 %v1036_v32, %v1015_v14  ;;  %v1069_v45 = vsel %vm130_vm1, %v1066_v18, %v1064_v29  ;;  %v4602_v21 = vpop.permute.xlu1 %1062  ;;  %v55_v8 = vadd.s32 16, %v2811_v5 }
 0x152   :  { %1386 = vrot.lane.b32.xlu1 %v4559_v12, %s2765_s2  ;;  %v1074_v17 = vadd.f32 %v1071_v36, %v1040_v54  ;;  %v1080_v1 = vadd.f32 %v1077_v41, %v1046_v26  ;;  %v1045_v39 = vadd.f32 %v1042_v55, %v1021_v42  ;;  %v1070_v33 = vmul.f32 %v1069_v45, %v7133_v61  ;;  %v7142_v55 = vld [vmem:[#allocation62_spill] sm:$0xff] }
 0x153   :  { %v4585_v44 = vmul.f32 %v4568_v16, %v6995_v59  ;;  %v4590_v32 = vmul.f32 %v4547_v37, %v6987_v15  ;;  %v1076_v29 = vmul.f32 %v1069_v45, %v7134_v58  ;;  %v4595_v40 = vmul.f32 %v4547_v37, %v3240_v25  ;;  %v7144_v12 = vld [vmem:[#allocation22_spill] sm:$0xff] }
 0x154   :  { %v1023_v54 = vadd.f32 %v1020_v48, %v999_v51  ;;  %v4600_v26 = vmul.f32 %v4526_v19, %v7115_v30  ;;  %v1041_v36 = vadd.f32 %v4453_v0, %v1017_v11  ;;  %v7140_v41 = vrot.slane %v4475_v4, 7  ;;  %v7143_v48 = vld [vmem:[#allocation28_spill] sm:$0xff] }
 0x155   :  { %7139 = vst [vmem:[#allocation88_spill] sm:$0xff] %v4595_v40  ;;  %v1073_v14 = vadd.f32 %v1070_v33, %v1039_v10  ;;  %v1079_v42 = vadd.f32 %v1076_v29, %v1045_v39  ;;  %v532_v51 = vadd.f32 %v7142_v55, %v7141_v62  ;;  %v579_v31 = vmul.f32 %v7106_v9, %v7143_v48  ;;  %v7149_v39 = vld [vmem:[#allocation49_spill] sm:$0xff] }
 0x156   :  { %v1067_v45 = vsel %vm130_vm1, %v7140_v41, %v1066_v18  ;;  %v7145_v57 = vrot.slane %v7144_v12, 7  ;;  %v7147_v30 = vrot.slane %v7146_v35, 7  ;;  %v7148_v18 = vld [vmem:[#allocation58_spill] sm:$0xff]  ;;  %v1102_v29 = vrot.slane %v4602_v21, 7  ;;  %v7150_v41 = vld [vmem:[#allocation71_spill] sm:$0xff] }
 0x157   :  { %v1072_v11 = vmul.f32 %v1067_v45, %v7133_v61  ;;  %v1047_v62 = vadd.f32 %v4457_v27, %v1023_v54  ;;  %v1156_v55 = vrot.slane %v4526_v19, 1  ;;  %vm63_vm11 = vcmp.le.s32.totalorder %v55_v8, 16 }
 0x158   :  { %v1087_v0 = vsel %vm130_vm1, %v7147_v30, %v7145_v57  ;;  %v557_v48 = vadd.f32 %v7150_v41, %v532_v51  ;;  %v1078_v46 = vmul.f32 %v1067_v45, %v7134_v58  ;;  %vm76_vm12 = vmand %vm63_vm11, %vm4407_vm9  ;;  %v7151_v61 = vrot.slane %v4547_v37, 7  ;;  %v7153_v51 = vld [vmem:[#allocation21_spill] sm:$0xff] }
 0x159   :  { %v1088_v10 = vmul.f32 %v1087_v0, %v7148_v18  ;;  %v1094_v33 = vmul.f32 %v1087_v0, %v7149_v39  ;;  %v7152_v8 = vrot.slane %v7146_v35, 7  ;;  %v7154_v41 = vrot.slane %v7153_v51, 7 }
 0x15a   :  { %v1105_v0 = vsel %vm130_vm1, %v1102_v29, %v7151_v61  ;;  %v582_v40 = vadd.f32 %v579_v31, %v557_v48  ;;  %v1075_v58 = vadd.f32 %v1072_v11, %v1041_v36  ;;  %v7155_v45 = vmov 0.0   ;;  %v7160_v36 = vld [vmem:[#allocation74_spill] sm:$0xff] }
 0x15b   :  { %v1091_v57 = vadd.f32 %v1088_v10, %v1073_v14  ;;  %v1097_v30 = vadd.f32 %v1094_v33, %v1079_v42  ;;  %v1106_v27 = vmul.f32 %v1105_v0, %v6973_v60  ;;  %v1112_v54 = vmul.f32 %v1105_v0, %v3251_v38 }
 0x15c   :  { %v1085_v6 = vsel %vm130_vm1, %v7154_v41, %v7152_v8  ;;  %v4643_v14 = vsel %vm76_vm12, 1.0, %v7155_v45  ;;  %v7157_v42 = vmov %v7154_v41  ;;  %v7158_v61 = vrot.slane %v7144_v12, 7  ;;  %v4659_v41 = vpop.permute.xlu0 %1060 }
 0x15d   :  { %7156 = vst [vmem:[#allocation89_spill] sm:$0xff] %v4643_v14  ;;  %v1090_v10 = vmul.f32 %v1085_v6, %v7148_v18  ;;  %v7159_v33 = vrot.slane %v4475_v4, 1  ;;  %v607_v11 = vadd.f32 %v7160_v36, %v582_v40  ;;  %v1109_v0 = vadd.f32 %v1106_v27, %v1091_v57 }
 0x15e   :  { %v1086_v31 = vsel %vm130_vm1, %v7158_v61, %v7157_v42  ;;  %v1115_v8 = vadd.f32 %v1112_v54, %v1097_v30  ;;  %v1081_v45 = vadd.f32 %v1078_v46, %v1047_v62  ;;  %v1096_v61 = vmul.f32 %v1085_v6, %v7149_v39 }
 0x15f   :  { %v1157_v48 = vsel %vm191_vm0, %v7159_v33, %v1156_v55  ;;  %v1089_v47 = vmul.f32 %v1086_v31, %v7148_v18  ;;  %v1095_v42 = vmul.f32 %v1086_v31, %v7149_v39  ;;  %v1126_v22 = vmul.f32 %v4526_v19, %v7116_v56  ;;  %v7161_v39 = vld [vmem:[#allocation37_spill] sm:$0xff]  ;;  %v7162_v56 = vld [vmem:[#allocation36_spill] sm:$0xff] }
 0x160   :  { %v4667_v4 = vmul.f32 %v4643_v14, %v607_v11  ;;  %v1121_v33 = vadd.f32 %v4514_v3, %v1109_v0  ;;  %v1127_v40 = vadd.f32 %v4556_v49, %v1115_v8  ;;  %v1161_v57 = vmul.f32 %v1157_v48, %v6995_v59  ;;  %v2689_v11 = vld [vmem:[#allocation10 + $0x80] sm:$0xff] }
 0x161   :  { %v1167_v46 = vmul.f32 %v1157_v48, %v3237_v24  ;;  %v1093_v62 = vadd.f32 %v1090_v10, %v1075_v58  ;;  %v1101_v30 = vrot.slane %v4659_v41, 7  ;;  %v1092_v6 = vadd.f32 %v1089_v47, %v1074_v17 }
 0x162   :  { %1384 = vrot.lane.b32.xlu0 %v4667_v4, %s2764_s25  ;;  %v1133_v27 = vadd.f32 %v7161_v39, %v1121_v33  ;;  %v4678_v54 = vadd.f32 %v7162_v56, %v1127_v40  ;;  %v1098_v31 = vadd.f32 %v1095_v42, %v1080_v1  ;;  %v1144_v3 = vmul.f32 %v4602_v21, %v6987_v15 }
 0x163   :  { %v1099_v49 = vadd.f32 %v1096_v61, %v1081_v45  ;;  %v1103_v48 = vsel %vm130_vm1, %v1101_v30, %v1102_v29  ;;  %v7163_v58 = vrot.slane %v4547_v37, 7  ;;  %1390 = vrot.lane.b32.xlu1 %v4667_v4, %s2765_s2  ;;  %v1131_v0 = vmul.f32 %v2689_v11, %v7080_v43 }
 0x164   :  { %v1108_v47 = vmul.f32 %v1103_v48, %v6973_v60  ;;  %v1114_v1 = vmul.f32 %v1103_v48, %v3251_v38  ;;  %v1137_v29 = vmul.f32 %v2689_v11, %v7081_v50  ;;  %v1143_v8 = vmul.f32 %v4659_v41, %v6987_v15 }
 0x165   :  { %v1104_v10 = vsel %vm130_vm1, %v7163_v58, %v1101_v30  ;;  %v1145_v45 = vadd.f32 %v4590_v32, %v1133_v27  ;;  %v7164_v40 = vrot.slane %v7153_v51, 1  ;;  %v7165_v30 = vrot.slane %v7144_v12, 1  ;;  %v7166_v27 = vld [vmem:[#allocation72_spill] sm:$0xff] }
 0x166   :  { %v1107_v36 = vmul.f32 %v1104_v10, %v6973_v60  ;;  %v1113_v17 = vmul.f32 %v1104_v10, %v3251_v38  ;;  %v1111_v61 = vadd.f32 %v1108_v47, %v1093_v62  ;;  %1388 = vrot.lane.b32.xlu0 %v4509_v20, %s2765_s2  ;;  %v1117_v50 = vadd.f32 %v1114_v1, %v1099_v49  ;;  %v7170_v47 = vld [vmem:[#allocation38_spill] sm:$0xff] }
 0x167   :  { %v4705_v38 = vsel %vm191_vm0, %v7165_v30, %v7164_v40  ;;  %v1163_v39 = vadd.f32 %v4585_v44, %v1145_v45  ;;  %v4714_v62 = vmul.f32 %v4465_v34, %v7166_v27  ;;  %v1149_v48 = vmul.f32 %v4659_v41, %v3240_v25  ;;  %v4738_v45 = vpop.permute.xlu1 %1214  ;;  %v7172_v30 = vld [vmem:[#allocation66_spill] sm:$0xff] }
 0x168   :  { %v1110_v42 = vadd.f32 %v1107_v36, %v1092_v6  ;;  %v1116_v33 = vadd.f32 %v1113_v17, %v1098_v31  ;;  %v1178_v32 = vmul.f32 %v4705_v38, %v7106_v9  ;;  %v1123_v6 = vadd.f32 %v4600_v26, %v1111_v61 }
 0x169   :  { %v1192_v49 = vrot.slane %v4602_v21, 1  ;;  %v7167_v44 = vrot.slane %v7146_v35, 1  ;;  %v7168_v58 = vmov %v7164_v40  ;;  %1496 = vrot.lane.b32.xlu1 %v4714_v62, %s2764_s25  ;;  %v1191_v11 = vrot.slane %v4659_v41, 1 }
 0x16a   :  { %v1122_v56 = vadd.f32 %v4486_v13, %v1110_v42  ;;  %v1128_v31 = vadd.f32 %v4492_v2, %v1116_v33  ;;  %v4728_v36 = vadd.f32 %v1178_v32, %v1163_v39  ;;  %v7169_v13 = vld [vmem:[#allocation64_spill] sm:$0xff]  ;;  %v1135_v17 = vadd.f32 %v7170_v47, %v1123_v6  ;;  %v7173_v39 = vld [vmem:[#allocation70_spill] sm:$0xff]  ;;  %v4754_v32 = vpop.permute.xlu0 %1212 }
 0x16b   :  { %v1175_v10 = vsel %vm191_vm0, %v7168_v58, %v7167_v44  ;;  %v4734_v2 = vmul.f32 %v4460_v63, %v7169_v13  ;;  %v1008_v51 = vmul.f32 %v4536_v52, %v7106_v9  ;;  %v7171_v42 = vrot.slane %v4494_v53, 1 }
 0x16c   :  { %v1134_v26 = vadd.f32 %v1131_v0, %v1122_v56  ;;  %v1140_v1 = vadd.f32 %v1137_v29, %v1128_v31  ;;  %v1129_v33 = vadd.f32 %v1126_v22, %v1117_v50  ;;  %v1179_v0 = vmul.f32 %v1175_v10, %v7106_v9 }
 0x16d   :  { %v1159_v61 = vsel %vm191_vm0, %v1156_v55, %v7171_v42  ;;  %1494 = vrot.lane.b32.xlu0 %v4734_v2, %s2764_s25  ;;  %v1185_v40 = vmul.f32 %v1175_v10, %v7107_v23  ;;  %v773_v52 = vadd.f32 %v7173_v39, %v7172_v30  ;;  %v1150_v19 = vmul.f32 %v4602_v21, %v3240_v25  ;;  %v7179_v42 = vld [vmem:[#allocation53_spill] sm:$0xff] }
 0x16e   :  { %v1146_v29 = vadd.f32 %v1143_v8, %v1134_v26  ;;  %v1152_v41 = vadd.f32 %v1149_v48, %v1140_v1  ;;  %v1162_v53 = vmul.f32 %v1159_v61, %v6995_v59  ;;  %v7174_v22 = vrot.slane %v4547_v37, 1  ;;  %1500 = vrot.lane.b32.xlu1 %v4734_v2, %s2765_s2  ;;  %v7175_v8 = vld [vmem:[#allocation107_spill] sm:$0xff]  ;;  %v7181_v37 = vld [vmem:[#allocation88_spill] sm:$0xff] }
 0x16f   :  { %v794_v50 = vmul.f32 %v7175_v8, %v7106_v9  ;;  %v1147_v27 = vadd.f32 %v1144_v3, %v1135_v17  ;;  %v1193_v31 = vsel %vm191_vm0, %v1191_v11, %v1192_v49  ;;  %v7176_v48 = vld [vmem:[#allocation39_spill] sm:$0xff]  ;;  %v1225_v44 = vrot.slane %v4738_v45, 7 }
 0x170   :  { %v4763_v55 = vsel %vm191_vm0, %v1192_v49, %v7174_v22  ;;  %v1164_v56 = vadd.f32 %v1161_v57, %v1146_v29  ;;  %v1170_v6 = vadd.f32 %v1167_v46, %v1152_v41  ;;  %v1141_v25 = vadd.f32 %v7176_v48, %v1129_v33  ;;  %v4782_v46 = vpop.permute.xlu1 %1218 }
 0x171   :  { %v797_v21 = vadd.f32 %v794_v50, %v773_v52  ;;  %v1224_v58 = vrot.slane %v4754_v32, 7  ;;  %v4776_v10 = vmul.f32 %v4465_v34, %v4506_v28  ;;  %v1166_v13 = vmul.f32 %v4568_v16, %v3237_v24  ;;  %v7178_v28 = vld [vmem:[#allocation65_spill] sm:$0xff] }
 0x172   :  { %v4780_v3 = vadd.f32 %v1179_v0, %v1164_v56  ;;  %v1188_v57 = vadd.f32 %v1185_v40, %v1170_v6  ;;  %v4785_v49 = vadd.f32 %v1008_v51, %v4469_v7  ;;  %v1168_v26 = vmul.f32 %v1159_v61, %v3237_v24  ;;  %v7180_v0 = vld [vmem:[#allocation73_spill] sm:$0xff]  ;;  %v4797_v40 = vpop.permute.xlu0 %1216 }
 0x173   :  { %v7177_v47 = vmov %v7174_v22  ;;  %v821_v1 = vadd.f32 %v7178_v28, %v797_v21  ;;  %v1204_v16 = vmul.f32 %v4763_v55, %v7179_v42  ;;  %v1165_v33 = vadd.f32 %v1162_v53, %v1147_v27 }
 0x174   :  { %v1194_v17 = vsel %vm191_vm0, %v7177_v47, %v1191_v11  ;;  %v1203_v41 = vmul.f32 %v1193_v31, %v7179_v42  ;;  %v1228_v24 = vsel %vm130_vm1, %v1224_v58, %v1225_v44  ;;  %v1151_v11 = vadd.f32 %v7181_v37, %v4678_v54  ;;  %v4824_v6 = vpop.permute.xlu1 %1222 }
 0x175   :  { %v1196_v29 = vmul.f32 %v1194_v17, %v7180_v0  ;;  %v4800_v7 = vmul.f32 %v4643_v14, %v821_v1  ;;  %v1153_v51 = vadd.f32 %v1150_v19, %v1141_v25  ;;  %v1202_v61 = vmul.f32 %v1194_v17, %v7179_v42  ;;  %v7187_v25 = vld [vmem:[#allocation87_spill] sm:$0xff] }
 0x176   :  { %v1248_v30 = vrot.slane %v4782_v46, 7  ;;  %v7182_v39 = vrot.slane %v7144_v12, 1  ;;  %v7183_v52 = vrot.slane %v7146_v35, 1  ;;  %v1184_v22 = vmul.f32 %v4705_v38, %v7107_v23  ;;  %v7184_v35 = vld [vmem:[#allocation59_spill] sm:$0xff]  ;;  %v7185_v38 = vld [vmem:[#allocation26_spill] sm:$0xff] }
 0x177   :  { %1498 = vrot.lane.b32.xlu0 %v4800_v7, %s2764_s25  ;;  %1504 = vrot.lane.b32.xlu1 %v4800_v7, %s2765_s2  ;;  %v1169_v54 = vadd.f32 %v1166_v13, %v1151_v11  ;;  %v1171_v19 = vadd.f32 %v1168_v26, %v1153_v51  ;;  %v1226_v12 = vrot.slane %v4797_v40, 7  ;;  %v1206_v50 = vadd.f32 %v1203_v41, %v1188_v57 }
 0x178   :  { %v1177_v53 = vsel %vm191_vm0, %v7183_v52, %v7182_v39  ;;  %v1231_v27 = vmul.f32 %v1228_v24, %v7184_v35  ;;  %v7186_v48 = vrot.slane %v7185_v38, 7  ;;  %v7188_v21 = vrot.slane %v7187_v25, 7 }
 0x179   :  { %v1180_v8 = vmul.f32 %v1177_v53, %v7106_v9  ;;  %v1186_v56 = vmul.f32 %v1177_v53, %v7107_v23  ;;  %v1187_v26 = vadd.f32 %v1184_v22, %v1169_v54  ;;  %v1227_v17 = vsel %vm130_vm1, %v1225_v44, %v1226_v12  ;;  %v7191_v53 = vld [vmem:[#allocation25_spill] sm:$0xff] }
 0x17a   :  { %v1241_v47 = vsel %vm130_vm1, %v7188_v21, %v7186_v48  ;;  %v1229_v57 = vsel %vm130_vm1, %v1226_v12, %v1224_v58  ;;  %v1197_v23 = vmul.f32 %v1193_v31, %v7180_v0  ;;  %v1232_v42 = vmul.f32 %v1227_v17, %v7184_v35  ;;  %v7189_v31 = vld [vmem:[#allocation57_spill] sm:$0xff] }
 0x17b   :  { %v4832_v13 = vadd.f32 %v1180_v8, %v1165_v33  ;;  %v1189_v28 = vadd.f32 %v1186_v56, %v1171_v19  ;;  %v1230_v1 = vmul.f32 %v1229_v57, %v7184_v35  ;;  %v4842_v41 = vadd.f32 %v1196_v29, %v4728_v36  ;;  %1502 = vrot.lane.b32.xlu0 %v4714_v62, %s2765_s2  ;;  %v4854_v29 = vpop.permute.xlu0 %1220 }
 0x17c   :  { %v1279_v33 = vrot.slane %v4738_v45, 1  ;;  %v1205_v24 = vadd.f32 %v1202_v61, %v1187_v26  ;;  %1664 = vrot.lane.b32.xlu1 %v4776_v10, %s2764_s25  ;;  %v1250_v44 = vrot.slane %v4824_v6, 7  ;;  %v1260_v58 = vmul.f32 %v4754_v32, %v7189_v31 }
 0x17d   :  { %v1278_v37 = vrot.slane %v4754_v32, 1  ;;  %v1207_v11 = vadd.f32 %v1204_v16, %v1189_v28  ;;  %v1242_v36 = vmul.f32 %v1241_v47, %v7148_v18  ;;  %v1234_v51 = vadd.f32 %v1231_v27, %v1206_v50  ;;  %v7195_v27 = vld [vmem:[#allocation84_spill] sm:$0xff] }
 0x17e   :  { %v1233_v39 = vadd.f32 %v1230_v1, %v1205_v24  ;;  %v1253_v61 = vsel %vm130_vm1, %v1250_v44, %v1248_v30  ;;  %v7190_v52 = vmov %v7188_v21  ;;  %v7192_v22 = vrot.slane %v7191_v53, 7 }
 0x17f   :  { %v1235_v19 = vadd.f32 %v1232_v42, %v1207_v11  ;;  %v1254_v32 = vmul.f32 %v1253_v61, %v6973_v60  ;;  %v7194_v8 = vmov %v7186_v48  ;;  %v1280_v35 = vrot.slane %v4797_v40, 1  ;;  %1662 = vrot.lane.b32.xlu0 %v7195_v27, %s2764_s25  ;;  %v2690_v61 = vld [vmem:[#allocation10 + $0x98] sm:$0xff] }
 0x180   :  { %v1239_v54 = vsel %vm130_vm1, %v7192_v22, %v7190_v52  ;;  %v7193_v16 = vmov %v7192_v22  ;;  %v1245_v56 = vadd.f32 %v1242_v36, %v1233_v39  ;;  %v1249_v25 = vrot.slane %v4854_v29, 7  ;;  %1668 = vrot.lane.b32.xlu1 %v7195_v27, %s2765_s2 }
 0x181   :  { %v1240_v12 = vsel %vm130_vm1, %v7194_v8, %v7193_v16  ;;  %v1244_v50 = vmul.f32 %v1239_v54, %v7148_v18  ;;  %v1261_v21 = vmul.f32 %v4738_v45, %v7189_v31  ;;  %v1282_v47 = vsel %vm191_vm0, %v1278_v37, %v1279_v33 }
 0x182   :  { %v1243_v48 = vmul.f32 %v1240_v12, %v7148_v18  ;;  %v1272_v26 = vmul.f32 %v4782_v46, %v6987_v15  ;;  %v1257_v57 = vadd.f32 %v1254_v32, %v1245_v56  ;;  %v1251_v18 = vsel %vm130_vm1, %v1249_v25, %v1250_v44  ;;  %v7200_v12 = vld [vmem:[#allocation27_spill] sm:$0xff] }
 0x183   :  { %v1247_v17 = vadd.f32 %v1244_v50, %v1235_v19  ;;  %v1252_v1 = vsel %vm130_vm1, %v1248_v30, %v1249_v25  ;;  %v1200_v42 = vadd.f32 %v1197_v23, %v4780_v3  ;;  %v1262_v45 = vmul.f32 %v4797_v40, %v7189_v31  ;;  %v7203_v25 = vld [vmem:[#allocation43_spill] sm:$0xff] }
 0x184   :  { %v1246_v28 = vadd.f32 %v1243_v48, %v1234_v51  ;;  %v1255_v24 = vmul.f32 %v1252_v1, %v6973_v60  ;;  %v1256_v11 = vmul.f32 %v1251_v18, %v6973_v60  ;;  %v1284_v36 = vmul.f32 %v1282_v47, %v6995_v59  ;;  %v7198_v60 = vld [vmem:[#allocation83_spill] sm:$0xff] }
 0x185   :  { %v1281_v51 = vsel %vm191_vm0, %v1279_v33, %v1280_v35  ;;  %v1263_v39 = vadd.f32 %v1260_v58, %v1257_v57  ;;  %v1267_v44 = vmul.f32 %v2690_v61, %v7080_v43  ;;  %v7196_v3 = vrot.slane %v7191_v53, 1  ;;  %v7199_v33 = vld [vmem:[#allocation40_spill] sm:$0xff] }
 0x186   :  { %v1258_v52 = vadd.f32 %v1255_v24, %v1246_v28  ;;  %v1259_v30 = vadd.f32 %v1256_v11, %v1247_v17  ;;  %v7197_v23 = vrot.slane %v7185_v38, 1  ;;  %v1035_v31 = vadd.f32 %v7198_v60, %v4785_v49 }
 0x187   :  { %v1283_v22 = vsel %vm191_vm0, %v1280_v35, %v1278_v37  ;;  %v1269_v58 = vadd.f32 %v7199_v33, %v1263_v39  ;;  %v1274_v43 = vmul.f32 %v4824_v6, %v6987_v15  ;;  %v1304_v54 = vrot.slane %v4824_v6, 1 }
 0x188   :  { %v1294_v40 = vsel %vm191_vm0, %v7197_v23, %v7196_v3  ;;  %v1264_v19 = vadd.f32 %v1261_v21, %v1258_v52  ;;  %v1265_v32 = vadd.f32 %v1262_v45, %v1259_v30  ;;  %v1273_v38 = vmul.f32 %v4854_v29, %v6987_v15 }
 0x189   :  { %v1303_v16 = vrot.slane %v4854_v29, 1  ;;  %v1275_v8 = vadd.f32 %v1272_v26, %v1269_v58  ;;  %v7201_v49 = vrot.slane %v7200_v12, 1  ;;  %v7202_v50 = vmov %v7196_v3  ;;  %v7204_v26 = vld [vmem:[#allocation86_spill] sm:$0xff] }
 0x18a   :  { %v1296_v35 = vmul.f32 %v1294_v40, %v7106_v9  ;;  %v4923_v56 = vmul.f32 %v4643_v14, %v1035_v31  ;;  %v1285_v6 = vmul.f32 %v1281_v51, %v6995_v59  ;;  %v1286_v48 = vmul.f32 %v1283_v22, %v6995_v59 }
 0x18b   :  { %v1293_v37 = vsel %vm191_vm0, %v7202_v50, %v7201_v49  ;;  %v1270_v15 = vadd.f32 %v1267_v44, %v1264_v19  ;;  %v1271_v29 = vadd.f32 %v7203_v25, %v1265_v32  ;;  %v4929_v21 = vmul.f32 %v4465_v34, %v1200_v42  ;;  %v7205_v44 = vld [vmem:[#allocation47_spill] sm:$0xff] }
 0x18c   :  { %v1302_v53 = vrot.slane %v4782_v46, 1  ;;  %v1287_v47 = vadd.f32 %v1284_v36, %v1275_v8  ;;  %1666 = vrot.lane.b32.xlu0 %v4923_v56, %s2764_s25  ;;  %1672 = vrot.lane.b32.xlu1 %v4923_v56, %s2765_s2  ;;  %v1405_v17 = vrot.slane %v7204_v26, 7  ;;  %v1297_v59 = vmul.f32 %v1293_v37, %v7106_v9 }
 0x18d   :  { %v1276_v57 = vadd.f32 %v1273_v38, %v1270_v15  ;;  %v1277_v28 = vadd.f32 %v1274_v43, %v1271_v29  ;;  %v1305_v18 = vsel %vm191_vm0, %v1303_v16, %v1304_v54  ;;  %v1198_v1 = vmul.f32 %v4763_v55, %v7180_v0 }
 0x18e   :  { %v1299_v46 = vadd.f32 %v1296_v35, %v1287_v47  ;;  %v1407_v42 = vrot.slane %v4667_v4, 7  ;;  %v4945_v45 = vmul.f32 %v4460_v63, %v4842_v41  ;;  %v1406_v36 = vrot.slane %v4509_v20, 7 }
 0x18f   :  { %v1288_v24 = vadd.f32 %v1285_v6, %v1276_v57  ;;  %v1289_v11 = vadd.f32 %v1286_v48, %v1277_v28  ;;  %v1309_v51 = vmul.f32 %v1305_v18, %v7180_v0  ;;  %v1465_v55 = vrot.slane %v7204_v26, 1 }
 0x190   :  { %1670 = vrot.lane.b32.xlu0 %v4776_v10, %s2765_s2  ;;  %1886 = vrot.lane.b32.xlu1 %v4929_v21, %s2764_s25  ;;  %v4955_v9 = vsel %vm130_vm1, %v1407_v42, %v1405_v17  ;;  %v1466_v41 = vrot.slane %v4509_v20, 1  ;;  %v1306_v61 = vsel %vm191_vm0, %v1302_v53, %v1303_v16  ;;  %v4964_v30 = vsel %vm130_vm1, %v1405_v17, %v1406_v36 }
 0x191   :  { %v1300_v39 = vadd.f32 %v1297_v59, %v1288_v24  ;;  %v1301_v52 = vadd.f32 %v7205_v44, %v1289_v11  ;;  %v1201_v3 = vadd.f32 %v1198_v1, %v4832_v13  ;;  %v4973_v40 = vsel %vm130_vm1, %v1406_v36, %v1407_v42 }
 0x192   :  { %v4969_v23 = vsel %vm191_vm0, %v1465_v55, %v1466_v41  ;;  %v1308_v60 = vmul.f32 %v1306_v61, %v7180_v0  ;;  %v1467_v22 = vrot.slane %v4667_v4, 1  ;;  %v1307_v13 = vsel %vm191_vm0, %v1304_v54, %v1302_v53 }
 0x193   :  { %v1312_v31 = vadd.f32 %v1309_v51, %v1300_v39  ;;  %v4984_v33 = vmul.f32 %v4643_v14, %v1201_v3  ;;  %v1525_v19 = vrot.slane %v4734_v2, 7  ;;  %v1527_v32 = vrot.slane %v4800_v7, 7 }
 0x194   :  { %1884 = vrot.lane.b32.xlu0 %v4945_v45, %s2764_s25  ;;  %1890 = vrot.lane.b32.xlu1 %v4945_v45, %s2765_s2  ;;  %v4988_v58 = vsel %vm191_vm0, %v1466_v41, %v1467_v22  ;;  %v4992_v43 = vsel %vm191_vm0, %v1467_v22, %v1465_v55  ;;  %v1310_v38 = vmul.f32 %v1307_v13, %v7180_v0  ;;  %v1526_v8 = vrot.slane %v4714_v62, 7 }
 0x195   :  { %v1311_v16 = vadd.f32 %v1308_v60, %v1299_v46  ;;  %v5002_v54 = vmul.f32 %v4465_v34, %v1312_v31  ;;  %v5007_v12 = vsel %vm130_vm1, %v1527_v32, %v1525_v19  ;;  %v1621_v35 = vrot.slane %v4734_v2, 1 }
 0x196   :  { %v5011_v49 = vsel %vm130_vm1, %v1526_v8, %v1527_v32  ;;  %v5015_v0 = vsel %vm130_vm1, %v1525_v19, %v1526_v8  ;;  %v1313_v37 = vadd.f32 %v1310_v38, %v1301_v52  ;;  %v1622_v6 = vrot.slane %v4714_v62, 1 }
 0x197   :  { %v5022_v50 = vmul.f32 %v4460_v63, %v1311_v16  ;;  %v1623_v48 = vrot.slane %v4800_v7, 1  ;;  %v1699_v15 = vrot.slane %v7195_v27, 7  ;;  %v1701_v47 = vrot.slane %v4923_v56, 7 }
 0x198   :  { %1888 = vrot.lane.b32.xlu0 %v4984_v33, %s2764_s25  ;;  %1894 = vrot.lane.b32.xlu1 %v4984_v33, %s2765_s2  ;;  %v5034_v29 = vsel %vm191_vm0, %v1621_v35, %v1622_v6  ;;  %v5046_v17 = vmul.f32 %v4643_v14, %v1313_v37  ;;  %v1700_v28 = vrot.slane %v4776_v10, 7  ;;  %v1832_v1 = vrot.slane %v4776_v10, 1 }
 0x199   :  { %v5030_v25 = vsel %vm191_vm0, %v1622_v6, %v1623_v48  ;;  %v5038_v53 = vsel %vm191_vm0, %v1623_v48, %v1621_v35  ;;  %v5050_v57 = vsel %vm130_vm1, %v1701_v47, %v1699_v15  ;;  %v1833_v46 = vrot.slane %v4923_v56, 1 }
 0x19a   :  { %v5059_v59 = vsel %vm130_vm1, %v1700_v28, %v1701_v47  ;;  %v5063_v18 = vsel %vm130_vm1, %v1699_v15, %v1700_v28  ;;  %v1831_v24 = vrot.slane %v7195_v27, 1  ;;  %v1914_v11 = vrot.slane %v4945_v45, 7 }
 0x19b   :  { %v5071_v42 = vsel %vm191_vm0, %v1832_v1, %v1833_v46  ;;  %v1916_v36 = vrot.slane %v4984_v33, 7  ;;  %v1915_v41 = vrot.slane %v4929_v21, 7  ;;  %v2004_v52 = vrot.slane %v4945_v45, 1 }
 0x19c   :  { %1892 = vrot.lane.b32.xlu0 %v4929_v21, %s2765_s2  ;;  %2045 = vrot.lane.b32.xlu1 %v5002_v54, %s2764_s25  ;;  %v5078_v51 = vsel %vm191_vm0, %v1831_v24, %v1832_v1  ;;  %v5082_v55 = vsel %vm191_vm0, %v1833_v46, %v1831_v24  ;;  %v2005_v3 = vrot.slane %v4929_v21, 1  ;;  %v2006_v60 = vrot.slane %v4984_v33, 1 }
 0x19d   :  { %v5091_v39 = vsel %vm130_vm1, %v1916_v36, %v1914_v11  ;;  %v5095_v61 = vsel %vm130_vm1, %v1915_v41, %v1916_v36  ;;  %v5099_v44 = vsel %vm130_vm1, %v1914_v11, %v1915_v41  ;;  %v2067_v31 = vrot.slane %v5022_v50, 7 }
 0x19e   :  { %v2069_v22 = vrot.slane %v5046_v17, 7  ;;  %v2068_v13 = vrot.slane %v5002_v54, 7  ;;  %v5117_v19 = vsel %vm191_vm0, %v2005_v3, %v2006_v60  ;;  %v5121_v32 = vsel %vm191_vm0, %v2004_v52, %v2005_v3 }
 0x19f   :  { %v5125_v38 = vsel %vm191_vm0, %v2006_v60, %v2004_v52  ;;  %v2121_v35 = vrot.slane %v5022_v50, 1  ;;  %v2122_v6 = vrot.slane %v5002_v54, 1  ;;  %v2123_v48 = vrot.slane %v5046_v17, 1 }
 0x1a0   :  { %2043 = vrot.lane.b32.xlu0 %v5022_v50, %s2764_s25  ;;  %2049 = vrot.lane.b32.xlu1 %v5022_v50, %s2765_s2  ;;  %v5131_v16 = vsel %vm130_vm1, %v2069_v22, %v2067_v31  ;;  %v5135_v8 = vsel %vm130_vm1, %v2068_v13, %v2069_v22  ;;  %v5139_v37 = vsel %vm130_vm1, %v2067_v31, %v2068_v13  ;;  %v5161_v1 = vstv %s5085_s28  ;;  %s5266_s28 = sld [smem:[#allocation4 + $0x35]] }
 0x1a1   :  { %v5146_v15 = vsel %vm191_vm0, %v2122_v6, %v2123_v48  ;;  %v5150_v47 = vsel %vm191_vm0, %v2121_v35, %v2122_v6  ;;  %v5154_v28 = vsel %vm191_vm0, %v2123_v48, %v2121_v35  ;;  %v5166_v46 = vstv %s5087_s29  ;;  %s5283_s29 = sld [smem:[#allocation4 + $0x34]] }
 0x1a2   :  { %v5170_v24 = vstv %s2608_s7  ;;  %v5172_v11 = vstv %s2632_s11  ;;  %v5174_v36 = vstv %s2605_s9  ;;  %v5177_v41 = vstv %s5101_s30  ;;  %s2637_s30 = sld [smem:[#allocation4 + $0x3a]] }
 0x1a3   :  { %v5181_v52 = vstv %s2611_s10  ;;  %v5183_v3 = vstv %s2610_s12  ;;  %v5185_v60 = vstv %s2607_s13  ;;  %v5189_v31 = vmul.f32 %v5161_v1, %v7204_v26  ;;  %s6357_s7 = sld [smem:[#allocation4 + $0x40]] }
 0x1a4   :  { %2047 = vrot.lane.b32.xlu0 %v5046_v17, %s2764_s25  ;;  %2053 = vrot.lane.b32.xlu1 %v5046_v17, %s2765_s2  ;;  %v5193_v22 = vstv %s2613_s14  ;;  %v5197_v13 = vmul.f32 %v5166_v46, %v4955_v9  ;;  %v5201_v35 = vmul.f32 %v5166_v46, %v4964_v30  ;;  %v5205_v6 = vmul.f32 %v5161_v1, %v4509_v20  ;;  %s2636_s9 = sld [smem:[#allocation4 + $0x39]] }
 0x1a5   :  { %v5211_v26 = vmul.f32 %v5177_v41, %v4969_v23  ;;  %v5215_v9 = vmul.f32 %v5166_v46, %v4973_v40  ;;  %v5219_v48 = vmul.f32 %v5161_v1, %v4667_v4  ;;  %v5222_v30 = vstv %s5103_s4  ;;  %s2634_s4 = sld [smem:[#allocation4 + $0x37]] }
 0x1a6   :  { %v5226_v20 = vstv %s2617_s15  ;;  %v5228_v14 = vstv %s2614_s16  ;;  %v5230_v23 = vstv %s2620_s17  ;;  %v5233_v63 = vstv %s5105_s5  ;;  %s2640_s5 = sld [smem:[#allocation4 + $0x3d]] }
 0x1a7   :  { %7206 = vst [vmem:[#allocation91_spill] sm:$0xff] %v5211_v26  ;;  %7207 = vst [vmem:[#allocation90_spill] sm:$0xff] %v5228_v14  ;;  %v5237_v40 = vmul.f32 %v5177_v41, %v4988_v58  ;;  %v5240_v34 = vstv %s5156_s18  ;;  %v5244_v4 = vmul.f32 %v5177_v41, %v4992_v43  ;;  %v5247_v26 = vstv %s5158_s19  ;;  %s2633_s10 = sld [smem:[#allocation4 + $0x36]] }
 0x1a8   :  { %2051 = vrot.lane.b32.xlu0 %v5002_v54, %s2765_s2  ;;  %7208 = vst [vmem:[#allocation48_spill] sm:$0xff] %v5230_v23  ;;  %7209 = vst [vmem:[#allocation99_spill] sm:$0xff] %v5247_v26  ;;  %v5253_v14 = vmul.f32 %v5222_v30, %v4734_v2  ;;  %v5257_v23 = vmul.f32 %v5161_v1, %v4734_v2  ;;  %v5260_v58 = vstv %s5163_s20  ;;  %s2639_s11 = sld [smem:[#allocation4 + $0x3c]] }
 0x1a9   :  { %7212 = vst [vmem:[#allocation98_spill] sm:$0xff] %v5260_v58  ;;  %v5264_v43 = vmul.f32 %v5222_v30, %v4714_v62  ;;  %v5270_v26 = vmul.f32 %v5233_v63, %v5007_v12  ;;  %v5274_v2 = vmul.f32 %v5007_v12, %v5166_v46  ;;  %v5278_v58 = vmul.f32 %v5233_v63, %v5015_v0  ;;  %s2660_s12 = sld [smem:[#allocation9 + $0x2]] }
 0x1aa   :  { %7210 = vst [vmem:[#allocation100_spill] sm:$0xff] %v5253_v14  ;;  %7211 = vst [vmem:[#allocation97_spill] sm:$0xff] %v5257_v23  ;;  %v5281_v23 = vstv %s5111_s6  ;;  %v5291_v14 = vmul.f32 %v5015_v0, %v5166_v46  ;;  %v5295_v12 = vmul.f32 %v5011_v49, %v5166_v46  ;;  %v5313_v0 = vstv %s5127_s8  ;;  %s6355_s6 = sld [smem:[#allocation4 + $0x43]] }
 0x1ab   :  { %7213 = vst [vmem:[#allocation92_spill] sm:$0xff] %v5264_v43  ;;  %7214 = vst [vmem:[#allocation95_spill] sm:$0xff] %v5270_v26  ;;  %v5287_v43 = vmul.f32 %v5233_v63, %v5011_v49  ;;  %v5307_v26 = vmul.f32 %v5161_v1, %v4800_v7  ;;  %v5317_v49 = vmul.f32 %v5281_v23, %v5034_v29  ;;  %s6359_s8 = sld [smem:[#allocation4 + $0x46]] }
 0x1ac   :  { %7215 = vst [vmem:[#allocation93_spill] sm:$0xff] %v5274_v2  ;;  %7216 = vst [vmem:[#allocation96_spill] sm:$0xff] %v5278_v58  ;;  %v5299_v58 = vmul.f32 %v5222_v30, %v4800_v7  ;;  %v5303_v2 = vmul.f32 %v5161_v1, %v4714_v62  ;;  %v5330_v62 = vmul.f32 %v5281_v23, %v5030_v25  ;;  %s2635_s13 = sld [smem:[#allocation4 + $0x38]] }
 0x1ad   :  { %7217 = vst [vmem:[#allocation94_spill] sm:$0xff] %v5287_v43  ;;  %7218 = vst [vmem:[#allocation101_spill] sm:$0xff] %v5291_v14  ;;  %v5310_v43 = vstv %s5168_s21  ;;  %v5326_v14 = vstv %s5207_s24  ;;  %v5334_v7 = vmul.f32 %v5034_v29, %v5177_v41  ;;  %v5355_v29 = vmul.f32 %v5050_v57, %v5233_v63  ;;  %s2641_s14 = sld [smem:[#allocation4 + $0x3e]] }
 0x1ae   :  { %7219 = vst [vmem:[#allocation103_spill] sm:$0xff] %v5295_v12  ;;  %7220 = vst [vmem:[#allocation104_spill] sm:$0xff] %v5299_v58  ;;  %v5320_v12 = vstv %s5179_s22  ;;  %v5323_v58 = vstv %s5191_s23  ;;  %s6361_s15 = sld [smem:[#allocation4 + $0x4c]] }
 0x1af   :  { %7221 = vst [vmem:[#allocation102_spill] sm:$0xff] %v5303_v2  ;;  %7222 = vst [vmem:[#allocation105_spill] sm:$0xff] %v5307_v26  ;;  %v1768_v26 = vstv %s5224_s26  ;;  %s6363_s16 = sld [smem:[#allocation4 + $0x42]] }
 0x1b0   :  { %7223 = vst [vmem:[#allocation106_spill] sm:$0xff] %v5310_v43  ;;  %7224 = vst [vmem:[#allocation108_spill] sm:$0xff] %v5320_v12  ;;  %v5338_v43 = vmul.f32 %v5030_v25, %v5177_v41  ;;  %v5343_v12 = vmul.f32 %v5281_v23, %v5038_v53  ;;  %v5383_v2 = vmul.f32 %v1768_v26, %v4776_v10  ;;  %s6367_s17 = sld [smem:[#allocation4 + $0x45]] }
 0x1b1   :  { %7225 = vst [vmem:[#allocation109_spill] sm:$0xff] %v5323_v58  ;;  %7226 = vst [vmem:[#allocation111_spill] sm:$0xff] %v5326_v14  ;;  %v5347_v58 = vmul.f32 %v5038_v53, %v5177_v41  ;;  %v5351_v14 = vmul.f32 %v5313_v0, %v5050_v57  ;;  %v5370_v53 = vmul.f32 %v5222_v30, %v7195_v27  ;;  %s6371_s18 = sld [smem:[#allocation4 + $0x44]] }
 0x1b2   :  { %7227 = vst [vmem:[#allocation110_spill] sm:$0xff] %v5330_v62  ;;  %7228 = vst [vmem:[#allocation54_spill] sm:$0xff] %v5338_v43  ;;  %v5366_v62 = vstv %s5249_s27  ;;  %s6373_s19 = sld [smem:[#allocation4 + $0x49]] }
 0x1b3   :  { %7229 = vst [vmem:[#allocation112_spill] sm:$0xff] %v5343_v12  ;;  %7230 = vst [vmem:[#allocation44_spill] sm:$0xff] %v5347_v58  ;;  %v5363_v12 = vmul.f32 %v5050_v57, %v5166_v46  ;;  %v5380_v58 = vstv %s5266_s28  ;;  %v5386_v57 = vmul.f32 %v1768_v26, %v4923_v56  ;;  %s6379_s20 = sld [smem:[#allocation4 + $0x41]] }
 0x1b4   :  { %7231 = vst [vmem:[#allocation46_spill] sm:$0xff] %v5351_v14  ;;  %7232 = vst [vmem:[#allocation55_spill] sm:$0xff] %v5355_v29  ;;  %v5374_v14 = vmul.f32 %v5161_v1, %v7195_v27  ;;  %v5377_v29 = vmul.f32 %v1768_v26, %v7195_v27  ;;  %v5398_v27 = vmul.f32 %v5161_v1, %v4776_v10  ;;  %s6389_s21 = sld [smem:[#allocation4 + $0x47]] }
 0x1b5   :  { %7233 = vst [vmem:[#allocation56_spill] sm:$0xff] %v5366_v62  ;;  %7234 = vst [vmem:[#allocation45_spill] sm:$0xff] %v5370_v53  ;;  %v5390_v62 = vmul.f32 %v5222_v30, %v4776_v10  ;;  %v5394_v53 = vmul.f32 %v5222_v30, %v4923_v56  ;;  %v5419_v10 = vmul.f32 %v5063_v18, %v5233_v63  ;;  %s6401_s22 = sld [smem:[#allocation4 + $0x4b]] }
 0x1b6   :  { %7235 = vst [vmem:[#allocation33_spill] sm:$0xff] %v5374_v14  ;;  %7236 = vst [vmem:[#allocation42_spill] sm:$0xff] %v5377_v29  ;;  %v5401_v14 = vstv %s5283_s29  ;;  %v5427_v29 = vmul.f32 %v5063_v18, %v5166_v46  ;;  %s6615_s23 = sld [smem:[#allocation4 + $0x48]] }
 0x1b7   :  { %7237 = vst [vmem:[#allocation35_spill] sm:$0xff] %v5380_v58  ;;  %7238 = vst [vmem:[#allocation31_spill] sm:$0xff] %v5383_v2  ;;  %s6628_s24 = sld [smem:[#allocation4 + $0x4a]] }
 0x1b8   :  { %7239 = vst [vmem:[#allocation29_spill] sm:$0xff] %v5386_v57  ;;  %7240 = vst [vmem:[#allocation20_spill] sm:$0xff] %v5390_v62  ;;  %v5407_v57 = vmul.f32 %v5313_v0, %v5063_v18  ;;  %v5411_v62 = vmul.f32 %v5161_v1, %v4923_v56  ;;  %v5431_v56 = vmul.f32 %v5059_v59, %v5166_v46  ;;  %s6650_s26 = sld [smem:[#allocation4 + $0x4f]] }
 0x1b9   :  { %7241 = vst [vmem:[#allocation18_spill] sm:$0xff] %v5394_v53  ;;  %7242 = vst [vmem:[#allocation19_spill] sm:$0xff] %v5398_v27  ;;  %v5415_v53 = vmul.f32 %v5313_v0, %v5059_v59  ;;  %v5423_v27 = vmul.f32 %v5059_v59, %v5233_v63  ;;  %v5435_v1 = vmul.f32 %v5401_v14, %v5071_v42  ;;  %s6661_s27 = sld [smem:[#allocation4 + $0x4e]] }
 0x1ba   :  { %7243 = vst [vmem:[#allocation41_spill] sm:$0xff] %v5407_v57  ;;  %7244 = vst [vmem:[#allocation32_spill] sm:$0xff] %v5411_v62  ;;  %v5439_v62 = vmul.f32 %v5071_v42, %v5281_v23  ;;  %v5449_v18 = vmul.f32 %v5078_v51, %v5281_v23  ;;  %v5452_v59 = vmul.f32 %v1768_v26, %v4945_v45  ;;  %s6669_s28 = sld [smem:[#allocation4 + $0x4d]] }
 0x1bb   :  { %7245 = vst [vmem:[#allocation50_spill] sm:$0xff] %v5415_v53  ;;  %7246 = vst [vmem:[#allocation30_spill] sm:$0xff] %v5435_v1  ;;  %v5443_v53 = vmul.f32 %v5071_v42, %v5177_v41  ;;  %v5456_v46 = vmul.f32 %v5222_v30, %v4945_v45  ;;  %v5459_v1 = vmul.f32 %v1768_v26, %v4929_v21  ;;  %s6679_s29 = sld [smem:[#allocation4 + $0x50]] }
 0x1bc   :  { %v5357_v25 = vpop.permute.xlu1 %1382  ;;  %7248 = vst [vmem:[#allocation51_spill] sm:$0xff] %v5449_v18  ;;  %7249 = vst [vmem:[#allocation34_spill] sm:$0xff] %v5452_v59  ;;  %v5469_v18 = vmul.f32 %v5078_v51, %v5177_v41  ;;  %v5473_v59 = vmul.f32 %v5082_v55, %v5177_v41  ;;  %v5477_v45 = vmul.f32 %v5091_v39, %v5313_v0 }
 0x1bd   :  { %v1393_v58 = vrot.slane %v5357_v25, 7  ;;  %7247 = vst [vmem:[#allocation79_spill] sm:$0xff] %v5443_v53  ;;  %7250 = vst [vmem:[#allocation69_spill] sm:$0xff] %v5456_v46  ;;  %v5465_v53 = vmul.f32 %v5082_v55, %v5281_v23  ;;  %v5485_v46 = vmul.f32 %v5099_v44, %v5313_v0  ;;  %v5496_v41 = vmul.f32 %v5099_v44, %v5233_v63 }
 0x1be   :  { %7251 = vst [vmem:[#allocation16_spill] sm:$0xff] %v5459_v1  ;;  %7253 = vst [vmem:[#allocation24_spill] sm:$0xff] %v5469_v18  ;;  %v5481_v1 = vmul.f32 %v5091_v39, %v5233_v63  ;;  %v5492_v18 = vmul.f32 %v5095_v61, %v5313_v0  ;;  %v5504_v39 = vmul.f32 %v5222_v30, %v4929_v21 }
 0x1bf   :  { %7252 = vst [vmem:[#allocation63_spill] sm:$0xff] %v5465_v53  ;;  %7254 = vst [vmem:[#allocation67_spill] sm:$0xff] %v5473_v59  ;;  %v5488_v53 = vmul.f32 %v1768_v26, %v4984_v33  ;;  %v5515_v44 = vmul.f32 %v1768_v26, %v5002_v54  ;;  %v5523_v21 = vmul.f32 %v5117_v19, %v5401_v14  ;;  %v7310_v59 = vld [vmem:[#allocation46_spill] sm:$0xff] }
 0x1c0   :  { %7255 = vst [vmem:[#allocation68_spill] sm:$0xff] %v5477_v45  ;;  %7256 = vst [vmem:[#allocation81_spill] sm:$0xff] %v5481_v1  ;;  %v5500_v45 = vmul.f32 %v5095_v61, %v5233_v63  ;;  %v5519_v63 = vmul.f32 %v5121_v32, %v5401_v14  ;;  %v5527_v61 = vmul.f32 %v5117_v19, %v5281_v23 }
 0x1c1   :  { %7257 = vst [vmem:[#allocation61_spill] sm:$0xff] %v5485_v46  ;;  %7258 = vst [vmem:[#allocation60_spill] sm:$0xff] %v5488_v53  ;;  %v5509_v53 = vmul.f32 %v5222_v30, %v4984_v33  ;;  %v5530_v33 = vmul.f32 %v1768_v26, %v5046_v17  ;;  %v5536_v54 = vmul.f32 %v5121_v32, %v5281_v23 }
 0x1c2   :  { %7259 = vst [vmem:[#allocation76_spill] sm:$0xff] %v5492_v18  ;;  %7260 = vst [vmem:[#allocation75_spill] sm:$0xff] %v5496_v41  ;;  %v5512_v18 = vmul.f32 %v1768_v26, %v5022_v50  ;;  %v5549_v17 = vmul.f32 %v5139_v37, %v5313_v0  ;;  %v5553_v26 = vmul.f32 %v5135_v8, %v5313_v0 }
 0x1c3   :  { %v5359_v43 = vpop.permute.xlu0 %1380  ;;  %7261 = vst [vmem:[#allocation80_spill] sm:$0xff] %v5500_v45  ;;  %7262 = vst [vmem:[#allocation77_spill] sm:$0xff] %v5504_v39  ;;  %v5557_v32 = vmul.f32 %v5401_v14, %v5078_v51  ;;  %v5573_v51 = vmul.f32 %v5125_v38, %v5401_v14 }
 0x1c4   :  { %v1392_v2 = vrot.slane %v5359_v43, 7  ;;  %v5445_v57 = vpop.permute.xlu1 %1386  ;;  %7263 = vst [vmem:[#allocation52_spill] sm:$0xff] %v5509_v53  ;;  %7264 = vst [vmem:[#allocation78_spill] sm:$0xff] %v5512_v18  ;;  %v7289_v53 = vld [vmem:[#allocation101_spill] sm:$0xff] }
 0x1c5   :  { %7265 = vst [vmem:[#allocation17_spill] sm:$0xff] %v5515_v44  ;;  %7266 = vst [vmem:[#allocation62_spill] sm:$0xff] %v5519_v63  ;;  %v5544_v44 = vmul.f32 %v5131_v16, %v5313_v0  ;;  %v5569_v0 = vmul.f32 %v5401_v14, %v5082_v55 }
 0x1c6   :  { %v1396_v42 = vsel %vm130_vm1, %v1392_v2, %v1393_v58  ;;  %7267 = vst [vmem:[#allocation28_spill] sm:$0xff] %v5523_v21  ;;  %7268 = vst [vmem:[#allocation22_spill] sm:$0xff] %v5527_v61 }
 0x1c7   :  { %v1400_v46 = vmul.f32 %v5174_v36, %v1396_v42  ;;  %7269 = vst [vmem:[#allocation23_spill] sm:$0xff] %v5530_v33  ;;  %7270 = vst [vmem:[#allocation58_spill] sm:$0xff] %v5536_v54  ;;  %v5540_v42 = vmul.f32 %v5125_v38, %v5281_v23  ;;  %v1418_v33 = vrot.slane %v5445_v57, 7 }
 0x1c8   :  { %7272 = vst [vmem:[#allocation71_spill] sm:$0xff] %v5544_v44  ;;  %7273 = vst [vmem:[#allocation21_spill] sm:$0xff] %v5549_v17 }
 0x1c9   :  { %7271 = vst [vmem:[#allocation49_spill] sm:$0xff] %v5540_v42  ;;  %7274 = vst [vmem:[#allocation74_spill] sm:$0xff] %v5553_v26  ;;  %v1403_v23 = vadd.f32 %v1400_v46, %v5172_v11  ;;  %v1453_v46 = vrot.slane %v5357_v25, 1 }
 0x1ca   :  { %7275 = vst [vmem:[#allocation37_spill] sm:$0xff] %v5557_v32  ;;  %7276 = vst [vmem:[#allocation36_spill] sm:$0xff] %v5569_v0 }
 0x1cb   :  { %7277 = vst [vmem:[#allocation72_spill] sm:$0xff] %v5573_v51  ;;  %v1416_v51 = vadd.f32 %v5201_v35, %v1403_v23  ;;  %v1432_v35 = vmul.f32 %v5170_v24, %v5359_v43 }
 0x1d4   :  { %v1385_v41 = vpop.permute.xlu0 %1384 }
 0x1d5   :  { %v1394_v50 = vrot.slane %v1385_v41, 7  ;;  %v5532_v30 = vpop.permute.xlu1 %1390  ;;  %v1454_v38 = vrot.slane %v1385_v41, 1 }
 0x1d6   :  { %v1420_v19 = vrot.slane %v5532_v30, 7 }
 0x1d7   :  { %v1395_v16 = vsel %vm130_vm1, %v1393_v58, %v1394_v50  ;;  %v1397_v18 = vsel %vm130_vm1, %v1394_v50, %v1392_v2  ;;  %v5580_v2 = vmul.f32 %v5150_v47, %v5401_v14 }
 0x1d8   :  { %v1399_v37 = vmul.f32 %v5174_v36, %v1397_v18  ;;  %v1401_v44 = vmul.f32 %v5174_v36, %v1395_v16  ;;  %v1389_v8 = vpop.permute.xlu0 %1388  ;;  %v1423_v58 = vsel %vm130_vm1, %v1420_v19, %v1418_v33  ;;  %v1452_v18 = vrot.slane %v5359_v43, 1 }
 0x1d9   :  { %v1419_v32 = vrot.slane %v1389_v8, 7  ;;  %7278 = vst [vmem:[#allocation64_spill] sm:$0xff] %v5580_v2  ;;  %v1425_v16 = vmul.f32 %v5185_v60, %v1423_v58  ;;  %v1433_v58 = vmul.f32 %v5170_v24, %v5357_v25  ;;  %v1455_v25 = vsel %vm191_vm0, %v1453_v46, %v1454_v38 }
 0x1da   :  { %v1402_v50 = vadd.f32 %v1399_v37, %v5172_v11  ;;  %v1404_v55 = vadd.f32 %v1401_v44, %v5172_v11  ;;  %v1456_v23 = vsel %vm191_vm0, %v1452_v18, %v1453_v46 }
 0x1db   :  { %v1421_v0 = vsel %vm130_vm1, %v1419_v32, %v1420_v19  ;;  %v1422_v26 = vsel %vm130_vm1, %v1418_v33, %v1419_v32  ;;  %v5595_v44 = vpop.permute.xlu1 %1496  ;;  %v1446_v19 = vmul.f32 %v5183_v3, %v5445_v57  ;;  %v1480_v33 = vrot.slane %v5532_v30, 1 }
 0x1dc   :  { %v1415_v47 = vadd.f32 %v5197_v13, %v1402_v50  ;;  %v1417_v2 = vadd.f32 %v5215_v9, %v1404_v55  ;;  %v1426_v17 = vmul.f32 %v5185_v60, %v1422_v26  ;;  %v1427_v37 = vmul.f32 %v5185_v60, %v1421_v0 }
 0x1dd   :  { %v1434_v13 = vmul.f32 %v5170_v24, %v1385_v41  ;;  %v1478_v0 = vrot.slane %v5445_v57, 1  ;;  %v1479_v50 = vrot.slane %v1389_v8, 1  ;;  %v1457_v55 = vsel %vm191_vm0, %v1454_v38, %v1452_v18 }
 0x1de   :  { %v1428_v9 = vadd.f32 %v1425_v16, %v1415_v47  ;;  %v1429_v32 = vadd.f32 %v1426_v17, %v1416_v51  ;;  %v1430_v26 = vadd.f32 %v1427_v37, %v1417_v2  ;;  %v1448_v17 = vmul.f32 %v5183_v3, %v5532_v30 }
 0x1df   :  { %v5610_v43 = vpop.permute.xlu0 %1494  ;;  %v1483_v51 = vsel %vm191_vm0, %v1480_v33, %v1478_v0  ;;  %v1447_v57 = vmul.f32 %v5183_v3, %v1389_v8  ;;  %v1507_v2 = vrot.slane %v5595_v44, 7  ;;  %v1459_v37 = vmul.f32 %v5181_v52, %v1456_v23 }
 0x1e0   :  { %v1435_v42 = vadd.f32 %v1432_v35, %v1428_v9  ;;  %v1436_v54 = vadd.f32 %v1433_v58, %v1429_v32  ;;  %v1437_v41 = vadd.f32 %v1434_v13, %v1430_v26  ;;  %v1506_v18 = vrot.slane %v5610_v43, 7  ;;  %v5624_v38 = vpop.permute.xlu1 %1500 }
 0x1e1   :  { %v1460_v30 = vmul.f32 %v5181_v52, %v1455_v25  ;;  %v1461_v58 = vmul.f32 %v5181_v52, %v1457_v55  ;;  %v1481_v8 = vsel %vm191_vm0, %v1479_v50, %v1480_v33  ;;  %v5644_v9 = vmul.f32 %v5154_v28, %v5401_v14  ;;  %v7281_v55 = vld [vmem:[#allocation91_spill] sm:$0xff] }
 0x1e2   :  { %v1442_v46 = vadd.f32 %v5189_v31, %v1435_v42  ;;  %v1443_v16 = vadd.f32 %v5205_v6, %v1436_v54  ;;  %v1444_v47 = vadd.f32 %v5219_v48, %v1437_v41  ;;  %v1482_v6 = vsel %vm191_vm0, %v1478_v0, %v1479_v50 }
 0x1e3   :  { %v1487_v48 = vmul.f32 %v5193_v22, %v1483_v51  ;;  %v5636_v54 = vmul.f32 %v5226_v20, %v5595_v44  ;;  %v5640_v42 = vmul.f32 %v5146_v15, %v5401_v14  ;;  %7280 = vst [vmem:[#allocation66_spill] sm:$0xff] %v5644_v9  ;;  %v1510_v26 = vsel %vm130_vm1, %v1506_v18, %v1507_v2  ;;  %v7287_v9 = vld [vmem:[#allocation96_spill] sm:$0xff] }
 0x1e4   :  { %v1449_v35 = vadd.f32 %v1446_v19, %v1442_v46  ;;  %v1450_v13 = vadd.f32 %v1447_v57, %v1443_v16  ;;  %v1451_v31 = vadd.f32 %v1448_v17, %v1444_v47  ;;  %v1485_v23 = vmul.f32 %v5193_v22, %v1482_v6  ;;  %v7282_v46 = vld [vmem:[#allocation90_spill] sm:$0xff] }
 0x1e5   :  { %7279 = vst [vmem:[#allocation38_spill] sm:$0xff] %v5640_v42  ;;  %v1486_v0 = vmul.f32 %v5193_v22, %v1481_v8  ;;  %v1603_v25 = vrot.slane %v5595_v44, 1  ;;  %v1602_v50 = vrot.slane %v5610_v43, 1  ;;  %v5659_v57 = vmul.f32 %v5595_v44, %v5170_v24  ;;  %v7288_v42 = vld [vmem:[#allocation94_spill] sm:$0xff] }
 0x1e6   :  { %v1462_v19 = vadd.f32 %v1459_v37, %v1449_v35  ;;  %v1463_v33 = vadd.f32 %v1460_v30, %v1450_v13  ;;  %v1464_v32 = vadd.f32 %v1461_v58, %v1451_v31  ;;  %v1514_v16 = vmul.f32 %v7282_v46, %v1510_v26 }
 0x1e7   :  { %v1520_v47 = vmul.f32 %v1510_v26, %v5174_v36  ;;  %v1564_v37 = vmul.f32 %v5226_v20, %v5610_v43  ;;  %v1570_v31 = vmul.f32 %v5610_v43, %v5170_v24  ;;  %v1606_v6 = vsel %vm191_vm0, %v1602_v50, %v1603_v25 }
 0x1e8   :  { %v1475_v41 = vadd.f32 %v7281_v55, %v1462_v19  ;;  %v1476_v14 = vadd.f32 %v5237_v40, %v1463_v33  ;;  %v1477_v28 = vadd.f32 %v5244_v4, %v1464_v32  ;;  %v1590_v26 = vmul.f32 %v5240_v34, %v5624_v38 }
 0x1e9   :  { %v1499_v15 = vpop.permute.xlu0 %1498  ;;  %v5655_v51 = vpop.permute.xlu1 %1504  ;;  %v1523_v55 = vadd.f32 %v1520_v47, %v5172_v11  ;;  %v1615_v21 = vmul.f32 %v1606_v6, %v5181_v52 }
 0x1ea   :  { %v1508_v17 = vrot.slane %v1499_v15, 7  ;;  %v1488_v30 = vadd.f32 %v1485_v23, %v1475_v41  ;;  %v1489_v58 = vadd.f32 %v1486_v0, %v1476_v14  ;;  %v1490_v8 = vadd.f32 %v1487_v48, %v1477_v28  ;;  %v7283_v41 = vld [vmem:[#allocation48_spill] sm:$0xff] }
 0x1eb   :  { %v1604_v44 = vrot.slane %v1499_v15, 1  ;;  %v1546_v13 = vrot.slane %v5655_v51, 7  ;;  %v1596_v23 = vmul.f32 %v5624_v38, %v5183_v3  ;;  %v1609_v14 = vmul.f32 %v7283_v41, %v1606_v6 }
 0x1ec   :  { %v1509_v40 = vsel %vm130_vm1, %v1507_v2, %v1508_v17  ;;  %v1511_v4 = vsel %vm130_vm1, %v1508_v17, %v1506_v18  ;;  %v1517_v33 = vadd.f32 %v1514_v16, %v1489_v58  ;;  %v1544_v2 = vrot.slane %v5624_v38, 7  ;;  %v7284_v16 = vld [vmem:[#allocation95_spill] sm:$0xff] }
 0x1ed   :  { %v1515_v35 = vmul.f32 %v7282_v46, %v1509_v40  ;;  %v1513_v19 = vmul.f32 %v7282_v46, %v1511_v4  ;;  %v1519_v48 = vmul.f32 %v1511_v4, %v5174_v36  ;;  %v1521_v18 = vmul.f32 %v1509_v40, %v5174_v36  ;;  %v7286_v4 = vld [vmem:[#allocation99_spill] sm:$0xff] }
 0x1ee   :  { %v5688_v28 = vsel %vm191_vm0, %v1603_v25, %v1604_v44  ;;  %v1549_v17 = vsel %vm130_vm1, %v1546_v13, %v1544_v2  ;;  %v1536_v25 = vadd.f32 %v7287_v9, %v1517_v33  ;;  %v1542_v39 = vadd.f32 %v7289_v53, %v1523_v55  ;;  %v7290_v33 = vld [vmem:[#allocation103_spill] sm:$0xff]  ;;  %v7292_v55 = vld [vmem:[#allocation97_spill] sm:$0xff] }
 0x1ef   :  { %v1518_v32 = vadd.f32 %v1515_v35, %v1490_v8  ;;  %v1516_v43 = vadd.f32 %v1513_v19, %v1488_v30  ;;  %v1522_v0 = vadd.f32 %v1519_v48, %v5172_v11  ;;  %v7285_v8 = vld [vmem:[#allocation93_spill] sm:$0xff]  ;;  %v1551_v35 = vmul.f32 %v7286_v4, %v1549_v17  ;;  %v1503_v19 = vpop.permute.xlu0 %1502 }
 0x1f0   :  { %v1557_v30 = vmul.f32 %v1549_v17, %v5185_v60  ;;  %v1524_v47 = vadd.f32 %v1521_v18, %v5172_v11  ;;  %v1607_v48 = vsel %vm191_vm0, %v1604_v44, %v1602_v50  ;;  %v1572_v17 = vmul.f32 %v1499_v15, %v5170_v24 }
 0x1f1   :  { %v1535_v58 = vadd.f32 %v7284_v16, %v1516_v43  ;;  %v1541_v40 = vadd.f32 %v7285_v8, %v1522_v0  ;;  %v1537_v61 = vadd.f32 %v7288_v42, %v1518_v32  ;;  %v1640_v43 = vrot.slane %v5624_v38, 1 }
 0x1f2   :  { %v1566_v8 = vmul.f32 %v5226_v20, %v1499_v15  ;;  %v1545_v18 = vrot.slane %v1503_v19, 7  ;;  %v1610_v50 = vmul.f32 %v7283_v41, %v5688_v28  ;;  %v1611_v9 = vmul.f32 %v7283_v41, %v1607_v48 }
 0x1f3   :  { %v1554_v16 = vadd.f32 %v1551_v35, %v1535_v58  ;;  %v1560_v0 = vadd.f32 %v1557_v30, %v1541_v40  ;;  %v1642_v6 = vrot.slane %v5655_v51, 1  ;;  %v1543_v38 = vadd.f32 %v7290_v33, %v1524_v47  ;;  %v7291_v58 = vld [vmem:[#allocation100_spill] sm:$0xff] }
 0x1f4   :  { %v1547_v32 = vsel %vm130_vm1, %v1545_v18, %v1546_v13  ;;  %v1548_v15 = vsel %vm130_vm1, %v1544_v2, %v1545_v18 }
 0x1f5   :  { %v1567_v44 = vadd.f32 %v1564_v37, %v1554_v16  ;;  %v1573_v42 = vadd.f32 %v1570_v31, %v1560_v0  ;;  %v1552_v35 = vmul.f32 %v7286_v4, %v1548_v15  ;;  %v1553_v30 = vmul.f32 %v7286_v4, %v1547_v32 }
 0x1f6   :  { %v1592_v37 = vmul.f32 %v5240_v34, %v5655_v51  ;;  %v1598_v31 = vmul.f32 %v5655_v51, %v5183_v3  ;;  %v1558_v47 = vmul.f32 %v1548_v15, %v5185_v60  ;;  %v1559_v13 = vmul.f32 %v1547_v32, %v5185_v60  ;;  %v5730_v15 = vpop.permute.xlu0 %1662 }
 0x1f7   :  { %v1580_v53 = vadd.f32 %v7291_v58, %v1567_v44  ;;  %v1586_v40 = vadd.f32 %v7292_v55, %v1573_v42  ;;  %v1555_v2 = vadd.f32 %v1552_v35, %v1536_v25  ;;  %v1556_v0 = vadd.f32 %v1553_v30, %v1537_v61  ;;  %v5725_v44 = vpop.permute.xlu1 %1664 }
 0x1f8   :  { %v1645_v42 = vsel %vm191_vm0, %v1642_v6, %v1640_v43  ;;  %v1561_v33 = vadd.f32 %v1558_v47, %v1542_v39  ;;  %v1562_v58 = vadd.f32 %v1559_v13, %v1543_v38  ;;  %v1641_v55 = vrot.slane %v1503_v19, 1  ;;  %v7294_v38 = vld [vmem:[#allocation104_spill] sm:$0xff] }
 0x1f9   :  { %v1599_v16 = vadd.f32 %v1596_v23, %v1586_v40  ;;  %v1593_v18 = vadd.f32 %v1590_v26, %v1580_v53  ;;  %v1568_v45 = vadd.f32 %v5636_v54, %v1555_v2  ;;  %v1569_v51 = vadd.f32 %v1566_v8, %v1556_v0  ;;  %v7293_v53 = vld [vmem:[#allocation92_spill] sm:$0xff]  ;;  %v7295_v54 = vld [vmem:[#allocation102_spill] sm:$0xff] }
 0x1fa   :  { %v1574_v23 = vadd.f32 %v5659_v57, %v1561_v33  ;;  %v1575_v25 = vadd.f32 %v1572_v17, %v1562_v58  ;;  %v1591_v61 = vmul.f32 %v5240_v34, %v1503_v19  ;;  %v1675_v26 = vrot.slane %v5725_v44, 7  ;;  %v7298_v33 = vld [vmem:[#allocation106_spill] sm:$0xff] }
 0x1fb   :  { %v1618_v63 = vadd.f32 %v1615_v21, %v1599_v16  ;;  %v1612_v1 = vadd.f32 %v1609_v14, %v1593_v18  ;;  %v1581_v39 = vadd.f32 %v7293_v53, %v1568_v45  ;;  %v1582_v40 = vadd.f32 %v7294_v38, %v1569_v51  ;;  %v7296_v14 = vld [vmem:[#allocation105_spill] sm:$0xff]  ;;  %v7297_v16 = vld [vmem:[#allocation98_spill] sm:$0xff] }
 0x1fc   :  { %v1587_v8 = vadd.f32 %v7295_v54, %v1574_v23  ;;  %v1588_v35 = vadd.f32 %v7296_v14, %v1575_v25  ;;  %v1597_v30 = vmul.f32 %v1503_v19, %v5183_v3  ;;  %v1674_v57 = vrot.slane %v5730_v15, 7 }
 0x1fd   :  { %v1637_v32 = vadd.f32 %v5334_v7, %v1618_v63  ;;  %v1631_v21 = vadd.f32 %v5317_v49, %v1612_v1  ;;  %v1594_v17 = vadd.f32 %v1591_v61, %v1581_v39  ;;  %v1595_v47 = vadd.f32 %v1592_v37, %v1582_v40 }
 0x1fe   :  { %v1643_v13 = vsel %vm191_vm0, %v1641_v55, %v1642_v6  ;;  %v1644_v7 = vsel %vm191_vm0, %v1640_v43, %v1641_v55  ;;  %v1616_v45 = vmul.f32 %v5688_v28, %v5181_v52  ;;  %v1617_v49 = vmul.f32 %v1607_v48, %v5181_v52  ;;  %v5760_v48 = vpop.permute.xlu1 %1668  ;;  %v7299_v55 = vld [vmem:[#allocation110_spill] sm:$0xff]  ;;  %v5771_v39 = vpop.permute.xlu0 %1666 }
 0x1ff   :  { %v1600_v1 = vadd.f32 %v1597_v30, %v1587_v8  ;;  %v1601_v63 = vadd.f32 %v1598_v31, %v1588_v35  ;;  %v1649_v2 = vmul.f32 %v7297_v16, %v1645_v42  ;;  %v1655_v19 = vmul.f32 %v1645_v42, %v5193_v22  ;;  %v7300_v42 = vld [vmem:[#allocation54_spill] sm:$0xff]  ;;  %v7301_v8 = vld [vmem:[#allocation108_spill] sm:$0xff] }
 0x200   :  { %v1613_v0 = vadd.f32 %v1610_v50, %v1594_v17  ;;  %v1678_v37 = vsel %vm130_vm1, %v1674_v57, %v1675_v26  ;;  %v1647_v6 = vmul.f32 %v7297_v16, %v1644_v7  ;;  %v1648_v43 = vmul.f32 %v7297_v16, %v1643_v13 }
 0x201   :  { %v1619_v18 = vadd.f32 %v1616_v45, %v1600_v1  ;;  %v5758_v28 = vmul.f32 %v7298_v33, %v5725_v44  ;;  %v1614_v31 = vadd.f32 %v1611_v9, %v1595_v47  ;;  %v1620_v58 = vadd.f32 %v1617_v49, %v1601_v63 }
 0x202   :  { %v1632_v51 = vadd.f32 %v7299_v55, %v1613_v0  ;;  %v1653_v50 = vmul.f32 %v1644_v7, %v5193_v22  ;;  %v1654_v25 = vmul.f32 %v1643_v13, %v5193_v22  ;;  %v5768_v61 = vmul.f32 %v5725_v44, %v5226_v20  ;;  %v7303_v13 = vld [vmem:[#allocation112_spill] sm:$0xff]  ;;  %v7304_v0 = vld [vmem:[#allocation111_spill] sm:$0xff] }
 0x203   :  { %v1638_v23 = vadd.f32 %v7300_v42, %v1619_v18  ;;  %v1694_v53 = vmul.f32 %v1678_v37, %v5174_v36  ;;  %v1650_v38 = vadd.f32 %v1647_v6, %v1631_v21  ;;  %v5775_v9 = vmul.f32 %v5725_v44, %v5170_v24  ;;  %v7302_v21 = vld [vmem:[#allocation44_spill] sm:$0xff]  ;;  %v5798_v18 = vpop.permute.xlu1 %1672 }
 0x204   :  { %v1656_v40 = vadd.f32 %v1653_v50, %v1637_v32  ;;  %v6845_v54 = vrot.slane %v5725_v44, 1  ;;  %v1682_v14 = vmul.f32 %v7301_v8, %v1678_v37  ;;  %v1688_v35 = vmul.f32 %v1678_v37, %v7282_v46 }
 0x205   :  { %v1750_v30 = vmul.f32 %v7298_v33, %v5730_v15  ;;  %v1756_v17 = vmul.f32 %v5730_v15, %v5226_v20  ;;  %v1806_v47 = vrot.slane %v5730_v15, 1  ;;  %v1639_v32 = vadd.f32 %v7302_v21, %v1620_v58 }
 0x206   :  { %v1633_v7 = vadd.f32 %v7303_v13, %v1614_v31  ;;  %v1676_v45 = vrot.slane %v5771_v39, 7  ;;  %v5789_v49 = vadd.f32 %v1694_v53, %v5172_v11  ;;  %v1762_v1 = vmul.f32 %v5730_v15, %v5170_v24 }
 0x207   :  { %v5796_v37 = vmul.f32 %v7304_v0, %v5760_v48  ;;  %v1657_v6 = vadd.f32 %v1654_v25, %v1638_v23  ;;  %v1658_v58 = vadd.f32 %v1655_v19, %v1639_v32  ;;  %v1651_v50 = vadd.f32 %v1648_v43, %v1632_v51  ;;  %v7311_v51 = vld [vmem:[#allocation55_spill] sm:$0xff] }
 0x208   :  { %v1677_v31 = vsel %vm130_vm1, %v1675_v26, %v1676_v45  ;;  %v1679_v55 = vsel %vm130_vm1, %v1676_v45, %v1674_v57  ;;  %v5806_v15 = vmul.f32 %v5760_v48, %v5240_v34  ;;  %v1810_v19 = vsel %vm191_vm0, %v1806_v47, %v6845_v54  ;;  %v7308_v54 = vld [vmem:[#allocation109_spill] sm:$0xff] }
 0x209   :  { %7305 = vst [vmem:[#allocation70_spill] sm:$0xff] %v5796_v37  ;;  %v1681_v42 = vmul.f32 %v7301_v8, %v1679_v55  ;;  %v1687_v53 = vmul.f32 %v1679_v55, %v7282_v46  ;;  %v1689_v23 = vmul.f32 %v1677_v31, %v7282_v46  ;;  %v1693_v26 = vmul.f32 %v1679_v55, %v5174_v36 }
 0x20a   :  { %7306 = vst [vmem:[#allocation107_spill] sm:$0xff] %v5806_v15  ;;  %v1726_v57 = vrot.slane %v5798_v18, 7  ;;  %v5819_v43 = vmul.f32 %v5760_v48, %v5183_v3  ;;  %v1691_v32 = vadd.f32 %v1688_v35, %v1657_v6  ;;  %v1652_v13 = vadd.f32 %v1649_v2, %v1633_v7  ;;  %v7313_v6 = vld [vmem:[#allocation56_spill] sm:$0xff] }
 0x20b   :  { %v1684_v25 = vadd.f32 %v1681_v42, %v1650_v38  ;;  %v1690_v21 = vadd.f32 %v1687_v53, %v1656_v40  ;;  %v1692_v45 = vadd.f32 %v1689_v23, %v1658_v58  ;;  %v1696_v63 = vadd.f32 %v1693_v26, %v5172_v11 }
 0x20c   :  { %7307 = vst [vmem:[#allocation39_spill] sm:$0xff] %v5819_v43  ;;  %v5824_v37 = vmul.f32 %v7308_v54, %v1810_v19  ;;  %v5827_v55 = vmul.f32 %v1810_v19, %v7283_v41  ;;  %v1808_v46 = vrot.slane %v5771_v39, 1  ;;  %v1683_v43 = vmul.f32 %v7301_v8, %v1677_v31 }
 0x20d   :  { %v1709_v15 = vadd.f32 %v7310_v59, %v1684_v25  ;;  %v1715_v38 = vadd.f32 %v7311_v51, %v1690_v21  ;;  %v1721_v40 = vadd.f32 %v5363_v12, %v1696_v63  ;;  %v7312_v2 = vrot.slane %v5760_v48, 7 }
 0x20e   :  { %7309 = vst [vmem:[#allocation65_spill] sm:$0xff] %v5824_v37  ;;  %v1685_v7 = vadd.f32 %v1682_v14, %v1651_v50  ;;  %v1686_v23 = vadd.f32 %v1683_v43, %v1652_v13  ;;  %v1695_v59 = vmul.f32 %v1677_v31, %v5174_v36  ;;  %v1716_v26 = vadd.f32 %v5419_v10, %v1691_v32 }
 0x20f   :  { %v1729_v35 = vsel %vm130_vm1, %v1726_v57, %v7312_v2  ;;  %v1717_v51 = vadd.f32 %v5423_v27, %v1692_v45  ;;  %v1811_v12 = vsel %vm191_vm0, %v1808_v46, %v1806_v47  ;;  %v5847_v14 = vmul.f32 %v1810_v19, %v5181_v52  ;;  %v7317_v2 = vld [vmem:[#allocation42_spill] sm:$0xff] }
 0x210   :  { %v1731_v58 = vmul.f32 %v7313_v6, %v1729_v35  ;;  %v1737_v42 = vmul.f32 %v1729_v35, %v7286_v4  ;;  %v1743_v53 = vmul.f32 %v1729_v35, %v5185_v60  ;;  %v1752_v50 = vmul.f32 %v7298_v33, %v5771_v39 }
 0x211   :  { %v1758_v43 = vmul.f32 %v5771_v39, %v5226_v20  ;;  %v1764_v36 = vmul.f32 %v5771_v39, %v5170_v24  ;;  %v1858_v47 = vrot.slane %v5798_v18, 1  ;;  %v1698_v32 = vadd.f32 %v1695_v59, %v5172_v11  ;;  %v7319_v39 = vld [vmem:[#allocation45_spill] sm:$0xff]  ;;  %v7321_v11 = vld [vmem:[#allocation50_spill] sm:$0xff] }
 0x212   :  { %v1734_v63 = vadd.f32 %v1731_v58, %v1709_v15  ;;  %v1740_v25 = vadd.f32 %v1737_v42, %v1715_v38  ;;  %v1746_v21 = vadd.f32 %v1743_v53, %v1721_v40  ;;  %v1671_v15 = vpop.permute.xlu0 %1670  ;;  %v7314_v19 = vrot.slane %v5725_v44, 1  ;;  %v7316_v38 = vld [vmem:[#allocation41_spill] sm:$0xff] }
 0x213   :  { %v5862_v45 = vmul.f32 %v7308_v54, %v1811_v12  ;;  %v1710_v40 = vadd.f32 %v7316_v38, %v1685_v7  ;;  %v1711_v35 = vadd.f32 %v7321_v11, %v1686_v23  ;;  %v5876_v44 = vmul.f32 %v1811_v12, %v7283_v41 }
 0x214   :  { %v1753_v10 = vadd.f32 %v1750_v30, %v1734_v63  ;;  %v1759_v27 = vadd.f32 %v1756_v17, %v1740_v25  ;;  %v1765_v31 = vadd.f32 %v1762_v1, %v1746_v21  ;;  %v1809_v13 = vsel %vm191_vm0, %v7314_v19, %v1808_v46  ;;  %v7320_v17 = vld [vmem:[#allocation33_spill] sm:$0xff] }
 0x215   :  { %7315 = vst [vmem:[#allocation53_spill] sm:$0xff] %v5862_v45  ;;  %v5879_v46 = vmul.f32 %v1811_v12, %v5181_v52  ;;  %v5883_v7 = vmul.f32 %v7304_v0, %v5798_v18  ;;  %v1725_v58 = vrot.slane %v1671_v15, 7  ;;  %v5887_v42 = vmul.f32 %v5798_v18, %v5240_v34 }
 0x216   :  { %v5866_v24 = vadd.f32 %v7317_v2, %v1753_v10  ;;  %v5869_v30 = vadd.f32 %v7319_v39, %v1759_v27  ;;  %v5872_v1 = vadd.f32 %v7320_v17, %v1765_v31  ;;  %v5891_v53 = vmul.f32 %v5798_v18, %v5183_v3 }
 0x217   :  { %7322 = vst [vmem:[#allocation88_spill] sm:$0xff] %v5883_v7  ;;  %v7323_v23 = vrot.slane %v5760_v48, 1  ;;  %v1722_v12 = vadd.f32 %v5427_v29, %v5789_v49  ;;  %v1723_v63 = vadd.f32 %v5431_v56, %v1698_v32  ;;  %v1814_v25 = vmul.f32 %v7308_v54, %v1809_v13  ;;  %v7325_v49 = vld [vmem:[#allocation35_spill] sm:$0xff] }
 0x218   :  { %7318 = vst [vmem:[#allocation73_spill] sm:$0xff] %v5866_v24  ;;  %v1727_v21 = vsel %vm130_vm1, %v1725_v58, %v1726_v57  ;;  %v7324_v10 = vrot.slane %v5760_v48, 7  ;;  %v1820_v32 = vmul.f32 %v1809_v13, %v7283_v41  ;;  %v1857_v45 = vrot.slane %v1671_v15, 1 }
 0x219   :  { %v1861_v59 = vsel %vm191_vm0, %v1858_v47, %v7323_v23  ;;  %v1733_v31 = vmul.f32 %v7313_v6, %v1727_v21  ;;  %v1739_v29 = vmul.f32 %v1727_v21, %v7286_v4  ;;  %v1745_v38 = vmul.f32 %v1727_v21, %v5185_v60 }
 0x21a   :  { %v1728_v18 = vsel %vm130_vm1, %v7324_v10, %v1725_v58  ;;  %v5912_v56 = vmul.f32 %v7325_v49, %v1861_v59  ;;  %v5918_v58 = vmul.f32 %v1861_v59, %v7297_v16 }
 0x21b   :  { %v1732_v27 = vmul.f32 %v7313_v6, %v1728_v18  ;;  %v1738_v19 = vmul.f32 %v1728_v18, %v7286_v4  ;;  %v1744_v57 = vmul.f32 %v1728_v18, %v5185_v60  ;;  %v1736_v39 = vadd.f32 %v1733_v31, %v1711_v35  ;;  %v7328_v35 = vld [vmem:[#allocation29_spill] sm:$0xff]  ;;  %v7332_v31 = vld [vmem:[#allocation32_spill] sm:$0xff] }
 0x21c   :  { %7326 = vst [vmem:[#allocation59_spill] sm:$0xff] %v5912_v56  ;;  %v1742_v11 = vadd.f32 %v1739_v29, %v1717_v51  ;;  %v1748_v10 = vadd.f32 %v1745_v38, %v1723_v63  ;;  %v1789_v60 = vmul.f32 %v7304_v0, %v1671_v15  ;;  %v7327_v51 = vld [vmem:[#allocation31_spill] sm:$0xff]  ;;  %v1801_v29 = vmul.f32 %v1671_v15, %v5183_v3 }
 0x21d   :  { %v1735_v2 = vadd.f32 %v1732_v27, %v1710_v40  ;;  %v1741_v17 = vadd.f32 %v1738_v19, %v1716_v26  ;;  %v1747_v23 = vadd.f32 %v1744_v57, %v1722_v12  ;;  %v1755_v7 = vadd.f32 %v1752_v50, %v1736_v39  ;;  %v7329_v12 = vld [vmem:[#allocation20_spill] sm:$0xff]  ;;  %v7330_v27 = vld [vmem:[#allocation18_spill] sm:$0xff]  ;;  %v5931_v50 = vpop.permute.xlu1 %1886 }
 0x21e   :  { %v1761_v24 = vadd.f32 %v1758_v43, %v1742_v11  ;;  %v1767_v41 = vadd.f32 %v1764_v36, %v1748_v10  ;;  %v1795_v26 = vmul.f32 %v1671_v15, %v5240_v34  ;;  %v7331_v43 = vld [vmem:[#allocation19_spill] sm:$0xff]  ;;  %v1826_v38 = vmul.f32 %v1809_v13, %v5181_v52 }
 0x21f   :  { %v1754_v37 = vadd.f32 %v5758_v28, %v1735_v2  ;;  %v1760_v56 = vadd.f32 %v5768_v61, %v1741_v17  ;;  %v1766_v18 = vadd.f32 %v5775_v9, %v1747_v23  ;;  %v5927_v21 = vadd.f32 %v7328_v35, %v1755_v7  ;;  %v5933_v61 = vpop.permute.xlu0 %1884  ;;  %v7335_v10 = vld [vmem:[#allocation107_spill] sm:$0xff] }
 0x220   :  { %v1780_v28 = vadd.f32 %v7330_v27, %v1761_v24  ;;  %v1877_v9 = vmul.f32 %v1861_v59, %v5193_v22  ;;  %v1786_v19 = vadd.f32 %v7332_v31, %v1767_v41  ;;  %v1859_v7 = vsel %vm191_vm0, %v1857_v45, %v1858_v47 }
 0x221   :  { %v1773_v40 = vadd.f32 %v7327_v51, %v1754_v37  ;;  %v1779_v63 = vadd.f32 %v7329_v12, %v1760_v56  ;;  %v1785_v36 = vadd.f32 %v7331_v43, %v1766_v18  ;;  %v7333_v56 = vrot.slane %v5760_v48, 1  ;;  %v5968_v23 = vpop.permute.xlu1 %1890 }
 0x222   :  { %v1897_v59 = vrot.slane %v5931_v50, 7  ;;  %v1896_v39 = vrot.slane %v5933_v61, 7  ;;  %v5950_v3 = vmul.f32 %v5931_v50, %v7298_v33  ;;  %v5954_v47 = vmul.f32 %v5931_v50, %v5226_v20 }
 0x223   :  { %v1792_v37 = vadd.f32 %v1789_v60, %v1773_v40  ;;  %v1798_v57 = vadd.f32 %v1795_v26, %v1779_v63  ;;  %v1860_v24 = vsel %vm191_vm0, %v7333_v56, %v1857_v45  ;;  %v1804_v2 = vadd.f32 %v1801_v29, %v1785_v36  ;;  %v7334_v45 = vld [vmem:[#allocation30_spill] sm:$0xff]  ;;  %v5972_v60 = vpop.permute.xlu0 %1888  ;;  %v7336_v26 = vld [vmem:[#allocation79_spill] sm:$0xff] }
 0x224   :  { %v5957_v15 = vmul.f32 %v7325_v49, %v1860_v24  ;;  %v5960_v52 = vmul.f32 %v7325_v49, %v1859_v7  ;;  %v1987_v13 = vrot.slane %v5931_v50, 1  ;;  %v1869_v11 = vmul.f32 %v1860_v24, %v7297_v16  ;;  %v7337_v63 = vld [vmem:[#allocation39_spill] sm:$0xff] }
 0x225   :  { %v1817_v41 = vadd.f32 %v1814_v25, %v1792_v37  ;;  %v1823_v17 = vadd.f32 %v1820_v32, %v1798_v57  ;;  %v1829_v48 = vadd.f32 %v1826_v38, %v1804_v2  ;;  %v1797_v18 = vadd.f32 %v7335_v10, %v5869_v30  ;;  %v7341_v38 = vld [vmem:[#allocation67_spill] sm:$0xff] }
 0x226   :  { %v1870_v40 = vmul.f32 %v1859_v7, %v7297_v16  ;;  %v1900_v35 = vsel %vm130_vm1, %v1896_v39, %v1897_v59  ;;  %v1799_v12 = vadd.f32 %v5887_v42, %v1780_v28  ;;  %v1803_v27 = vadd.f32 %v7337_v63, %v5872_v1  ;;  %v7338_v1 = vld [vmem:[#allocation51_spill] sm:$0xff] }
 0x227   :  { %v5964_v25 = vadd.f32 %v7334_v45, %v1817_v41  ;;  %v1848_v32 = vadd.f32 %v5439_v62, %v1823_v17  ;;  %v1854_v51 = vadd.f32 %v7336_v26, %v1829_v48  ;;  %v1875_v62 = vmul.f32 %v1860_v24, %v5193_v22  ;;  %v6001_v17 = vpop.permute.xlu1 %1894 }
 0x228   :  { %v1805_v43 = vadd.f32 %v5891_v53, %v1786_v19  ;;  %v1822_v30 = vadd.f32 %v5827_v55, %v1797_v18  ;;  %v1876_v36 = vmul.f32 %v1859_v7, %v5193_v22  ;;  %v1950_v31 = vmul.f32 %v5933_v61, %v7298_v33  ;;  %v7339_v19 = vld [vmem:[#allocation63_spill] sm:$0xff] }
 0x229   :  { %v1824_v29 = vadd.f32 %v5876_v44, %v1799_v12  ;;  %v1898_v37 = vrot.slane %v5972_v60, 7  ;;  %v1903_v42 = vmul.f32 %v1900_v35, %v7301_v8  ;;  %v1828_v28 = vadd.f32 %v5847_v14, %v1803_v27  ;;  %v7340_v44 = vld [vmem:[#allocation24_spill] sm:$0xff] }
 0x22a   :  { %v1830_v57 = vadd.f32 %v5879_v46, %v1805_v43  ;;  %v1847_v56 = vadd.f32 %v7338_v1, %v1822_v30  ;;  %v1873_v53 = vadd.f32 %v1870_v40, %v1848_v32  ;;  %v1879_v46 = vadd.f32 %v1876_v36, %v1854_v51  ;;  %v7343_v30 = vld [vmem:[#allocation68_spill] sm:$0xff]  ;;  %v7344_v1 = vld [vmem:[#allocation81_spill] sm:$0xff] }
 0x22b   :  { %v1849_v55 = vadd.f32 %v7339_v19, %v1824_v29  ;;  %v1899_v22 = vsel %vm130_vm1, %v1897_v59, %v1898_v37  ;;  %v1901_v7 = vsel %vm130_vm1, %v1898_v37, %v1896_v39  ;;  %v1853_v24 = vadd.f32 %v7340_v44, %v1828_v28  ;;  %v7342_v39 = vld [vmem:[#allocation90_spill] sm:$0xff]  ;;  %v7346_v44 = vld [vmem:[#allocation61_spill] sm:$0xff] }
 0x22c   :  { %v1855_v2 = vadd.f32 %v7341_v38, %v1830_v57  ;;  %v1872_v41 = vadd.f32 %v1869_v11, %v1847_v56  ;;  %v1902_v14 = vmul.f32 %v1901_v7, %v7301_v8  ;;  %v1986_v48 = vrot.slane %v5933_v61, 1  ;;  %v7347_v38 = vld [vmem:[#allocation76_spill] sm:$0xff] }
 0x22d   :  { %v1874_v45 = vadd.f32 %v5918_v58, %v1849_v55  ;;  %v1904_v32 = vmul.f32 %v1899_v22, %v7301_v8  ;;  %v1878_v59 = vadd.f32 %v1875_v62, %v1853_v24  ;;  %v1908_v26 = vmul.f32 %v1901_v7, %v7342_v39  ;;  %v1893_v55 = vpop.permute.xlu0 %1892 }
 0x22e   :  { %v1880_v10 = vadd.f32 %v1877_v9, %v1855_v2  ;;  %v1905_v18 = vadd.f32 %v1902_v14, %v1872_v41  ;;  %v1909_v40 = vmul.f32 %v1900_v35, %v7342_v39  ;;  %v1932_v11 = vrot.slane %v5968_v23, 7  ;;  %v7348_v14 = vld [vmem:[#allocation75_spill] sm:$0xff] }
 0x22f   :  { %v1910_v12 = vmul.f32 %v1899_v22, %v7342_v39  ;;  %v1934_v63 = vrot.slane %v6001_v17, 7  ;;  %v1906_v51 = vadd.f32 %v1903_v42, %v1873_v53  ;;  %v1907_v27 = vadd.f32 %v1904_v32, %v1874_v45  ;;  %v7345_v22 = vld [vmem:[#allocation48_spill] sm:$0xff] }
 0x230   :  { %v1911_v43 = vadd.f32 %v1908_v26, %v1878_v59  ;;  %v1923_v58 = vadd.f32 %v7343_v30, %v1905_v18  ;;  %v1912_v36 = vadd.f32 %v1909_v40, %v1879_v46  ;;  %v1990_v9 = vsel %vm191_vm0, %v1986_v48, %v1987_v13  ;;  %v7349_v45 = vld [vmem:[#allocation80_spill] sm:$0xff]  ;;  %v7350_v30 = vld [vmem:[#allocation34_spill] sm:$0xff] }
 0x231   :  { %v1913_v62 = vadd.f32 %v1910_v12, %v1880_v10  ;;  %v1937_v35 = vsel %vm130_vm1, %v1934_v63, %v1932_v11  ;;  %v1956_v29 = vmul.f32 %v5933_v61, %v5226_v20  ;;  %v1974_v37 = vmul.f32 %v5968_v23, %v7304_v0 }
 0x232   :  { %v6024_v42 = vmul.f32 %v5968_v23, %v5240_v34  ;;  %v2022_v28 = vrot.slane %v5968_v23, 1  ;;  %v1988_v57 = vrot.slane %v5972_v60, 1  ;;  %v1929_v56 = vadd.f32 %v7344_v1, %v1911_v43  ;;  %v6072_v1 = vpop.permute.xlu0 %2043 }
 0x233   :  { %v1938_v53 = vmul.f32 %v1937_v35, %v7313_v6  ;;  %v1944_v19 = vmul.f32 %v1937_v35, %v7286_v4  ;;  %v1992_v61 = vmul.f32 %v1990_v9, %v7308_v54  ;;  %v6033_v7 = vmul.f32 %v1990_v9, %v7345_v22 }
 0x234   :  { %v1924_v24 = vadd.f32 %v7346_v44, %v1906_v51  ;;  %v1925_v2 = vadd.f32 %v7347_v38, %v1907_v27  ;;  %v1930_v46 = vadd.f32 %v7348_v14, %v1912_v36  ;;  %v1931_v32 = vadd.f32 %v7349_v45, %v1913_v62  ;;  %v6053_v27 = vpop.permute.xlu1 %2045 }
 0x235   :  { %v1941_v41 = vadd.f32 %v1938_v53, %v1923_v58  ;;  %v1947_v23 = vadd.f32 %v1944_v19, %v1929_v56  ;;  %v1952_v59 = vmul.f32 %v5972_v60, %v7298_v33  ;;  %v1958_v10 = vmul.f32 %v5972_v60, %v5226_v20 }
 0x236   :  { %v6045_v18 = vmul.f32 %v6001_v17, %v7304_v0  ;;  %v1933_v39 = vrot.slane %v1893_v55, 7  ;;  %v1989_v26 = vsel %vm191_vm0, %v1987_v13, %v1988_v57  ;;  %v1982_v51 = vmul.f32 %v6001_v17, %v5240_v34 }
 0x237   :  { %v1953_v40 = vadd.f32 %v1950_v31, %v1941_v41  ;;  %v1959_v12 = vadd.f32 %v1956_v29, %v1947_v23  ;;  %v1991_v20 = vsel %vm191_vm0, %v1988_v57, %v1986_v48  ;;  %v2024_v60 = vrot.slane %v6001_v17, 1  ;;  %v7351_v31 = vld [vmem:[#allocation69_spill] sm:$0xff] }
 0x238   :  { %v1935_v43 = vsel %vm130_vm1, %v1933_v39, %v1934_v63  ;;  %v1936_v50 = vsel %vm130_vm1, %v1932_v11, %v1933_v39  ;;  %v1993_v62 = vmul.f32 %v1989_v26, %v7308_v54  ;;  %v2023_v35 = vrot.slane %v1893_v55, 1  ;;  %v6079_v14 = vpop.permute.xlu1 %2049  ;;  %v7352_v39 = vld [vmem:[#allocation62_spill] sm:$0xff] }
 0x239   :  { %v1965_v13 = vadd.f32 %v7350_v30, %v1953_v40  ;;  %v1971_v58 = vadd.f32 %v7351_v31, %v1959_v12  ;;  %v1939_v36 = vmul.f32 %v1936_v50, %v7313_v6  ;;  %v1940_v9 = vmul.f32 %v1935_v43, %v7313_v6 }
 0x23a   :  { %v1945_v48 = vmul.f32 %v1936_v50, %v7286_v4  ;;  %v1946_v17 = vmul.f32 %v1935_v43, %v7286_v4  ;;  %v6070_v63 = vmul.f32 %v1991_v20, %v7308_v54  ;;  %v1999_v56 = vmul.f32 %v1989_v26, %v7345_v22  ;;  %v7356_v43 = vld [vmem:[#allocation52_spill] sm:$0xff] }
 0x23b   :  { %v1977_v29 = vadd.f32 %v1974_v37, %v1965_v13  ;;  %v1942_v11 = vadd.f32 %v1939_v36, %v1924_v24  ;;  %v1943_v57 = vadd.f32 %v1940_v9, %v1925_v2  ;;  %v2027_v53 = vsel %vm191_vm0, %v2024_v60, %v2022_v28  ;;  %v2048_v13 = vpop.permute.xlu0 %2047 }
 0x23c   :  { %v1948_v19 = vadd.f32 %v1945_v48, %v1930_v46  ;;  %v1949_v44 = vadd.f32 %v1946_v17, %v1931_v32  ;;  %v1975_v23 = vmul.f32 %v1893_v55, %v7304_v0  ;;  %v1981_v2 = vmul.f32 %v1893_v55, %v5240_v34  ;;  %v7353_v46 = vld [vmem:[#allocation16_spill] sm:$0xff] }
 0x23d   :  { %v1995_v38 = vadd.f32 %v1992_v61, %v1977_v29  ;;  %v1954_v41 = vadd.f32 %v5950_v3, %v1942_v11  ;;  %v1955_v4 = vadd.f32 %v1952_v59, %v1943_v57  ;;  %v2025_v45 = vsel %vm191_vm0, %v2023_v35, %v2024_v60  ;;  %v7354_v61 = vld [vmem:[#allocation60_spill] sm:$0xff]  ;;  %v7355_v59 = vld [vmem:[#allocation77_spill] sm:$0xff] }
 0x23e   :  { %v1960_v37 = vadd.f32 %v5954_v47, %v1948_v19  ;;  %v1961_v24 = vadd.f32 %v1958_v10, %v1949_v44  ;;  %v2026_v3 = vsel %vm191_vm0, %v2022_v28, %v2023_v35  ;;  %v2056_v47 = vrot.slane %v6053_v27, 7  ;;  %v7357_v19 = vld [vmem:[#allocation28_spill] sm:$0xff] }
 0x23f   :  { %v2013_v26 = vadd.f32 %v7352_v39, %v1995_v38  ;;  %v1966_v32 = vadd.f32 %v7353_v46, %v1954_v41  ;;  %v1967_v40 = vadd.f32 %v7354_v61, %v1955_v4  ;;  %v2055_v34 = vrot.slane %v6072_v1, 7  ;;  %v6127_v39 = vpop.permute.xlu0 %2051 }
 0x240   :  { %v1972_v12 = vadd.f32 %v7355_v59, %v1960_v37  ;;  %v1973_v50 = vadd.f32 %v7356_v43, %v1961_v24  ;;  %v2000_v55 = vmul.f32 %v1991_v20, %v7345_v22  ;;  %v6096_v10 = vmul.f32 %v2027_v53, %v7325_v49  ;;  %v6104_v20 = vpop.permute.xlu1 %2053  ;;  %v7359_v37 = vld [vmem:[#allocation58_spill] sm:$0xff] }
 0x241   :  { %v2036_v60 = vmul.f32 %v2027_v53, %v7297_v16  ;;  %v1978_v30 = vadd.f32 %v1975_v23, %v1966_v32  ;;  %v2028_v28 = vmul.f32 %v2026_v3, %v7325_v49  ;;  %v2035_v36 = vmul.f32 %v2025_v45, %v7297_v16 }
 0x242   :  { %v1984_v31 = vadd.f32 %v1981_v2, %v1972_v12  ;;  %v2092_v9 = vmul.f32 %v6053_v27, %v7298_v33  ;;  %v1983_v17 = vadd.f32 %v6024_v42, %v1971_v58  ;;  %v1985_v35 = vadd.f32 %v1982_v51, %v1973_v50  ;;  %v7358_v51 = vld [vmem:[#allocation22_spill] sm:$0xff]  ;;  %v7360_v2 = vld [vmem:[#allocation49_spill] sm:$0xff] }
 0x243   :  { %v1996_v48 = vadd.f32 %v1993_v62, %v1978_v30  ;;  %v2057_v22 = vrot.slane %v2048_v13, 7  ;;  %v2110_v11 = vrot.slane %v6053_v27, 1  ;;  %v2059_v57 = vsel %vm130_vm1, %v2055_v34, %v2056_v47 }
 0x244   :  { %v2002_v29 = vadd.f32 %v1999_v56, %v1984_v31  ;;  %v2109_v53 = vrot.slane %v6072_v1, 1  ;;  %v2079_v38 = vrot.slane %v6079_v14, 7  ;;  %v2001_v62 = vadd.f32 %v6033_v7, %v1983_v17 }
 0x245   :  { %v6111_v44 = vadd.f32 %v7357_v19, %v1996_v48  ;;  %v2003_v42 = vadd.f32 %v2000_v55, %v1985_v35  ;;  %v2058_v56 = vsel %vm130_vm1, %v2056_v47, %v2057_v22  ;;  %v2060_v27 = vsel %vm130_vm1, %v2057_v22, %v2055_v34 }
 0x246   :  { %v2020_v58 = vadd.f32 %v7358_v51, %v2002_v29  ;;  %v2081_v41 = vrot.slane %v6104_v20, 7  ;;  %v6122_v4 = vmul.f32 %v2025_v45, %v7325_v49  ;;  %v2034_v23 = vmul.f32 %v2026_v3, %v7297_v16 }
 0x247   :  { %v2019_v24 = vadd.f32 %v7359_v37, %v2001_v62  ;;  %v2021_v7 = vadd.f32 %v7360_v2, %v2003_v42  ;;  %v2062_v32 = vmul.f32 %v2059_v57, %v7301_v8  ;;  %v2091_v61 = vmul.f32 %v6072_v1, %v7298_v33 }
 0x248   :  { %v2038_v46 = vadd.f32 %v2035_v36, %v2020_v58  ;;  %v2113_v59 = vsel %vm191_vm0, %v2109_v53, %v2110_v11  ;;  %v2061_v43 = vmul.f32 %v2060_v27, %v7301_v8  ;;  %v2063_v16 = vmul.f32 %v2058_v56, %v7301_v8  ;;  %v7361_v36 = vld [vmem:[#allocation21_spill] sm:$0xff] }
 0x249   :  { %v2037_v12 = vadd.f32 %v2034_v23, %v2019_v24  ;;  %v2039_v45 = vadd.f32 %v2036_v60, %v2021_v7  ;;  %v1979_v3 = vadd.f32 %v6045_v18, %v1967_v40  ;;  %v2084_v47 = vsel %vm130_vm1, %v2081_v41, %v2079_v38  ;;  %v7362_v40 = vld [vmem:[#allocation71_spill] sm:$0xff]  ;;  %v7364_v27 = vld [vmem:[#allocation85_spill] sm:$0xff]  ;;  %v7366_v23 = vld [vmem:[#allocation70_spill] sm:$0xff] }
 0x24a   :  { %v2065_v50 = vadd.f32 %v2062_v32, %v2038_v46  ;;  %v2080_v34 = vrot.slane %v6127_v39, 7  ;;  %v6140_v55 = vadd.f32 %v2028_v28, %v2013_v26  ;;  %v2111_v31 = vrot.slane %v2048_v13, 1  ;;  %v7363_v26 = vld [vmem:[#allocation74_spill] sm:$0xff]  ;;  %v7368_v24 = vld [vmem:[#allocation65_spill] sm:$0xff] }
 0x24b   :  { %v2064_v1 = vadd.f32 %v2061_v43, %v2037_v12  ;;  %v2066_v30 = vadd.f32 %v2063_v16, %v2039_v45  ;;  %v2103_v60 = vmul.f32 %v6079_v14, %v7304_v0  ;;  %v2085_v35 = vmul.f32 %v2084_v47, %v7313_v6  ;;  %v7369_v7 = vld [vmem:[#allocation53_spill] sm:$0xff]  ;;  %v7370_v12 = vld [vmem:[#allocation78_spill] sm:$0xff] }
 0x24c   :  { %v2077_v48 = vadd.f32 %v7361_v36, %v2065_v50  ;;  %v2082_v8 = vsel %vm130_vm1, %v2080_v34, %v2081_v41  ;;  %v2083_v18 = vsel %vm130_vm1, %v2079_v38, %v2080_v34  ;;  %v2133_v29 = vrot.slane %v6079_v14, 1  ;;  %v7365_v14 = vld [vmem:[#allocation73_spill] sm:$0xff]  ;;  %v7374_v34 = vld [vmem:[#allocation36_spill] sm:$0xff] }
 0x24d   :  { %v2076_v17 = vadd.f32 %v7362_v40, %v2064_v1  ;;  %v2078_v28 = vadd.f32 %v7363_v26, %v2066_v30  ;;  %v2086_v22 = vmul.f32 %v2083_v18, %v7313_v6  ;;  %v2093_v57 = vmul.f32 %v2048_v13, %v7298_v33  ;;  %v7373_v50 = vld [vmem:[#allocation37_spill] sm:$0xff]  ;;  %v7375_v30 = vld [vmem:[#allocation72_spill] sm:$0xff] }
 0x24e   :  { %v2087_v19 = vmul.f32 %v2082_v8, %v7313_v6  ;;  %v1867_v62 = vadd.f32 %v5960_v52, %v5964_v25  ;;  %v2112_v38 = vsel %vm191_vm0, %v2110_v11, %v2111_v31  ;;  %v2114_v42 = vsel %vm191_vm0, %v2111_v31, %v2109_v53  ;;  %v7367_v6 = vld [vmem:[#allocation88_spill] sm:$0xff] }
 0x24f   :  { %v2088_v51 = vadd.f32 %v2085_v35, %v2076_v17  ;;  %v2089_v58 = vadd.f32 %v2086_v22, %v2077_v48  ;;  %v1791_v33 = vadd.f32 %v7366_v23, %v7365_v14  ;;  %v1793_v13 = vadd.f32 %v7367_v6, %v5927_v21  ;;  %v7371_v21 = vld [vmem:[#allocation17_spill] sm:$0xff] }
 0x250   :  { %v2090_v56 = vadd.f32 %v2087_v19, %v2078_v28  ;;  %v6163_v41 = vmul.f32 %v7364_v27, %v1867_v62  ;;  %v2105_v52 = vmul.f32 %v6104_v20, %v7304_v0  ;;  %v2135_v25 = vrot.slane %v6104_v20, 1  ;;  %v7379_v19 = vld [vmem:[#allocation64_spill] sm:$0xff] }
 0x251   :  { %v2094_v37 = vadd.f32 %v2091_v61, %v2088_v51  ;;  %v2095_v11 = vadd.f32 %v2092_v9, %v2089_v58  ;;  %v1816_v2 = vadd.f32 %v7368_v24, %v1791_v33  ;;  %v1818_v46 = vadd.f32 %v7369_v7, %v1793_v13  ;;  %v7372_v9 = vld [vmem:[#allocation23_spill] sm:$0xff]  ;;  %v7381_v58 = vld [vmem:[#allocation66_spill] sm:$0xff] }
 0x252   :  { %v2096_v53 = vadd.f32 %v2093_v57, %v2090_v56  ;;  %2199 = vrot.lane.b32.xlu1 %v6163_v41, %s2764_s25  ;;  %v1997_v32 = vadd.f32 %v6070_v63, %v1979_v3  ;;  %v2104_v43 = vmul.f32 %v6127_v39, %v7304_v0  ;;  %v2134_v20 = vrot.slane %v6127_v39, 1  ;;  %v7376_v39 = vld [vmem:[#allocation59_spill] sm:$0xff] }
 0x253   :  { %v2100_v45 = vadd.f32 %v7370_v12, %v2094_v37  ;;  %v2101_v61 = vadd.f32 %v7371_v21, %v2095_v11  ;;  %v1841_v47 = vadd.f32 %v7373_v50, %v1816_v2  ;;  %v1843_v1 = vadd.f32 %v7374_v34, %v1818_v46 }
 0x254   :  { %v2102_v16 = vadd.f32 %v7372_v9, %v2096_v53  ;;  %v2015_v31 = vadd.f32 %v7375_v30, %v1997_v32  ;;  %v2115_v36 = vmul.f32 %v2113_v59, %v7308_v54  ;;  %v2116_v63 = vmul.f32 %v2112_v38, %v7308_v54  ;;  %v7380_v38 = vld [vmem:[#allocation38_spill] sm:$0xff] }
 0x255   :  { %v2106_v3 = vadd.f32 %v2103_v60, %v2100_v45  ;;  %v2107_v48 = vadd.f32 %v2104_v43, %v2101_v61  ;;  %v2117_v8 = vmul.f32 %v2114_v42, %v7308_v54  ;;  %v1866_v0 = vadd.f32 %v5957_v15, %v1841_v47  ;;  %v7377_v60 = vld [vmem:[#allocation82_spill] sm:$0xff]  ;;  %v7378_v54 = vld [vmem:[#allocation89_spill] sm:$0xff] }
 0x256   :  { %v2108_v18 = vadd.f32 %v2105_v52, %v2102_v16  ;;  %v1868_v40 = vadd.f32 %v7376_v39, %v1843_v1  ;;  %v2032_v17 = vadd.f32 %v6122_v4, %v6111_v44  ;;  %v2138_v35 = vsel %vm191_vm0, %v2135_v25, %v2133_v29 }
 0x257   :  { %v2118_v26 = vadd.f32 %v2115_v36, %v2106_v3  ;;  %v2119_v28 = vadd.f32 %v2116_v63, %v2107_v48  ;;  %v2136_v59 = vsel %vm191_vm0, %v2134_v20, %v2135_v25  ;;  %v6198_v22 = vmul.f32 %v7377_v60, %v1866_v0 }
 0x258   :  { %v6201_v57 = vmul.f32 %v7378_v54, %v1868_v40  ;;  %v2120_v15 = vadd.f32 %v2117_v8, %v2108_v18  ;;  %v2033_v44 = vadd.f32 %v6096_v10, %v2015_v31  ;;  %v2223_v4 = vrot.slane %v6163_v41, 7 }
 0x259   :  { %v2130_v62 = vadd.f32 %v7379_v19, %v2118_v26  ;;  %v2131_v42 = vadd.f32 %v7380_v38, %v2119_v28  ;;  %v2137_v51 = vsel %vm191_vm0, %v2133_v29, %v2134_v20  ;;  %2197 = vrot.lane.b32.xlu0 %v6198_v22, %s2764_s25  ;;  %2203 = vrot.lane.b32.xlu1 %v6198_v22, %s2765_s2  ;;  %v2222_v14 = vrot.slane %v6198_v22, 7 }
 0x25a   :  { %v2132_v56 = vadd.f32 %v7381_v58, %v2120_v15  ;;  %v2224_v23 = vrot.slane %v6201_v57, 7  ;;  %v2282_v33 = vrot.slane %v6198_v22, 1  ;;  %v6219_v10 = vmul.f32 %v7377_v60, %v6140_v55 }
 0x25b   :  { %v6227_v6 = vsel %vm130_vm1, %v2222_v14, %v2223_v4  ;;  %v2283_v13 = vrot.slane %v6163_v41, 1  ;;  %v2141_v37 = vmul.f32 %v2138_v35, %v7325_v49  ;;  %v2139_v52 = vmul.f32 %v2137_v51, %v7325_v49 }
 0x25c   :  { %v6223_v29 = vsel %vm130_vm1, %v2224_v23, %v2222_v14  ;;  %v2140_v25 = vmul.f32 %v2136_v59, %v7325_v49  ;;  %v6234_v11 = vmul.f32 %v7378_v54, %v2033_v44  ;;  %v6241_v55 = vmul.f32 %v7364_v27, %v2032_v17 }
 0x25d   :  { %2201 = vrot.lane.b32.xlu0 %v6201_v57, %s2764_s25  ;;  %2207 = vrot.lane.b32.xlu1 %v6201_v57, %s2765_s2  ;;  %v6245_v53 = vsel %vm191_vm0, %v2282_v33, %v2283_v13  ;;  %v6249_v24 = vsel %vm130_vm1, %v2223_v4, %v2224_v23  ;;  %v2284_v49 = vrot.slane %v6201_v57, 1  ;;  %v2142_v2 = vadd.f32 %v2139_v52, %v2130_v62 }
 0x25e   :  { %v2143_v7 = vadd.f32 %v2140_v25, %v2131_v42  ;;  %v2144_v46 = vadd.f32 %v2141_v37, %v2132_v56  ;;  %v2336_v45 = vrot.slane %v6219_v10, 7  ;;  %v2338_v21 = vrot.slane %v6234_v11, 7 }
 0x25f   :  { %v6254_v32 = vsel %vm191_vm0, %v2283_v13, %v2284_v49  ;;  %v6258_v12 = vsel %vm191_vm0, %v2284_v49, %v2282_v33  ;;  %v2337_v61 = vrot.slane %v6241_v55, 7  ;;  %v2396_v43 = vrot.slane %v6219_v10, 1 }
 0x260   :  { %v6269_v20 = vmul.f32 %v7377_v60, %v2142_v2  ;;  %v6273_v9 = vsel %vm130_vm1, %v2338_v21, %v2336_v45  ;;  %v2397_v16 = vrot.slane %v6241_v55, 1  ;;  %v2398_v50 = vrot.slane %v6234_v11, 1 }
 0x261   :  { %2205 = vrot.lane.b32.xlu0 %v6163_v41, %s2765_s2  ;;  %2313 = vrot.lane.b32.xlu1 %v6241_v55, %s2764_s25  ;;  %v6278_v47 = vmul.f32 %v7364_v27, %v2143_v7  ;;  %v6281_v34 = vmul.f32 %v7378_v54, %v2144_v46  ;;  %v6285_v1 = vsel %vm130_vm1, %v2337_v61, %v2338_v21  ;;  %v2228_v60 = vstv %s2634_s4 }
 0x262   :  { %v6289_v30 = vsel %vm130_vm1, %v2336_v45, %v2337_v61  ;;  %v6297_v27 = vsel %vm191_vm0, %v2397_v16, %v2398_v50  ;;  %v6301_v31 = vsel %vm191_vm0, %v2396_v43, %v2397_v16  ;;  %v6305_v36 = vsel %vm191_vm0, %v2398_v50, %v2396_v43 }
 0x263   :  { %v2450_v63 = vrot.slane %v6269_v20, 7  ;;  %v2452_v3 = vrot.slane %v6281_v34, 7  ;;  %v2451_v48 = vrot.slane %v6278_v47, 7  ;;  %v2510_v8 = vrot.slane %v6269_v20, 1 }
 0x264   :  { %v2511_v18 = vrot.slane %v6278_v47, 1  ;;  %v2512_v17 = vrot.slane %v6281_v34, 1  ;;  %v2255_v54 = vstv %s2637_s30  ;;  %v6375_v15 = vstv %s2636_s9  ;;  %s2767_s30 = smov [#allocation11]  }
 0x265   :  { %2311 = vrot.lane.b32.xlu0 %v6219_v10, %s2764_s25  ;;  %2317 = vrot.lane.b32.xlu1 %v6219_v10, %s2765_s2  ;;  %v6318_v0 = vsel %vm130_vm1, %v2452_v3, %v2450_v63  ;;  %v6322_v39 = vsel %vm130_vm1, %v2451_v48, %v2452_v3  ;;  %v6326_v40 = vsel %vm130_vm1, %v2450_v63, %v2451_v48  ;;  %v6377_v19 = vstv %s2660_s12  ;;  %s2562_s4 = sshll.u32 %s2767_s30, 4  ;;  %s2563_s4 = int_to_ptr.vmem [resolvable:$true] %s2562_s4 }
 0x266   :  { %v6331_v35 = vsel %vm191_vm0, %v2511_v18, %v2512_v17  ;;  %v6335_v26 = vsel %vm191_vm0, %v2510_v8, %v2511_v18  ;;  %v6339_v28 = vsel %vm191_vm0, %v2512_v17, %v2510_v8  ;;  %v2215_v62 = vstv %s2633_s10  ;;  %p2736_p11 = scmp.lt.s32.totalorder %s2563_s4, %s2563_s4 }
 0x267   :  { %7382 = vst [vmem:[#allocation26_spill] sm:$0xff] %v6331_v35  ;;  %7383 = vst [vmem:[#allocation87_spill] sm:$0xff] %v6335_v26  ;;  %v2288_v38 = vstv %s2640_s5  ;;  %v6381_v42 = vstv %s2639_s11  ;;  %v6385_v4 = vstv %s2635_s13  ;;  %v6387_v51 = vstv %s2641_s14  ;;  %s2731_s5 = scalar_lea.vmem %s2563_s4, 384 }
 0x268   :  { %7384 = vst [vmem:[#allocation57_spill] sm:$0xff] %v6339_v28  ;;  %v6392_v58 = vmul.f32 %v2228_v60, %v6223_v29  ;;  %v2230_v56 = vmul.f32 %v2228_v60, %v6227_v6  ;;  %v6396_v14 = vmul.f32 %v2255_v54, %v6198_v22  ;;  %v6399_v23 = vmul.f32 %v2255_v54, %v6163_v41  ;;  %p2732_p10 = scmp.ne.s32.totalorder %s2563_s4, %s2731_s5  ;;  %p2737_p12 = scmp.lt.s32.totalorder %s2731_s5, %s2731_s5 }
 0x269   :  { %2315 = vrot.lane.b32.xlu0 %v6234_v11, %s2764_s25  ;;  %2321 = vrot.lane.b32.xlu1 %v6234_v11, %s2765_s2  ;;  %v6405_v13 = vmul.f32 %v2288_v38, %v6245_v53  ;;  %v2342_v29 = vstv %s6357_s7  ;;  %v2369_v37 = vstv %s6355_s6  ;;  %v2231_v22 = vmul.f32 %v2228_v60, %v6249_v24 }
 0x26a   :  { %v6415_v41 = vmul.f32 %v2255_v54, %v6201_v57  ;;  %v6418_v25 = vstv %s6363_s16  ;;  %v6425_v53 = vmul.f32 %v2288_v38, %v6254_v32  ;;  %v6428_v7 = vmul.f32 %v2288_v38, %v6258_v12  ;;  %p2738_p13 = por %p2737_p12, %p2736_p11 }
 0x26b   :  { %v2402_v46 = vstv %s6359_s8  ;;  %v6432_v45 = vstv %s6367_s17  ;;  %v6435_v21 = vstv %s6371_s18  ;;  %v6438_v57 = vmul.f32 %v2342_v29, %v6273_v9 }
 0x26c   :  { %v6441_v24 = vmul.f32 %v2369_v37, %v6219_v10  ;;  %v6446_v12 = vmul.f32 %v2342_v29, %v6289_v30  ;;  %v6449_v61 = vmul.f32 %v2342_v29, %v6285_v1  ;;  %v6452_v43 = vmul.f32 %v2369_v37, %v6241_v55  ;;  %p2739_p0 = pnand %p2738_p13, %p2732_p10 }
 0x26d   :  { %2319 = vrot.lane.b32.xlu0 %v6241_v55, %s2765_s2  ;;  %2427 = vrot.lane.b32.xlu1 %v6278_v47, %s2764_s25  ;;  %v6457_v10 = vmul.f32 %v2369_v37, %v6234_v11  ;;  %v6460_v63 = vmul.f32 %v2402_v46, %v6301_v31  ;;  %v6463_v30 = vmul.f32 %v2402_v46, %v6297_v27  ;;  %v6470_v55 = vstv %s6373_s19 }
 0x26e   :  { %v6467_v48 = vmul.f32 %v2402_v46, %v6305_v36  ;;  %v6473_v8 = vstv %s6379_s20  ;;  %v6476_v18 = vstv %s6389_s21  ;;  %v6479_v11 = vstv %s6401_s22 }
 0x26f   :  { %7385 = vst [vmem:[#allocation25_spill] sm:$0xff] %v6479_v11  ;;  %v6482_v17 = vstv %s6361_s15  ;;  %v6494_v46 = vmul.f32 %v6470_v55, %v6318_v0 }
 0x271   :  { %2425 = vrot.lane.b32.xlu0 %v6269_v20, %s2764_s25  ;;  %2431 = vrot.lane.b32.xlu1 %v6269_v20, %s2765_s2  ;;  %7386 = vst [vmem:[#allocation84_spill] sm:$0xff] %v6494_v46 }
 0x275   :  { %2429 = vrot.lane.b32.xlu0 %v6281_v34, %s2764_s25  ;;  %2435 = vrot.lane.b32.xlu1 %v6281_v34, %s2765_s2  ;;  %s2638_s25 = sld [smem:[#allocation4 + $0x3b]] }
 0x279   :  { %2433 = vrot.lane.b32.xlu0 %v6278_v47, %s2765_s2  ;;  %s6365_s2 = sld [smem:[#allocation4 + $0x3f]] }
 0x27b   :  { %v6383_v44 = vstv %s2638_s25 }
 0x27f   :  { %v6421_v49 = vstv %s6365_s2 }
 0x2c4   :  { %v6369_v59 = vpop.permute.xlu1 %2199 }
 0x2c5   :  { %v2210_v33 = vrot.slane %v6369_v59, 7 }
 0x2cb   :  { %v6409_v52 = vpop.permute.xlu0 %2197  ;;  %v6411_v6 = vpop.permute.xlu1 %2203 }
 0x2cc   :  { %v2209_v2 = vrot.slane %v6409_v52, 7  ;;  %v2235_v27 = vrot.slane %v6411_v6, 7 }
 0x2ce   :  { %v2213_v32 = vsel %vm130_vm1, %v2209_v2, %v2210_v33 }
 0x2cf   :  { %v2217_v9 = vmul.f32 %v2215_v62, %v2213_v32  ;;  %v2202_v16 = vpop.permute.xlu0 %2201  ;;  %v6454_v50 = vpop.permute.xlu1 %2207  ;;  %v6498_v32 = vmul.f32 %v6470_v55, %v6326_v40 }
 0x2d0   :  { %v2211_v3 = vrot.slane %v2202_v16, 7  ;;  %v2237_v1 = vrot.slane %v6454_v50, 7  ;;  %v2271_v28 = vrot.slane %v2202_v16, 1 }
 0x2d1   :  { %v2220_v31 = vadd.f32 %v2217_v9, %v6377_v19  ;;  %7387 = vst [vmem:[#allocation83_spill] sm:$0xff] %v6498_v32  ;;  %v2250_v9 = vmul.f32 %v6375_v15, %v6369_v59 }
 0x2d2   :  { %v2212_v60 = vsel %vm130_vm1, %v2210_v33, %v2211_v3  ;;  %v2214_v36 = vsel %vm130_vm1, %v2211_v3, %v2209_v2  ;;  %v2270_v33 = vrot.slane %v6369_v59, 1  ;;  %v2240_v2 = vsel %vm130_vm1, %v2237_v1, %v2235_v27 }
 0x2d3   :  { %v2216_v54 = vmul.f32 %v2215_v62, %v2214_v36  ;;  %v2218_v38 = vmul.f32 %v2215_v62, %v2212_v60  ;;  %v2206_v29 = vpop.permute.xlu0 %2205  ;;  %v6490_v37 = vpop.permute.xlu1 %2313  ;;  %v2269_v3 = vrot.slane %v6409_v52, 1  ;;  %v2242_v36 = vmul.f32 %v6385_v4, %v2240_v2 }
 0x2d4   :  { %v2236_v62 = vrot.slane %v2206_v29, 7  ;;  %v2233_v40 = vadd.f32 %v2230_v56, %v2220_v31  ;;  %v2263_v56 = vmul.f32 %v6383_v44, %v6411_v6  ;;  %v2297_v31 = vrot.slane %v6454_v50, 1 }
 0x2d5   :  { %v2219_v60 = vadd.f32 %v2216_v54, %v6377_v19  ;;  %v2221_v0 = vadd.f32 %v2218_v38, %v6377_v19  ;;  %v2249_v19 = vmul.f32 %v6375_v15, %v6409_v52  ;;  %v2296_v2 = vrot.slane %v2206_v29, 1 }
 0x2d6   :  { %v2238_v35 = vsel %vm130_vm1, %v2236_v62, %v2237_v1  ;;  %v2239_v59 = vsel %vm130_vm1, %v2235_v27, %v2236_v62  ;;  %v2251_v1 = vmul.f32 %v6375_v15, %v2202_v16  ;;  %v2272_v52 = vsel %vm191_vm0, %v2270_v33, %v2271_v28 }
 0x2d7   :  { %v2232_v26 = vadd.f32 %v6392_v58, %v2219_v60  ;;  %v2234_v11 = vadd.f32 %v2231_v22, %v2221_v0  ;;  %v2243_v32 = vmul.f32 %v6385_v4, %v2239_v59  ;;  %v2244_v46 = vmul.f32 %v6385_v4, %v2238_v35  ;;  %v6516_v54 = vpop.permute.xlu0 %2311  ;;  %v6524_v27 = vpop.permute.xlu1 %2317 }
 0x2d8   :  { %v2273_v35 = vsel %vm191_vm0, %v2269_v3, %v2270_v33  ;;  %v2295_v4 = vrot.slane %v6411_v6, 1  ;;  %v2265_v62 = vmul.f32 %v6383_v44, %v6454_v50  ;;  %v2274_v15 = vsel %vm191_vm0, %v2271_v28, %v2269_v3 }
 0x2d9   :  { %v2245_v58 = vadd.f32 %v2242_v36, %v2232_v26  ;;  %v2246_v22 = vadd.f32 %v2243_v32, %v2233_v40  ;;  %v2247_v38 = vadd.f32 %v2244_v46, %v2234_v11  ;;  %v2264_v46 = vmul.f32 %v6383_v44, %v2206_v29 }
 0x2da   :  { %v2300_v11 = vsel %vm191_vm0, %v2297_v31, %v2295_v4  ;;  %v2324_v6 = vrot.slane %v6490_v37, 7  ;;  %v2323_v33 = vrot.slane %v6516_v54, 7  ;;  %v2276_v3 = vmul.f32 %v6381_v42, %v2273_v35 }
 0x2db   :  { %v2252_v16 = vadd.f32 %v2249_v19, %v2245_v58  ;;  %v2253_v60 = vadd.f32 %v2250_v9, %v2246_v22  ;;  %v2254_v26 = vadd.f32 %v2251_v1, %v2247_v38  ;;  %v6535_v32 = vpop.permute.xlu0 %2315  ;;  %v2299_v9 = vsel %vm191_vm0, %v2295_v4, %v2296_v2  ;;  %v6551_v29 = vpop.permute.xlu1 %2321 }
 0x2dc   :  { %v2277_v36 = vmul.f32 %v6381_v42, %v2272_v52  ;;  %v2278_v40 = vmul.f32 %v6381_v42, %v2274_v15  ;;  %v2325_v44 = vrot.slane %v6535_v32, 7  ;;  %v2304_v1 = vmul.f32 %v6387_v51, %v2300_v11 }
 0x2dd   :  { %v2259_v0 = vadd.f32 %v6396_v14, %v2252_v16  ;;  %v2260_v50 = vadd.f32 %v6399_v23, %v2253_v60  ;;  %v2261_v28 = vadd.f32 %v6415_v41, %v2254_v26  ;;  %v2298_v23 = vsel %vm191_vm0, %v2296_v2, %v2297_v31 }
 0x2de   :  { %v2302_v58 = vmul.f32 %v6387_v51, %v2299_v9  ;;  %v2327_v22 = vsel %vm130_vm1, %v2323_v33, %v2324_v6  ;;  %v2326_v42 = vsel %vm130_vm1, %v2324_v6, %v2325_v44  ;;  %v2328_v4 = vsel %vm130_vm1, %v2325_v44, %v2323_v33 }
 0x2df   :  { %v2266_v59 = vadd.f32 %v2263_v56, %v2259_v0  ;;  %v2267_v19 = vadd.f32 %v2264_v46, %v2260_v50  ;;  %v2268_v14 = vadd.f32 %v2265_v62, %v2261_v28  ;;  %v6555_v41 = vpop.permute.xlu0 %2319  ;;  %v2303_v31 = vmul.f32 %v6387_v51, %v2298_v23  ;;  %v6577_v33 = vpop.permute.xlu1 %2427 }
 0x2e0   :  { %v2384_v2 = vrot.slane %v6490_v37, 1  ;;  %v2383_v52 = vrot.slane %v6516_v54, 1  ;;  %v2351_v62 = vrot.slane %v6551_v29, 7  ;;  %v2349_v60 = vrot.slane %v6524_v27, 7 }
 0x2e1   :  { %v2279_v38 = vadd.f32 %v2276_v3, %v2266_v59  ;;  %v2280_v35 = vadd.f32 %v2277_v36, %v2267_v19  ;;  %v2281_v56 = vadd.f32 %v2278_v40, %v2268_v14  ;;  %v2331_v11 = vmul.f32 %v6421_v49, %v2327_v22 }
 0x2e2   :  { %v2330_v46 = vmul.f32 %v6421_v49, %v2328_v4  ;;  %v2332_v51 = vmul.f32 %v6421_v49, %v2326_v42  ;;  %v2350_v6 = vrot.slane %v6555_v41, 7  ;;  %v6589_v49 = vmul.f32 %v6470_v55, %v6322_v39 }
 0x2e3   :  { %v2292_v15 = vadd.f32 %v6405_v13, %v2279_v38  ;;  %v2293_v16 = vadd.f32 %v6425_v53, %v2280_v35  ;;  %v2294_v26 = vadd.f32 %v6428_v7, %v2281_v56  ;;  %v2354_v13 = vsel %vm130_vm1, %v2351_v62, %v2349_v60  ;;  %v6581_v53 = vpop.permute.xlu0 %2425 }
 0x2e4   :  { %v2352_v7 = vsel %vm130_vm1, %v2350_v6, %v2351_v62  ;;  %v2353_v9 = vsel %vm130_vm1, %v2349_v60, %v2350_v6  ;;  %v6593_v3 = vmul.f32 %v6482_v17, %v6269_v20  ;;  %v6597_v59 = vmul.f32 %v6482_v17, %v6278_v47 }
 0x2e5   :  { %v2305_v0 = vadd.f32 %v2302_v58, %v2292_v15  ;;  %v2306_v50 = vadd.f32 %v2303_v31, %v2293_v16  ;;  %v2307_v28 = vadd.f32 %v2304_v1, %v2294_v26  ;;  %v2387_v19 = vsel %vm191_vm0, %v2383_v52, %v2384_v2 }
 0x2e6   :  { %v2385_v14 = vrot.slane %v6535_v32, 1  ;;  %v2356_v23 = vmul.f32 %v6473_v8, %v2354_v13  ;;  %v2357_v39 = vmul.f32 %v6473_v8, %v2353_v9  ;;  %v2358_v58 = vmul.f32 %v6473_v8, %v2352_v7 }
 0x2e7   :  { %v2334_v36 = vadd.f32 %v2331_v11, %v2306_v50  ;;  %v2333_v40 = vadd.f32 %v2330_v46, %v2305_v0  ;;  %v2335_v44 = vadd.f32 %v2332_v51, %v2307_v28  ;;  %v2364_v47 = vmul.f32 %v6418_v25, %v6490_v37  ;;  %v6621_v56 = vpop.permute.xlu0 %2429 }
 0x2e8   :  { %v2363_v22 = vmul.f32 %v6418_v25, %v6516_v54  ;;  %v2377_v42 = vmul.f32 %v6435_v21, %v6524_v27  ;;  %v2409_v38 = vrot.slane %v6524_v27, 1  ;;  %v2390_v37 = vmul.f32 %v6432_v45, %v2387_v19 }
 0x2e9   :  { %v2346_v55 = vadd.f32 %v6438_v57, %v2333_v40  ;;  %v2347_v20 = vadd.f32 %v6446_v12, %v2334_v36  ;;  %v2348_v1 = vadd.f32 %v6449_v61, %v2335_v44  ;;  %v6617_v57 = vpop.permute.xlu1 %2431  ;;  %v2365_v12 = vmul.f32 %v6418_v25, %v6535_v32 }
 0x2ea   :  { %v2386_v54 = vsel %vm191_vm0, %v2384_v2, %v2385_v14  ;;  %v2411_v4 = vrot.slane %v6551_v29, 1  ;;  %v2410_v27 = vrot.slane %v6555_v41, 1  ;;  %v2388_v31 = vsel %vm191_vm0, %v2385_v14, %v2383_v52 }
 0x2eb   :  { %v2359_v61 = vadd.f32 %v2356_v23, %v2346_v55  ;;  %v2360_v8 = vadd.f32 %v2357_v39, %v2347_v20  ;;  %v2361_v35 = vadd.f32 %v2358_v58, %v2348_v1  ;;  %v2379_v15 = vmul.f32 %v6435_v21, %v6551_v29  ;;  %v6664_v44 = vpop.permute.xlu0 %2433 }
 0x2ec   :  { %v2438_v16 = vrot.slane %v6577_v33, 7  ;;  %v2437_v60 = vrot.slane %v6581_v53, 7  ;;  %v2439_v2 = vrot.slane %v6621_v56, 7  ;;  %v2378_v52 = vmul.f32 %v6435_v21, %v6555_v41 }
 0x2ed   :  { %v2366_v25 = vadd.f32 %v2363_v22, %v2359_v61  ;;  %v2367_v32 = vadd.f32 %v2364_v47, %v2360_v8  ;;  %v2368_v62 = vadd.f32 %v2365_v12, %v2361_v35  ;;  %v2391_v51 = vmul.f32 %v6432_v45, %v2386_v54  ;;  %v6648_v50 = vpop.permute.xlu1 %2435 }
 0x2ee   :  { %v2392_v29 = vmul.f32 %v6432_v45, %v2388_v31  ;;  %v2414_v6 = vsel %vm191_vm0, %v2411_v4, %v2409_v38  ;;  %v2412_v0 = vsel %vm191_vm0, %v2410_v27, %v2411_v4  ;;  %v2413_v21 = vsel %vm191_vm0, %v2409_v38, %v2410_v27 }
 0x2ef   :  { %v2373_v26 = vadd.f32 %v6441_v24, %v2366_v25  ;;  %v2374_v11 = vadd.f32 %v6452_v43, %v2367_v32  ;;  %v2375_v46 = vadd.f32 %v6457_v10, %v2368_v62  ;;  %v2443_v41 = vstv %s6615_s23 }
 0x2f0   :  { %v2441_v45 = vsel %vm130_vm1, %v2437_v60, %v2438_v16  ;;  %v2440_v28 = vsel %vm130_vm1, %v2438_v16, %v2439_v2  ;;  %v2442_v13 = vsel %vm130_vm1, %v2439_v2, %v2437_v60  ;;  %v2465_v40 = vrot.slane %v6648_v50, 7 }
 0x2f1   :  { %v2380_v24 = vadd.f32 %v2377_v42, %v2373_v26  ;;  %v2381_v43 = vadd.f32 %v2378_v52, %v2374_v11  ;;  %v2382_v10 = vadd.f32 %v2379_v15, %v2375_v46  ;;  %v2418_v19 = vmul.f32 %v6476_v18, %v2414_v6  ;;  %v7389_v15 = vld [vmem:[#allocation83_spill] sm:$0xff]  ;;  %v7390_v26 = vld [vmem:[#allocation25_spill] sm:$0xff] }
 0x2f2   :  { %v2416_v14 = vmul.f32 %v6476_v18, %v2413_v21  ;;  %v2417_v23 = vmul.f32 %v6476_v18, %v2412_v0  ;;  %v2469_v39 = vstv %s6628_s24  ;;  %v2463_v1 = vrot.slane %v6617_v57, 7 }
 0x2f3   :  { %v2393_v7 = vadd.f32 %v2390_v37, %v2380_v24  ;;  %v2394_v9 = vadd.f32 %v2391_v51, %v2381_v43  ;;  %v2395_v36 = vadd.f32 %v2392_v29, %v2382_v10  ;;  %v2445_v47 = vmul.f32 %v2443_v41, %v2441_v45 }
 0x2f4   :  { %v2444_v22 = vmul.f32 %v2443_v41, %v2442_v13  ;;  %v2446_v42 = vmul.f32 %v2443_v41, %v2440_v28  ;;  %v2464_v38 = vrot.slane %v6664_v44, 7  ;;  %v2468_v8 = vsel %vm130_vm1, %v2465_v40, %v2463_v1 }
 0x2f5   :  { %v2406_v55 = vadd.f32 %v6460_v63, %v2393_v7  ;;  %v2407_v20 = vadd.f32 %v6463_v30, %v2394_v9  ;;  %v2408_v58 = vadd.f32 %v6467_v48, %v2395_v36  ;;  %v2486_v63 = vmul.f32 %v6482_v17, %v6281_v34  ;;  %v7388_v17 = vld [vmem:[#allocation84_spill] sm:$0xff] }
 0x2f6   :  { %v2516_v30 = vstv %s6650_s26  ;;  %v2466_v48 = vsel %vm130_vm1, %v2464_v38, %v2465_v40  ;;  %v2467_v35 = vsel %vm130_vm1, %v2463_v1, %v2464_v38  ;;  %v2498_v37 = vrot.slane %v6577_v33, 1 }
 0x2f7   :  { %v2419_v12 = vadd.f32 %v2416_v14, %v2406_v55  ;;  %v2420_v61 = vadd.f32 %v2417_v23, %v2407_v20  ;;  %v2421_v18 = vadd.f32 %v2418_v19, %v2408_v58  ;;  %v2497_v31 = vrot.slane %v6581_v53, 1 }
 0x2f8   :  { %v2499_v25 = vrot.slane %v6621_v56, 1  ;;  %v2470_v32 = vmul.f32 %v2469_v39, %v2468_v8  ;;  %v2471_v34 = vmul.f32 %v2469_v39, %v2467_v35  ;;  %v2472_v2 = vmul.f32 %v2469_v39, %v2466_v48 }
 0x2f9   :  { %v2448_v54 = vadd.f32 %v2445_v47, %v2420_v61  ;;  %v2447_v4 = vadd.f32 %v2444_v22, %v2419_v12  ;;  %v2449_v27 = vadd.f32 %v2446_v42, %v2421_v18  ;;  %v2478_v11 = vmul.f32 %v7390_v26, %v6577_v33 }
 0x2fa   :  { %v2503_v46 = vstv %s6661_s27  ;;  %v2477_v52 = vmul.f32 %v7390_v26, %v6581_v53  ;;  %v2490_v51 = vstv %s6669_s28  ;;  %v2479_v29 = vmul.f32 %v7390_v26, %v6621_v56 }
 0x2fb   :  { %v2460_v62 = vadd.f32 %v7388_v17, %v2447_v4  ;;  %v2461_v16 = vadd.f32 %v7389_v15, %v2448_v54  ;;  %v2462_v60 = vadd.f32 %v6589_v49, %v2449_v27  ;;  %v2501_v43 = vsel %vm191_vm0, %v2497_v31, %v2498_v37 }
 0x2fc   :  { %v2500_v49 = vsel %vm191_vm0, %v2498_v37, %v2499_v25  ;;  %v2502_v33 = vsel %vm191_vm0, %v2499_v25, %v2497_v31  ;;  %v2525_v10 = vrot.slane %v6648_v50, 1  ;;  %v2524_v45 = vrot.slane %v6664_v44, 1 }
 0x2fd   :  { %v2473_v6 = vadd.f32 %v2470_v32, %v2460_v62  ;;  %v2474_v0 = vadd.f32 %v2471_v34, %v2461_v16  ;;  %v2475_v24 = vadd.f32 %v2472_v2, %v2462_v60  ;;  %v2491_v56 = vmul.f32 %v2490_v51, %v6617_v57 }
 0x2fe   :  { %v2523_v28 = vrot.slane %v6617_v57, 1  ;;  %v2529_v13 = vstv %s6679_s29  ;;  %v2493_v7 = vmul.f32 %v2490_v51, %v6648_v50  ;;  %v2492_v19 = vmul.f32 %v2490_v51, %v6664_v44  ;;  %v7391_v50 = vld [vmem:[#allocation87_spill] sm:$0xff]  ;;  %v7393_v44 = vld [vmem:[#allocation57_spill] sm:$0xff] }
 0x2ff   :  { %v2480_v53 = vadd.f32 %v2477_v52, %v2473_v6  ;;  %v2481_v21 = vadd.f32 %v2478_v11, %v2474_v0  ;;  %v2482_v41 = vadd.f32 %v2479_v29, %v2475_v24  ;;  %v2504_v14 = vmul.f32 %v2503_v46, %v2501_v43 }
 0x300   :  { %v2506_v23 = vmul.f32 %v2503_v46, %v2502_v33  ;;  %v2528_v39 = vsel %vm191_vm0, %v2525_v10, %v2523_v28  ;;  %v2505_v55 = vmul.f32 %v2503_v46, %v2500_v49  ;;  %v2527_v57 = vsel %vm191_vm0, %v2523_v28, %v2524_v45 }
 0x301   :  { %v2487_v9 = vadd.f32 %v6593_v3, %v2480_v53  ;;  %v2488_v36 = vadd.f32 %v6597_v59, %v2481_v21  ;;  %v2489_v40 = vadd.f32 %v2486_v63, %v2482_v41  ;;  %v2517_v47 = vmul.f32 %v2516_v30, %v7391_v50  ;;  %v7392_v3 = vld [vmem:[#allocation26_spill] sm:$0xff] }
 0x302   :  { %v2518_v22 = vmul.f32 %v2516_v30, %v7392_v3  ;;  %v2526_v59 = vsel %vm191_vm0, %v2524_v45, %v2525_v10  ;;  %v2519_v42 = vmul.f32 %v2516_v30, %v7393_v44  ;;  %v2532_v18 = vmul.f32 %v2529_v13, %v2528_v39 }
 0x303   :  { %v2494_v20 = vadd.f32 %v2491_v56, %v2487_v9  ;;  %v2495_v1 = vadd.f32 %v2492_v19, %v2488_v36  ;;  %v2496_v58 = vadd.f32 %v2493_v7, %v2489_v40  ;;  %v2530_v8 = vmul.f32 %v2529_v13, %v2527_v57 }
 0x304   :  { %v2531_v35 = vmul.f32 %v2529_v13, %v2526_v59 }
 0x305   :  { %v2507_v38 = vadd.f32 %v2504_v14, %v2494_v20  ;;  %v2508_v12 = vadd.f32 %v2505_v55, %v2495_v1  ;;  %v2509_v61 = vadd.f32 %v2506_v23, %v2496_v58 }
 0x307   :  { %v2520_v63 = vadd.f32 %v2517_v47, %v2507_v38  ;;  %v2521_v48 = vadd.f32 %v2518_v22, %v2508_v12  ;;  %v2522_v37 = vadd.f32 %v2519_v42, %v2509_v61 }
 0x309   :  { %v2533_v54 = vadd.f32 %v2530_v8, %v2520_v63  ;;  %v2534_v4 = vadd.f32 %v2531_v35, %v2521_v48  ;;  %v2535_v27 = vadd.f32 %v2532_v18, %v2522_v37 }
 0x30b   :  { %v2661_v31 = vmul.f32 -1.442695, %v2533_v54  ;;  %v2662_v25 = vmul.f32 -1.442695, %v2534_v4  ;;  %v2663_v32 = vmul.f32 -1.442695, %v2535_v27 }
 0x30d   :  { %2673 = vpow2.f32 %v2661_v31 }
 0x30e   :  { %2675 = vpow2.f32 %v2662_v25 }
 0x30f   :  { %2677 = vpow2.f32 %v2663_v32 }
 0x31a   :  { %v2674_v5 = vpop.eup %2673 }
 0x31b   :  { %v2676_v30 = vpop.eup %2675  ;;  %v2545_v34 = vadd.f32 1.0, %v2674_v5 }
 0x31c   :  { %v2678_v17 = vpop.eup %2677  ;;  %v2546_v62 = vadd.f32 1.0, %v2676_v30 }
 0x31d   :  { %v2547_v15 = vadd.f32 1.0, %v2678_v17  ;;  %2679 = vrcp.f32 %v2545_v34 }
 0x31e   :  { %2681 = vrcp.f32 %v2546_v62 }
 0x31f   :  { %2683 = vrcp.f32 %v2547_v15 }
 0x32a   :  { %v2680_v16 = vpop.eup %2679 }
 0x32b   :  { %v2682_v60 = vpop.eup %2681  ;;  %2554 = vst [vmem:[#allocation11] sm:$0xff] %v2680_v16 }
 0x32c   :  { %v2684_v2 = vpop.eup %2683  ;;  %2555 = vst [vmem:[#allocation11 + $0x8] sm:$0xff] %v2682_v60 }
 0x32d   :  { %2556 = vst [vmem:[#allocation11 + $0x10] sm:$0xff] %v2684_v2 }
 0x32e   :  { %2742 = shalt.err (!%p2739_p0)
}
 0x32f   :  { %2568 = dma.vmem_to_hbm [thread:$0]  %s2563_s4, 384, %s6735_s3, [#allocation6], %s2762_s0, %s2762_s0, %s2763_s1  }
 0x330   :  { %2757 = dma.done.wait [#allocation6], 384  }
 0x331   :  { %2758 = vsyncadd [#allocation6], 4294966912 }
 0x332   :  { %2572 = vsyncpa [#allocation5], 1 }
 0x333   :  { %2573 = vsyncpa [#allocation6], 1 }
 0x334   :  { %2574 = vsyncpa [#allocation7], 1 }
 0x335   :  { %2575 = vsyncpa [#allocation8], 1 }

</bundles_post_ra>
